<compile_context>
chip_gen: v5e
topology: v5e:2x2
jax: 0.10.0
libtpu: 0.0.40
codegen_flags: <defaults>
</compile_context>

<pallas_src>
import jax
import jax.numpy as jnp
from jax import lax
from jax.experimental import pallas as pl
from jax.experimental.pallas import tpu as pltpu

# ---- model configuration (hidden_dim=32 keeps shapes small) -----------------------
LIB_SIZE = 20            # embedding has LIB_SIZE + 1 rows
HIDDEN = 32              # hidden_dim
H2 = HIDDEN // 2
H4 = HIDDEN // 4
K = 5                    # num_components
OUT_W = 6 * K + 2        # 32: [wl(10) | means(10) | kappas(10) | sasa,flex(2)]
EMB_PAD = 128            # embedding table padded to 128 rows (lane-dense one-hot gather)
BN_EPS = 1e-5
N_GIN = 3

# ---- batching ---------------------------------------------------------------------
N_NODES = 16             # nodes per graph
N_EDGES = 30             # edges per graph
GRAPHS = 32              # graphs per forward call
GRAPHS_PER_TILE = 16     # 16*16 = 256-row node tiles (v6e/v7x MXU); use 8 -> 128 rows on v5e

# ---- packed parameter slab layout ([P_ROWS, 128] f32, one DMA, 8-row aligned) ------
OFF_EMB = 0                                   # [128, 32]
OFF_GIN = OFF_EMB + EMB_PAD                   # per layer: w1[32,32] | w2[32,32] | b1,s,t,b2
GIN_STRIDE = 2 * HIDDEN + 8                   # 72 rows per layer
OFF_HV_W1 = OFF_GIN + N_GIN * GIN_STRIDE      # [32, 16]
OFF_HV_W2 = OFF_HV_W1 + HIDDEN                # [16, 16]
OFF_HV_V = OFF_HV_W2 + H2                     # rows: b1, s1, t1, b2, s2, t2
OFF_HVAL_W1 = OFF_HV_V + 8                    # [32, 8]
OFF_HVAL_V1 = OFF_HVAL_W1 + HIDDEN            # rows: b1, s1, t1
OFF_FC_W = OFF_HVAL_V1 + 8                    # [16, 32] fused (wl | means | kappas | 0)
OFF_VAL_W = OFF_FC_W + H2                     # [8, 32]  (0 ... | hval_w2 * bn_scale)
OFF_FC_B = OFF_VAL_W + 8                      # 1 row fused bias
P_ROWS = OFF_FC_B + 8                         # 472 rows  (~242 KiB)


# ---- Pallas kernel ------------------------------------------------------------------
def _sweetnet_kernel(ids_ref, a_ref, p_ref, out_ref):
    f32 = jnp.float32
    m = out_ref.shape[0]                                   # node-tile rows

    # ---- embedding gather as one-hot matmul (MXU, no XLA gather / x0 round-trip) ----
    ids = ids_ref[...]                                     # [m, 1] int32
    lane = lax.broadcasted_iota(jnp.int32, (m, EMB_PAD), 1)
    onehot = (lane == ids).astype(f32)                     # [m, 128]
    emb = p_ref[OFF_EMB:OFF_EMB + EMB_PAD, 0:HIDDEN]       # [128, 32]
    x = jnp.dot(onehot, emb, preferred_element_type=f32)   # [m, 32]

    A = a_ref[0]                                           # [m, m]  block-diag adjacency + I

    # ---- body: 3 x GINConv(Linear -> ReLU -> BN -> Dropout(id) -> Linear) ----
    for l in range(N_GIN):
        base = OFF_GIN + l * GIN_STRIDE
        w1 = p_ref[base:base + HIDDEN, 0:HIDDEN]
        w2 = p_ref[base + HIDDEN:base + 2 * HIDDEN, 0:HIDDEN]
        b1 = p_ref[base + 2 * HIDDEN + 0:base + 2 * HIDDEN + 1, 0:HIDDEN]
        s = p_ref[base + 2 * HIDDEN + 1:base + 2 * HIDDEN + 2, 0:HIDDEN]
        t = p_ref[base + 2 * HIDDEN + 2:base + 2 * HIDDEN + 3, 0:HIDDEN]
        b2 = p_ref[base + 2 * HIDDEN + 3:base + 2 * HIDDEN + 4, 0:HIDDEN]
        agg = jnp.dot(A, x, preferred_element_type=f32)
        h = jnp.maximum(jnp.dot(agg, w1, preferred_element_type=f32) + b1, 0.0)
        h = h * s + t                                      # folded BatchNorm1d (eval)
        x = jnp.dot(h, w2, preferred_element_type=f32) + b2

    # ---- von Mises head: Linear -> BN -> Dropout(id) -> ReLU -> Linear -> BN ----
    w1 = p_ref[OFF_HV_W1:OFF_HV_W1 + HIDDEN, 0:H2]
    w2 = p_ref[OFF_HV_W2:OFF_HV_W2 + H2, 0:H2]
    h = jnp.dot(x, w1, preferred_element_type=f32) + p_ref[OFF_HV_V + 0:OFF_HV_V + 1, 0:H2]
    h = h * p_ref[OFF_HV_V + 1:OFF_HV_V + 2, 0:H2] + p_ref[OFF_HV_V + 2:OFF_HV_V + 3, 0:H2]
    h = jnp.maximum(h, 0.0)
    h = jnp.dot(h, w2, preferred_element_type=f32) + p_ref[OFF_HV_V + 3:OFF_HV_V + 4, 0:H2]
    h = h * p_ref[OFF_HV_V + 4:OFF_HV_V + 5, 0:H2] + p_ref[OFF_HV_V + 5:OFF_HV_V + 6, 0:H2]

    # ---- values head hidden: Linear -> BN -> Dropout(id) -> ReLU ----
    vw1 = p_ref[OFF_HVAL_W1:OFF_HVAL_W1 + HIDDEN, 0:H4]
    v = jnp.dot(x, vw1, preferred_element_type=f32) + p_ref[OFF_HVAL_V1 + 0:OFF_HVAL_V1 + 1, 0:H4]
    v = v * p_ref[OFF_HVAL_V1 + 1:OFF_HVAL_V1 + 2, 0:H4] + p_ref[OFF_HVAL_V1 + 2:OFF_HVAL_V1 + 3, 0:H4]
    v = jnp.maximum(v, 0.0)

    # ---- fused final projection: wl | means | kappas | values  ->  [m, 32] ----
    wf = p_ref[OFF_FC_W:OFF_FC_W + H2, 0:OUT_W]            # [16, 32]
    wv = p_ref[OFF_VAL_W:OFF_VAL_W + H4, 0:OUT_W]          # [8, 32]  (final values-BN folded)
    bf = p_ref[OFF_FC_B:OFF_FC_B + 1, 0:OUT_W]             # [1, 32]
    raw = (jnp.dot(h, wf, preferred_element_type=f32)
           + jnp.dot(v, wv, preferred_element_type=f32) + bf)

    col = lax.broadcasted_iota(jnp.int32, (m, OUT_W), 1)
    tanh_part = jnp.tanh(raw) * 180.0
    sp_part = jnp.maximum(raw, 0.0) + jnp.log1p(jnp.exp(-jnp.abs(raw)))   # stable softplus
    out = jnp.where((col >= 2 * K) & (col < 4 * K), tanh_part,
                    jnp.where((col >= 4 * K) & (col < 6 * K), sp_part, raw))
    out_ref[...] = out


# ---- wrapper ------------------------------------------------------------------------
def sweetnet_forward(node_ids, edge_index, packed, graphs_per_tile=GRAPHS_PER_TILE):
    """node_ids: [G, n] int32, edge_index: [G, 2, E] int32, packed: [P_ROWS, 128] f32."""
    g, n = node_ids.shape
    tile = graphs_per_tile * n
    num_tiles = g // graphs_per_tile
    total = g * n

    ids = node_ids.reshape(total, 1).astype(jnp.int32)

    # Block-diagonal adjacency per node-tile via one-hot matmuls (no serialized scatter).
    src = edge_index[:, 0, :]
    dst = edge_index[:, 1, :]
    rng = jnp.arange(n, dtype=jnp.int32)
    oh_src = (src[..., None] == rng).astype(jnp.float32)            # [G, E, n]
    oh_dst = (dst[..., None] == rng).astype(jnp.float32)            # [G, E, n]
    a_g = jnp.einsum("gei,gej->gij", oh_dst, oh_src) + jnp.eye(n, dtype=jnp.float32)
    a_g = a_g.reshape(num_tiles, graphs_per_tile, n, n)
    eye_g = jnp.eye(graphs_per_tile, dtype=jnp.float32)
    a_blocks = jnp.einsum("tgij,gh->tgihj", a_g, eye_g).reshape(num_tiles, tile, tile)

    out = pl.pallas_call(
        _sweetnet_kernel,
        out_shape=jax.ShapeDtypeStruct((total, OUT_W), jnp.float32),
        grid=(num_tiles,),
        in_specs=[
            pl.BlockSpec((tile, 1), lambda i: (i, 0)),              # node ids per tile
            pl.BlockSpec((1, tile, tile), lambda i: (i, 0, 0)),     # adjacency block per tile
            pl.BlockSpec((P_ROWS, 128), lambda i: (0, 0)),          # weights: VMEM-resident
        ],
        out_specs=pl.BlockSpec((tile, OUT_W), lambda i: (i, 0)),
        compiler_params=pltpu.CompilerParams(dimension_semantics=("parallel",)),
    )(ids, a_blocks, packed)

    weights_logits = out[:, 0:2 * K].reshape(total, 2, K)
    means = out[:, 2 * K:4 * K].reshape(total, 2, K)
    kappas = out[:, 4 * K:6 * K].reshape(total, 2, K)
    sasa_pred = out[:, 6 * K]
    flex_pred = out[:, 6 * K + 1]
    return weights_logits, means, kappas, sasa_pred, flex_pred


# ---- deterministic synthetic parameters ---------------------------------------------
def init_params(key):
    def nrm(k, shape, scale=0.1):
        return scale * jax.random.normal(k, shape, dtype=jnp.float32)

    keys = iter(jax.random.split(key, 64))

    def bn_fold(k, dim):
        k1, k2, k3, k4 = jax.random.split(k, 4)
        gamma = 1.0 + 0.1 * jax.random.normal(k1, (dim,), jnp.float32)
        beta = 0.1 * jax.random.normal(k2, (dim,), jnp.float32)
        mean = 0.1 * jax.random.normal(k3, (dim,), jnp.float32)
        var = jnp.abs(1.0 + 0.1 * jax.random.normal(k4, (dim,), jnp.float32))
        scale = gamma / jnp.sqrt(var + BN_EPS)
        shift = beta - mean * scale
        return scale, shift

    p = {}
    p["embedding"] = nrm(next(keys), (LIB_SIZE + 1, HIDDEN), 1.0)

    gw1, gw2, gb1, gs, gt, gb2 = [], [], [], [], [], []
    for _ in range(N_GIN):
        gw1.append(nrm(next(keys), (HIDDEN, HIDDEN)))
        gb1.append(nrm(next(keys), (HIDDEN,)))
        s, t = bn_fold(next(keys), HIDDEN)
        gs.append(s)
        gt.append(t)
        gw2.append(nrm(next(keys), (HIDDEN, HIDDEN)))
        gb2.append(nrm(next(keys), (HIDDEN,)))
    p["gin_w1"], p["gin_w2"] = jnp.stack(gw1), jnp.stack(gw2)
    p["gin_b1"], p["gin_b2"] = jnp.stack(gb1), jnp.stack(gb2)
    p["gin_s"], p["gin_t"] = jnp.stack(gs), jnp.stack(gt)

    p["hv_w1"] = nrm(next(keys), (HIDDEN, H2))
    p["hv_b1"] = nrm(next(keys), (H2,))
    p["hv_s1"], p["hv_t1"] = bn_fold(next(keys), H2)
    p["hv_w2"] = nrm(next(keys), (H2, H2))
    p["hv_b2"] = nrm(next(keys), (H2,))
    p["hv_s2"], p["hv_t2"] = bn_fold(next(keys), H2)

    p["fc_w_w"], p["fc_b_w"] = nrm(next(keys), (H2, 2 * K)), nrm(next(keys), (2 * K,))
    p["fc_w_m"], p["fc_b_m"] = nrm(next(keys), (H2, 2 * K)), nrm(next(keys), (2 * K,))
    p["fc_w_k"], p["fc_b_k"] = nrm(next(keys), (H2, 2 * K)), nrm(next(keys), (2 * K,))

    p["hval_w1"] = nrm(next(keys), (HIDDEN, H4))
    p["hval_b1"] = nrm(next(keys), (H4,))
    p["hval_s1"], p["hval_t1"] = bn_fold(next(keys), H4)
    p["hval_w2"] = nrm(next(keys), (H4, 2))
    p["hval_b2"] = nrm(next(keys), (2,))
    p["hval_s2"], p["hval_t2"] = bn_fold(next(keys), 2)
    return p


def pack_params(p):
    """Pack all parameters into one lane-dense [P_ROWS, 128] f32 slab (single DMA)."""
    P = jnp.zeros((P_ROWS, 128), jnp.float32)
    P = P.at[OFF_EMB:OFF_EMB + LIB_SIZE + 1, 0:HIDDEN].set(p["embedding"])
    for l in range(N_GIN):
        base = OFF_GIN + l * GIN_STRIDE
        P = P.at[base:base + HIDDEN, 0:HIDDEN].set(p["gin_w1"][l])
        P = P.at[base + HIDDEN:base + 2 * HIDDEN, 0:HIDDEN].set(p["gin_w2"][l])
        P = P.at[base + 2 * HIDDEN + 0, 0:HIDDEN].set(p["gin_b1"][l])
        P = P.at[base + 2 * HIDDEN + 1, 0:HIDDEN].set(p["gin_s"][l])
        P = P.at[base + 2 * HIDDEN + 2, 0:HIDDEN].set(p["gin_t"][l])
        P = P.at[base + 2 * HIDDEN + 3, 0:HIDDEN].set(p["gin_b2"][l])
    P = P.at[OFF_HV_W1:OFF_HV_W1 + HIDDEN, 0:H2].set(p["hv_w1"])
    P = P.at[OFF_HV_W2:OFF_HV_W2 + H2, 0:H2].set(p["hv_w2"])
    for r, name in enumerate(["hv_b1", "hv_s1", "hv_t1", "hv_b2", "hv_s2", "hv_t2"]):
        P = P.at[OFF_HV_V + r, 0:H2].set(p[name])
    P = P.at[OFF_HVAL_W1:OFF_HVAL_W1 + HIDDEN, 0:H4].set(p["hval_w1"])
    for r, name in enumerate(["hval_b1", "hval_s1", "hval_t1"]):
        P = P.at[OFF_HVAL_V1 + r, 0:H4].set(p[name])
    # fused output projection: cols 0:10 wl | 10:20 means | 20:30 kappas | 30:32 values
    P = P.at[OFF_FC_W:OFF_FC_W + H2, 0:2 * K].set(p["fc_w_w"])
    P = P.at[OFF_FC_W:OFF_FC_W + H2, 2 * K:4 * K].set(p["fc_w_m"])
    P = P.at[OFF_FC_W:OFF_FC_W + H2, 4 * K:6 * K].set(p["fc_w_k"])
    P = P.at[OFF_VAL_W:OFF_VAL_W + H4, 6 * K:6 * K + 2].set(p["hval_w2"] * p["hval_s2"][None, :])
    P = P.at[OFF_FC_B, 0:2 * K].set(p["fc_b_w"])
    P = P.at[OFF_FC_B, 2 * K:4 * K].set(p["fc_b_m"])
    P = P.at[OFF_FC_B, 4 * K:6 * K].set(p["fc_b_k"])
    P = P.at[OFF_FC_B, 6 * K:6 * K + 2].set(p["hval_b2"] * p["hval_s2"] + p["hval_t2"])
    return P


# ---- pure-JAX reference (same eval-mode semantics, per graph) -------------------------
def _reference_single(node_ids_g, edge_index_g, p):
    n = node_ids_g.shape[0]
    x = jnp.take(p["embedding"], node_ids_g, axis=0)
    A = jnp.zeros((n, n), jnp.float32).at[edge_index_g[1], edge_index_g[0]].add(1.0)
    A = A + jnp.eye(n, dtype=jnp.float32)
    for l in range(N_GIN):
        agg = A @ x
        h = jax.nn.relu(agg @ p["gin_w1"][l] + p["gin_b1"][l])
        h = h * p["gin_s"][l] + p["gin_t"][l]
        x = h @ p["gin_w2"][l] + p["gin_b2"][l]
    h = x @ p["hv_w1"] + p["hv_b1"]
    h = h * p["hv_s1"] + p["hv_t1"]
    h = jax.nn.relu(h)
    h = h @ p["hv_w2"] + p["hv_b2"]
    h = h * p["hv_s2"] + p["hv_t2"]
    wl = (h @ p["fc_w_w"] + p["fc_b_w"]).reshape(n, 2, K)
    mm = jnp.tanh((h @ p["fc_w_m"] + p["fc_b_m"]).reshape(n, 2, K)) * 180.0
    kp = jax.nn.softplus((h @ p["fc_w_k"] + p["fc_b_k"]).reshape(n, 2, K))
    v = x @ p["hval_w1"] + p["hval_b1"]
    v = v * p["hval_s1"] + p["hval_t1"]
    v = jax.nn.relu(v)
    v = v @ p["hval_w2"] + p["hval_b2"]
    v = v * p["hval_s2"] + p["hval_t2"]
    return wl, mm, kp, v[:, 0], v[:, 1]


def reference_forward(node_ids, edge_index, p):
    wl, mm, kp, sasa, flex = jax.vmap(_reference_single, in_axes=(0, 0, None))(node_ids, edge_index, p)
    total = node_ids.shape[0] * node_ids.shape[1]
    return (wl.reshape(total, 2, K), mm.reshape(total, 2, K), kp.reshape(total, 2, K),
            sasa.reshape(total), flex.reshape(total))


if __name__ == "__main__":
    root = jax.random.PRNGKey(0)
    kp_, kn, ke = jax.random.split(root, 3)

    params = init_params(kp_)
    packed = pack_params(params)
    node_ids = jax.random.randint(kn, (GRAPHS, N_NODES), 0, LIB_SIZE + 1, dtype=jnp.int32)
    edge_index = jax.random.randint(ke, (GRAPHS, 2, N_EDGES), 0, N_NODES, dtype=jnp.int32)

    fwd = jax.jit(sweetnet_forward)
    outs = jax.block_until_ready(fwd(node_ids, edge_index, packed))

    refs = reference_forward(node_ids, edge_index, params)
    for o, r in zip(outs, refs):
        assert o.shape == r.shape, (o.shape, r.shape)
        assert jnp.allclose(o, r, rtol=2e-2, atol=2e-1), float(jnp.max(jnp.abs(o - r)))

    # TODO(synk): training-mode Dropout / batch-statistics BatchNorm are not modeled (eval mode only).
    print("KERNEL_OK")
</pallas_src>

<mosaic_0001>
module attributes {stable_mosaic.version = 11 : i64} {
  func.func @_sweetnet_kernel(%arg0: i32, %arg1: memref<256x1xi32, #tpu.memory_space<vmem>>, %arg2: memref<1x256x256xf32, #tpu.memory_space<vmem>>, %arg3: memref<472x128xf32, #tpu.memory_space<vmem>>, %arg4: memref<256x32xf32, #tpu.memory_space<vmem>>) attributes {dimension_semantics = [#tpu.dimension_semantics<parallel>], iteration_bounds = array<i64: 2>, scalar_prefetch = 0 : i64, scratch_operands = 0 : i64, tpu.core_type = #tpu.core_type<tc>, window_params = [{transform_indices = @transform_0, window_bounds = array<i64: 256, 1>}, {transform_indices = @transform_1, window_bounds = array<i64: 1, 256, 256>}, {pipeline_mode = #tpu.pipeline_mode<synchronous>, transform_indices = @transform_2, window_bounds = array<i64: 472, 128>}, {transform_indices = @transform_3, window_bounds = array<i64: 256, 32>}]} {
    %c0 = arith.constant 0 : index
    %c0_0 = arith.constant 0 : index
    %0 = vector.load %arg1[%c0, %c0_0] : memref<256x1xi32, #tpu.memory_space<vmem>>, vector<256x1xi32>
    %1 = tpu.iota {dimensions = array<i32: 1>} : vector<256x128xi32>
    %2 = vector.broadcast %0 : vector<256x1xi32> to vector<256x128xi32>
    %3 = arith.cmpi eq, %1, %2 : vector<256x128xi32>
    %4 = arith.extui %3 : vector<256x128xi1> to vector<256x128xi32>
    %5 = arith.sitofp %4 : vector<256x128xi32> to vector<256x128xf32>
    %c0_1 = arith.constant 0 : index
    %c0_2 = arith.constant 0 : index
    %6 = vector.load %arg3[%c0_1, %c0_2] : memref<472x128xf32, #tpu.memory_space<vmem>>, vector<128x32xf32>
    %cst = arith.constant dense<0.000000e+00> : vector<256x32xf32>
    %7 = tpu.matmul %5, %6, %cst {dimension_numbers = #tpu.dot_dimension_numbers<[1], [0], [0], [1], [0, 0, 1, 1], [], []>} : vector<256x128xf32>, vector<128x32xf32>, vector<256x32xf32> -> vector<256x32xf32>
    %c0_3 = arith.constant 0 : index
    %c0_4 = arith.constant 0 : index
    %c0_5 = arith.constant 0 : index
    %8 = vector.load %arg2[%c0_3, %c0_4, %c0_5] : memref<1x256x256xf32, #tpu.memory_space<vmem>>, vector<1x256x256xf32>
    %9 = vector.shape_cast %8 : vector<1x256x256xf32> to vector<256x256xf32>
    %c128 = arith.constant 128 : index
    %c0_6 = arith.constant 0 : index
    %10 = vector.load %arg3[%c128, %c0_6] : memref<472x128xf32, #tpu.memory_space<vmem>>, vector<32x32xf32>
    %c160 = arith.constant 160 : index
    %c0_7 = arith.constant 0 : index
    %11 = vector.load %arg3[%c160, %c0_7] : memref<472x128xf32, #tpu.memory_space<vmem>>, vector<32x32xf32>
    %c192 = arith.constant 192 : index
    %c0_8 = arith.constant 0 : index
    %12 = vector.load %arg3[%c192, %c0_8] : memref<472x128xf32, #tpu.memory_space<vmem>>, vector<1x32xf32>
    %c193 = arith.constant 193 : index
    %c0_9 = arith.constant 0 : index
    %13 = vector.load %arg3[%c193, %c0_9] : memref<472x128xf32, #tpu.memory_space<vmem>>, vector<1x32xf32>
    %c194 = arith.constant 194 : index
    %c0_10 = arith.constant 0 : index
    %14 = vector.load %arg3[%c194, %c0_10] : memref<472x128xf32, #tpu.memory_space<vmem>>, vector<1x32xf32>
    %c195 = arith.constant 195 : index
    %c0_11 = arith.constant 0 : index
    %15 = vector.load %arg3[%c195, %c0_11] : memref<472x128xf32, #tpu.memory_space<vmem>>, vector<1x32xf32>
    %cst_12 = arith.constant dense<0.000000e+00> : vector<256x32xf32>
    %16 = tpu.matmul %9, %7, %cst_12 {dimension_numbers = #tpu.dot_dimension_numbers<[1], [0], [0], [1], [0, 0, 1, 1], [], []>} : vector<256x256xf32>, vector<256x32xf32>, vector<256x32xf32> -> vector<256x32xf32>
    %cst_13 = arith.constant dense<0.000000e+00> : vector<256x32xf32>
    %17 = tpu.matmul %16, %10, %cst_13 {dimension_numbers = #tpu.dot_dimension_numbers<[1], [0], [0], [1], [0, 0, 1, 1], [], []>} : vector<256x32xf32>, vector<32x32xf32>, vector<256x32xf32> -> vector<256x32xf32>
    %18 = vector.broadcast %12 : vector<1x32xf32> to vector<256x32xf32>
    %19 = arith.addf %17, %18 : vector<256x32xf32>
    %cst_14 = arith.constant 0.000000e+00 : f32
    %20 = vector.broadcast %cst_14 : f32 to vector<256x32xf32>
    %21 = arith.maximumf %19, %20 : vector<256x32xf32>
    %22 = vector.broadcast %13 : vector<1x32xf32> to vector<256x32xf32>
    %23 = arith.mulf %21, %22 : vector<256x32xf32>
    %24 = vector.broadcast %14 : vector<1x32xf32> to vector<256x32xf32>
    %25 = arith.addf %23, %24 : vector<256x32xf32>
    %cst_15 = arith.constant dense<0.000000e+00> : vector<256x32xf32>
    %26 = tpu.matmul %25, %11, %cst_15 {dimension_numbers = #tpu.dot_dimension_numbers<[1], [0], [0], [1], [0, 0, 1, 1], [], []>} : vector<256x32xf32>, vector<32x32xf32>, vector<256x32xf32> -> vector<256x32xf32>
    %27 = vector.broadcast %15 : vector<1x32xf32> to vector<256x32xf32>
    %28 = arith.addf %26, %27 : vector<256x32xf32>
    %c200 = arith.constant 200 : index
    %c0_16 = arith.constant 0 : index
    %29 = vector.load %arg3[%c200, %c0_16] : memref<472x128xf32, #tpu.memory_space<vmem>>, vector<32x32xf32>
    %c232 = arith.constant 232 : index
    %c0_17 = arith.constant 0 : index
    %30 = vector.load %arg3[%c232, %c0_17] : memref<472x128xf32, #tpu.memory_space<vmem>>, vector<32x32xf32>
    %c264 = arith.constant 264 : index
    %c0_18 = arith.constant 0 : index
    %31 = vector.load %arg3[%c264, %c0_18] : memref<472x128xf32, #tpu.memory_space<vmem>>, vector<1x32xf32>
    %c265 = arith.constant 265 : index
    %c0_19 = arith.constant 0 : index
    %32 = vector.load %arg3[%c265, %c0_19] : memref<472x128xf32, #tpu.memory_space<vmem>>, vector<1x32xf32>
    %c266 = arith.constant 266 : index
    %c0_20 = arith.constant 0 : index
    %33 = vector.load %arg3[%c266, %c0_20] : memref<472x128xf32, #tpu.memory_space<vmem>>, vector<1x32xf32>
    %c267 = arith.constant 267 : index
    %c0_21 = arith.constant 0 : index
    %34 = vector.load %arg3[%c267, %c0_21] : memref<472x128xf32, #tpu.memory_space<vmem>>, vector<1x32xf32>
    %cst_22 = arith.constant dense<0.000000e+00> : vector<256x32xf32>
    %35 = tpu.matmul %9, %28, %cst_22 {dimension_numbers = #tpu.dot_dimension_numbers<[1], [0], [0], [1], [0, 0, 1, 1], [], []>} : vector<256x256xf32>, vector<256x32xf32>, vector<256x32xf32> -> vector<256x32xf32>
    %cst_23 = arith.constant dense<0.000000e+00> : vector<256x32xf32>
    %36 = tpu.matmul %35, %29, %cst_23 {dimension_numbers = #tpu.dot_dimension_numbers<[1], [0], [0], [1], [0, 0, 1, 1], [], []>} : vector<256x32xf32>, vector<32x32xf32>, vector<256x32xf32> -> vector<256x32xf32>
    %37 = vector.broadcast %31 : vector<1x32xf32> to vector<256x32xf32>
    %38 = arith.addf %36, %37 : vector<256x32xf32>
    %cst_24 = arith.constant 0.000000e+00 : f32
    %39 = vector.broadcast %cst_24 : f32 to vector<256x32xf32>
    %40 = arith.maximumf %38, %39 : vector<256x32xf32>
    %41 = vector.broadcast %32 : vector<1x32xf32> to vector<256x32xf32>
    %42 = arith.mulf %40, %41 : vector<256x32xf32>
    %43 = vector.broadcast %33 : vector<1x32xf32> to vector<256x32xf32>
    %44 = arith.addf %42, %43 : vector<256x32xf32>
    %cst_25 = arith.constant dense<0.000000e+00> : vector<256x32xf32>
    %45 = tpu.matmul %44, %30, %cst_25 {dimension_numbers = #tpu.dot_dimension_numbers<[1], [0], [0], [1], [0, 0, 1, 1], [], []>} : vector<256x32xf32>, vector<32x32xf32>, vector<256x32xf32> -> vector<256x32xf32>
    %46 = vector.broadcast %34 : vector<1x32xf32> to vector<256x32xf32>
    %47 = arith.addf %45, %46 : vector<256x32xf32>
    %c272 = arith.constant 272 : index
    %c0_26 = arith.constant 0 : index
    %48 = vector.load %arg3[%c272, %c0_26] : memref<472x128xf32, #tpu.memory_space<vmem>>, vector<32x32xf32>
    %c304 = arith.constant 304 : index
    %c0_27 = arith.constant 0 : index
    %49 = vector.load %arg3[%c304, %c0_27] : memref<472x128xf32, #tpu.memory_space<vmem>>, vector<32x32xf32>
    %c336 = arith.constant 336 : index
    %c0_28 = arith.constant 0 : index
    %50 = vector.load %arg3[%c336, %c0_28] : memref<472x128xf32, #tpu.memory_space<vmem>>, vector<1x32xf32>
    %c337 = arith.constant 337 : index
    %c0_29 = arith.constant 0 : index
    %51 = vector.load %arg3[%c337, %c0_29] : memref<472x128xf32, #tpu.memory_space<vmem>>, vector<1x32xf32>
    %c338 = arith.constant 338 : index
    %c0_30 = arith.constant 0 : index
    %52 = vector.load %arg3[%c338, %c0_30] : memref<472x128xf32, #tpu.memory_space<vmem>>, vector<1x32xf32>
    %c339 = arith.constant 339 : index
    %c0_31 = arith.constant 0 : index
    %53 = vector.load %arg3[%c339, %c0_31] : memref<472x128xf32, #tpu.memory_space<vmem>>, vector<1x32xf32>
    %cst_32 = arith.constant dense<0.000000e+00> : vector<256x32xf32>
    %54 = tpu.matmul %9, %47, %cst_32 {dimension_numbers = #tpu.dot_dimension_numbers<[1], [0], [0], [1], [0, 0, 1, 1], [], []>} : vector<256x256xf32>, vector<256x32xf32>, vector<256x32xf32> -> vector<256x32xf32>
    %cst_33 = arith.constant dense<0.000000e+00> : vector<256x32xf32>
    %55 = tpu.matmul %54, %48, %cst_33 {dimension_numbers = #tpu.dot_dimension_numbers<[1], [0], [0], [1], [0, 0, 1, 1], [], []>} : vector<256x32xf32>, vector<32x32xf32>, vector<256x32xf32> -> vector<256x32xf32>
    %56 = vector.broadcast %50 : vector<1x32xf32> to vector<256x32xf32>
    %57 = arith.addf %55, %56 : vector<256x32xf32>
    %cst_34 = arith.constant 0.000000e+00 : f32
    %58 = vector.broadcast %cst_34 : f32 to vector<256x32xf32>
    %59 = arith.maximumf %57, %58 : vector<256x32xf32>
    %60 = vector.broadcast %51 : vector<1x32xf32> to vector<256x32xf32>
    %61 = arith.mulf %59, %60 : vector<256x32xf32>
    %62 = vector.broadcast %52 : vector<1x32xf32> to vector<256x32xf32>
    %63 = arith.addf %61, %62 : vector<256x32xf32>
    %cst_35 = arith.constant dense<0.000000e+00> : vector<256x32xf32>
    %64 = tpu.matmul %63, %49, %cst_35 {dimension_numbers = #tpu.dot_dimension_numbers<[1], [0], [0], [1], [0, 0, 1, 1], [], []>} : vector<256x32xf32>, vector<32x32xf32>, vector<256x32xf32> -> vector<256x32xf32>
    %65 = vector.broadcast %53 : vector<1x32xf32> to vector<256x32xf32>
    %66 = arith.addf %64, %65 : vector<256x32xf32>
    %c344 = arith.constant 344 : index
    %c0_36 = arith.constant 0 : index
    %67 = vector.load %arg3[%c344, %c0_36] : memref<472x128xf32, #tpu.memory_space<vmem>>, vector<32x16xf32>
    %c376 = arith.constant 376 : index
    %c0_37 = arith.constant 0 : index
    %68 = vector.load %arg3[%c376, %c0_37] : memref<472x128xf32, #tpu.memory_space<vmem>>, vector<16x16xf32>
    %cst_38 = arith.constant dense<0.000000e+00> : vector<256x16xf32>
    %69 = tpu.matmul %66, %67, %cst_38 {dimension_numbers = #tpu.dot_dimension_numbers<[1], [0], [0], [1], [0, 0, 1, 1], [], []>} : vector<256x32xf32>, vector<32x16xf32>, vector<256x16xf32> -> vector<256x16xf32>
    %c392 = arith.constant 392 : index
    %c0_39 = arith.constant 0 : index
    %70 = vector.load %arg3[%c392, %c0_39] : memref<472x128xf32, #tpu.memory_space<vmem>>, vector<1x16xf32>
    %71 = vector.broadcast %70 : vector<1x16xf32> to vector<256x16xf32>
    %72 = arith.addf %69, %71 : vector<256x16xf32>
    %c393 = arith.constant 393 : index
    %c0_40 = arith.constant 0 : index
    %73 = vector.load %arg3[%c393, %c0_40] : memref<472x128xf32, #tpu.memory_space<vmem>>, vector<1x16xf32>
    %74 = vector.broadcast %73 : vector<1x16xf32> to vector<256x16xf32>
    %75 = arith.mulf %72, %74 : vector<256x16xf32>
    %c394 = arith.constant 394 : index
    %c0_41 = arith.constant 0 : index
    %76 = vector.load %arg3[%c394, %c0_41] : memref<472x128xf32, #tpu.memory_space<vmem>>, vector<1x16xf32>
    %77 = vector.broadcast %76 : vector<1x16xf32> to vector<256x16xf32>
    %78 = arith.addf %75, %77 : vector<256x16xf32>
    %cst_42 = arith.constant 0.000000e+00 : f32
    %79 = vector.broadcast %cst_42 : f32 to vector<256x16xf32>
    %80 = arith.maximumf %78, %79 : vector<256x16xf32>
    %cst_43 = arith.constant dense<0.000000e+00> : vector<256x16xf32>
    %81 = tpu.matmul %80, %68, %cst_43 {dimension_numbers = #tpu.dot_dimension_numbers<[1], [0], [0], [1], [0, 0, 1, 1], [], []>} : vector<256x16xf32>, vector<16x16xf32>, vector<256x16xf32> -> vector<256x16xf32>
    %c395 = arith.constant 395 : index
    %c0_44 = arith.constant 0 : index
    %82 = vector.load %arg3[%c395, %c0_44] : memref<472x128xf32, #tpu.memory_space<vmem>>, vector<1x16xf32>
    %83 = vector.broadcast %82 : vector<1x16xf32> to vector<256x16xf32>
    %84 = arith.addf %81, %83 : vector<256x16xf32>
    %c396 = arith.constant 396 : index
    %c0_45 = arith.constant 0 : index
    %85 = vector.load %arg3[%c396, %c0_45] : memref<472x128xf32, #tpu.memory_space<vmem>>, vector<1x16xf32>
    %86 = vector.broadcast %85 : vector<1x16xf32> to vector<256x16xf32>
    %87 = arith.mulf %84, %86 : vector<256x16xf32>
    %c397 = arith.constant 397 : index
    %c0_46 = arith.constant 0 : index
    %88 = vector.load %arg3[%c397, %c0_46] : memref<472x128xf32, #tpu.memory_space<vmem>>, vector<1x16xf32>
    %89 = vector.broadcast %88 : vector<1x16xf32> to vector<256x16xf32>
    %90 = arith.addf %87, %89 : vector<256x16xf32>
    %c400 = arith.constant 400 : index
    %c0_47 = arith.constant 0 : index
    %91 = vector.load %arg3[%c400, %c0_47] : memref<472x128xf32, #tpu.memory_space<vmem>>, vector<32x8xf32>
    %cst_48 = arith.constant dense<0.000000e+00> : vector<256x8xf32>
    %92 = tpu.matmul %66, %91, %cst_48 {dimension_numbers = #tpu.dot_dimension_numbers<[1], [0], [0], [1], [0, 0, 1, 1], [], []>} : vector<256x32xf32>, vector<32x8xf32>, vector<256x8xf32> -> vector<256x8xf32>
    %c432 = arith.constant 432 : index
    %c0_49 = arith.constant 0 : index
    %93 = vector.load %arg3[%c432, %c0_49] : memref<472x128xf32, #tpu.memory_space<vmem>>, vector<1x8xf32>
    %94 = vector.broadcast %93 : vector<1x8xf32> to vector<256x8xf32>
    %95 = arith.addf %92, %94 : vector<256x8xf32>
    %c433 = arith.constant 433 : index
    %c0_50 = arith.constant 0 : index
    %96 = vector.load %arg3[%c433, %c0_50] : memref<472x128xf32, #tpu.memory_space<vmem>>, vector<1x8xf32>
    %97 = vector.broadcast %96 : vector<1x8xf32> to vector<256x8xf32>
    %98 = arith.mulf %95, %97 : vector<256x8xf32>
    %c434 = arith.constant 434 : index
    %c0_51 = arith.constant 0 : index
    %99 = vector.load %arg3[%c434, %c0_51] : memref<472x128xf32, #tpu.memory_space<vmem>>, vector<1x8xf32>
    %100 = vector.broadcast %99 : vector<1x8xf32> to vector<256x8xf32>
    %101 = arith.addf %98, %100 : vector<256x8xf32>
    %cst_52 = arith.constant 0.000000e+00 : f32
    %102 = vector.broadcast %cst_52 : f32 to vector<256x8xf32>
    %103 = arith.maximumf %101, %102 : vector<256x8xf32>
    %c440 = arith.constant 440 : index
    %c0_53 = arith.constant 0 : index
    %104 = vector.load %arg3[%c440, %c0_53] : memref<472x128xf32, #tpu.memory_space<vmem>>, vector<16x32xf32>
    %c456 = arith.constant 456 : index
    %c0_54 = arith.constant 0 : index
    %105 = vector.load %arg3[%c456, %c0_54] : memref<472x128xf32, #tpu.memory_space<vmem>>, vector<8x32xf32>
    %c464 = arith.constant 464 : index
    %c0_55 = arith.constant 0 : index
    %106 = vector.load %arg3[%c464, %c0_55] : memref<472x128xf32, #tpu.memory_space<vmem>>, vector<1x32xf32>
    %cst_56 = arith.constant dense<0.000000e+00> : vector<256x32xf32>
    %107 = tpu.matmul %90, %104, %cst_56 {dimension_numbers = #tpu.dot_dimension_numbers<[1], [0], [0], [1], [0, 0, 1, 1], [], []>} : vector<256x16xf32>, vector<16x32xf32>, vector<256x32xf32> -> vector<256x32xf32>
    %cst_57 = arith.constant dense<0.000000e+00> : vector<256x32xf32>
    %108 = tpu.matmul %103, %105, %cst_57 {dimension_numbers = #tpu.dot_dimension_numbers<[1], [0], [0], [1], [0, 0, 1, 1], [], []>} : vector<256x8xf32>, vector<8x32xf32>, vector<256x32xf32> -> vector<256x32xf32>
    %109 = arith.addf %107, %108 : vector<256x32xf32>
    %110 = vector.broadcast %106 : vector<1x32xf32> to vector<256x32xf32>
    %111 = arith.addf %109, %110 : vector<256x32xf32>
    %112 = tpu.iota {dimensions = array<i32: 1>} : vector<256x32xi32>
    %113 = math.tanh %111 : vector<256x32xf32>
    %cst_58 = arith.constant 1.800000e+02 : f32
    %114 = vector.broadcast %cst_58 : f32 to vector<256x32xf32>
    %115 = arith.mulf %113, %114 : vector<256x32xf32>
    %cst_59 = arith.constant 0.000000e+00 : f32
    %116 = vector.broadcast %cst_59 : f32 to vector<256x32xf32>
    %117 = arith.maximumf %111, %116 : vector<256x32xf32>
    %118 = math.absf %111 : vector<256x32xf32>
    %cst_60 = arith.constant 0.000000e+00 : f32
    %119 = vector.broadcast %cst_60 : f32 to vector<256x32xf32>
    %120 = arith.subf %119, %118 : vector<256x32xf32>
    %121 = math.exp %120 : vector<256x32xf32>
    %122 = math.log1p %121 : vector<256x32xf32>
    %123 = arith.addf %117, %122 : vector<256x32xf32>
    %c10_i32 = arith.constant 10 : i32
    %124 = vector.broadcast %c10_i32 : i32 to vector<256x32xi32>
    %125 = arith.cmpi sge, %112, %124 : vector<256x32xi32>
    %c20_i32 = arith.constant 20 : i32
    %126 = vector.broadcast %c20_i32 : i32 to vector<256x32xi32>
    %127 = arith.cmpi slt, %112, %126 : vector<256x32xi32>
    %128 = arith.andi %125, %127 : vector<256x32xi1>
    %c20_i32_61 = arith.constant 20 : i32
    %129 = vector.broadcast %c20_i32_61 : i32 to vector<256x32xi32>
    %130 = arith.cmpi sge, %112, %129 : vector<256x32xi32>
    %c30_i32 = arith.constant 30 : i32
    %131 = vector.broadcast %c30_i32 : i32 to vector<256x32xi32>
    %132 = arith.cmpi slt, %112, %131 : vector<256x32xi32>
    %133 = arith.andi %130, %132 : vector<256x32xi1>
    %134 = arith.select %133, %123, %111 : vector<256x32xi1>, vector<256x32xf32>
    %135 = arith.select %128, %115, %134 : vector<256x32xi1>, vector<256x32xf32>
    %c0_62 = arith.constant 0 : index
    %c0_63 = arith.constant 0 : index
    %136 = vector.load %arg4[%c0_62, %c0_63] : memref<256x32xf32, #tpu.memory_space<vmem>>, vector<256x32xf32>
    tpu.vector_store %arg4[%c0_62, %c0_63], %135 {strides = array<i32>} : memref<256x32xf32, #tpu.memory_space<vmem>>, vector<256x32xf32>,
    return
  }
  func.func @transform_0(%arg0: i32) -> (i32, i32) {
    %c0_i32 = arith.constant 0 : i32
    %c0_i32_0 = arith.constant 0 : i32
    return %arg0, %c0_i32 : i32, i32
  }
  func.func @transform_1(%arg0: i32) -> (i32, i32, i32) {
    %c0_i32 = arith.constant 0 : i32
    %c0_i32_0 = arith.constant 0 : i32
    %c0_i32_1 = arith.constant 0 : i32
    return %arg0, %c0_i32, %c0_i32_0 : i32, i32, i32
  }
  func.func @transform_2(%arg0: i32) -> (i32, i32) {
    %c0_i32 = arith.constant 0 : i32
    %c0_i32_0 = arith.constant 0 : i32
    %c0_i32_1 = arith.constant 0 : i32
    return %c0_i32, %c0_i32_0 : i32, i32
  }
  func.func @transform_3(%arg0: i32) -> (i32, i32) {
    %c0_i32 = arith.constant 0 : i32
    %c0_i32_0 = arith.constant 0 : i32
    return %arg0, %c0_i32 : i32, i32
  }
}

</mosaic_0001>

<bundles_post_ra>
// kernel: sweetnet_forward.1
= control target key start
LH: loop header
LB: loop body
LE: loop exit
PB: predicated region body
PF: predicated region fallthrough
CT: control target
= control target key end

     0   :  { %s5649_s12 = smov 0   ;;  %s8172_s0 = inlined_call_operand.vmem [shape: s32[512,1], index: 0, kind: input, shape index: {}]   ;;  %s8173_s1 = inlined_call_operand.vmem [shape: f32[2,256,256], index: 1, kind: input, shape index: {}]   ;;  %s8174_s2 = inlined_call_operand.vmem [shape: f32[472,128], index: 2, kind: input, shape index: {}]   ;;  %s8175_s3 = inlined_call_operand.vmem [shape: f32[512,32], index: 3, kind: output, shape index: {}]  }
   0x1 LB: > { %s5655_s13 = sadd.s32 4294967295, %s5625_s12   ;;  %p4872_p0 = scmp.ge.s32.totalorder %s5625_s12, 1  ;;  %s5625_s12 = sphi %s5649_s12, %s13_s12  }
   0x2   : > { %p148_p1 = scmp.lt.s32.totalorder %s5625_s12, 3 }
   0x4   : > { %p149_p2 = pnand %p4872_p0, %p148_p1 }
   0x6   : > { %152 = sbr.rel (%p149_p2) target bundleno = 2977 (0xba1), region = 32 }
   0xb   : > { %s4873_s14 = sshll.u32 %s5655_s13, 5  ;;  %v5627_v0 = vmov 0   ;;  %v435_v22 = vld [vmem:[%s8174_s2 + $0x78] sm:$0xff]  ;;  %v434_v23 = vld [vmem:[%s8174_s2 + $0x70] sm:$0xff]  ;;  %v433_v24 = vld [vmem:[%s8174_s2 + $0x68] sm:$0xff]  ;;  %v226_v49 = vlaneseq  ;;  %v5628_v53 = vmov 1.0  }
   0xc   : > { %5330 = vset.pattern.permute.xlu2 %v5627_v0  ;;  %5329 = vset.pattern.permute.xlu1 %v5627_v0  ;;  %p178_p3 = scmp.lt.s32.totalorder %s4873_s14, 63  ;;  %v432_v28 = vld [vmem:[%s8174_s2 + $0x60] sm:$0xff]  ;;  %v431_v29 = vld [vmem:[%s8174_s2 + $0x58] sm:$0xff]  ;;  %v430_v33 = vld [vmem:[%s8174_s2 + $0x50] sm:$0xff]  ;;  %p183_p4 = scmp.lt.s32.totalorder %s5655_s13, 1 }
   0xd   : > { %5328 = vset.pattern.permute.xlu0 %v5627_v0  ;;  %436 = vmatpush.msra.mxu0 %v435_v22  ;;  %v429_v34 = vld [vmem:[%s8174_s2 + $0x48] sm:$0xff]  ;;  %v428_v35 = vld [vmem:[%s8174_s2 + $0x40] sm:$0xff]  ;;  %v427_v36 = vld [vmem:[%s8174_s2 + $0x38] sm:$0xff]  ;;  %v5750_v50 = vand.u32 127, %v226_v49 }
   0xe   : > { %s8206_s14 = smov (!%p178_p3, %s4873_s14), 63  ;;  %5298 = vmatpush.msra.mxu1 %v435_v22  ;;  %v426_v40 = vld [vmem:[%s8174_s2 + $0x30] sm:$0xff]  ;;  %v425_v41 = vld [vmem:[%s8174_s2 + $0x28] sm:$0xff]  ;;  %v424_v42 = vld [vmem:[%s8174_s2 + $0x20] sm:$0xff]  ;;  %s8208_s13 = smov (!%p183_p4, %s5655_s13), 1 }
   0xf   : > { %s4874_s15 = sshll.u32 %s8206_s14, 3  ;;  %437 = vmatpush.msra.mxu0 %v434_v23  ;;  %v423_v44 = vld [vmem:[%s8174_s2 + $0x18] sm:$0xff]  ;;  %v422_v46 = vld [vmem:[%s8174_s2 + $0x10] sm:$0xff]  ;;  %v421_v47 = vld [vmem:[%s8174_s2 + $0x8] sm:$0xff]  ;;  %8185 = vst [vmem:[#allocation2_spill] sm:$0xff] %v5750_v50 }
  0x10   : > { %s5668_s18 = scalar_lea.vmem %s8172_s0, %s4874_s15  ;;  %5299 = vmatpush.msra.mxu1 %v434_v23  ;;  %v420_v48 = vld [vmem:[%s8174_s2] sm:$0xff]  ;;  %s7661_s22 = scalar_lea.vmem %s8175_s3, %s4874_s15 }
  0x11   : > { %v210_v1 = vld [vmem:[%s5668_s18 + $0x80] sm:$0xff]  ;;  %v195_v2 = vld [vmem:[%s5668_s18 + $0x8] sm:$0xff]  ;;  %v213_v5 = vld [vmem:[%s5668_s18 + $0x98] sm:$0xff]  ;;  %438 = vmatpush.msra.mxu0 %v433_v24 }
  0x12   : > { %v194_v3 = vld [vmem:[%s5668_s18] sm:$0xff]  ;;  %277 = vperm.xlu0 %5328, %v210_v1   ;;  %232 = vperm.xlu2 %5330, %v195_v2   ;;  %v211_v4 = vld [vmem:[%s5668_s18 + $0x88] sm:$0xff]  ;;  %v212_v6 = vld [vmem:[%s5668_s18 + $0x90] sm:$0xff] }
  0x13   : > { %229 = vperm.xlu1 %5329, %v194_v3   ;;  %v196_v7 = vld [vmem:[%s5668_s18 + $0x10] sm:$0xff]  ;;  %v197_v8 = vld [vmem:[%s5668_s18 + $0x18] sm:$0xff]  ;;  %v214_v9 = vld [vmem:[%s5668_s18 + $0xa0] sm:$0xff]  ;;  %5300 = vmatpush.msra.mxu1 %v433_v24 }
  0x14   : > { %v215_v10 = vld [vmem:[%s5668_s18 + $0xa8] sm:$0xff]  ;;  %v216_v11 = vld [vmem:[%s5668_s18 + $0xb0] sm:$0xff]  ;;  %v198_v12 = vld [vmem:[%s5668_s18 + $0x20] sm:$0xff]  ;;  %439 = vmatpush.msra.mxu0 %v432_v28 }
  0x15   : > { %v199_v13 = vld [vmem:[%s5668_s18 + $0x28] sm:$0xff]  ;;  %v200_v14 = vld [vmem:[%s5668_s18 + $0x30] sm:$0xff]  ;;  %v217_v15 = vld [vmem:[%s5668_s18 + $0xb8] sm:$0xff]  ;;  %5301 = vmatpush.msra.mxu1 %v432_v28 }
  0x16   : > { %v218_v16 = vld [vmem:[%s5668_s18 + $0xc0] sm:$0xff]  ;;  %v219_v17 = vld [vmem:[%s5668_s18 + $0xc8] sm:$0xff]  ;;  %v201_v18 = vld [vmem:[%s5668_s18 + $0x38] sm:$0xff]  ;;  %440 = vmatpush.msra.mxu0 %v431_v29 }
  0x17   : > { %v202_v19 = vld [vmem:[%s5668_s18 + $0x40] sm:$0xff]  ;;  %v203_v20 = vld [vmem:[%s5668_s18 + $0x48] sm:$0xff]  ;;  %v220_v21 = vld [vmem:[%s5668_s18 + $0xd0] sm:$0xff]  ;;  %5302 = vmatpush.msra.mxu1 %v431_v29 }
  0x18   : > { %v221_v25 = vld [vmem:[%s5668_s18 + $0xd8] sm:$0xff]  ;;  %v222_v26 = vld [vmem:[%s5668_s18 + $0xe0] sm:$0xff]  ;;  %v204_v27 = vld [vmem:[%s5668_s18 + $0x50] sm:$0xff]  ;;  %441 = vmatpush.msra.mxu0 %v430_v33 }
  0x19   : > { %v205_v30 = vld [vmem:[%s5668_s18 + $0x58] sm:$0xff]  ;;  %v206_v31 = vld [vmem:[%s5668_s18 + $0x60] sm:$0xff]  ;;  %v223_v32 = vld [vmem:[%s5668_s18 + $0xe8] sm:$0xff]  ;;  %5303 = vmatpush.msra.mxu1 %v430_v33 }
  0x1a   : > { %280 = vperm.xlu0 %5328, %v211_v4   ;;  %286 = vperm.xlu2 %5330, %v213_v5   ;;  %v224_v37 = vld [vmem:[%s5668_s18 + $0xf0] sm:$0xff]  ;;  %v225_v38 = vld [vmem:[%s5668_s18 + $0xf8] sm:$0xff]  ;;  %v207_v39 = vld [vmem:[%s5668_s18 + $0x68] sm:$0xff] }
  0x1b   : > { %283 = vperm.xlu1 %5329, %v212_v6   ;;  %442 = vmatpush.msra.mxu0 %v429_v34  ;;  %v208_v43 = vld [vmem:[%s5668_s18 + $0x70] sm:$0xff]  ;;  %v209_v45 = vld [vmem:[%s5668_s18 + $0x78] sm:$0xff]  ;;  %s5297_s18 = sshll.u32 %s8208_s13, 9 }
  0x1c   : > { %5304 = vmatpush.msra.mxu1 %v429_v34  ;;  %s5825_s4 = scalar_lea.vmem %s8173_s1, %s5297_s18 }
  0x1d   : > { %443 = vmatpush.msra.mxu0 %v428_v35 }
  0x1e   : > { %5305 = vmatpush.msra.mxu1 %v428_v35 }
  0x1f   : > { %444 = vmatpush.msra.mxu0 %v427_v36 }
  0x20   : > { %5306 = vmatpush.msra.mxu1 %v427_v36 }
  0x21   : > { %445 = vmatpush.msra.mxu0 %v426_v40 }
  0x22   : > { %235 = vperm.xlu0 %5328, %v196_v7   ;;  %238 = vperm.xlu2 %5330, %v197_v8  }
  0x23   : > { %289 = vperm.xlu1 %5329, %v214_v9   ;;  %5307 = vmatpush.msra.mxu1 %v426_v40 }
  0x24   : > { %446 = vmatpush.msra.mxu0 %v425_v41 }
  0x25   : > { %5308 = vmatpush.msra.mxu1 %v425_v41 }
  0x26   : > { %447 = vmatpush.msra.mxu0 %v424_v42 }
  0x27   : > { %5309 = vmatpush.msra.mxu1 %v424_v42 }
  0x28   : > { %448 = vmatpush.msra.mxu0 %v423_v44 }
  0x29   : > { %5310 = vmatpush.msra.mxu1 %v423_v44 }
  0x2a   : > { %292 = vperm.xlu0 %5328, %v215_v10   ;;  %295 = vperm.xlu2 %5330, %v216_v11  }
  0x2b   : > { %241 = vperm.xlu1 %5329, %v198_v12   ;;  %449 = vmatpush.msra.mxu0 %v422_v46 }
  0x2c   : > { %5311 = vmatpush.msra.mxu1 %v422_v46 }
  0x2d   : > { %450 = vmatpush.msra.mxu0 %v421_v47 }
  0x2e   : > { %5312 = vmatpush.msra.mxu1 %v421_v47 }
  0x2f   : > { %451 = vmatpush.msra.mxu0 %v420_v48 }
  0x30   : > { %5313 = vmatpush.msra.mxu1 %v420_v48 }
  0x32   : > { %244 = vperm.xlu0 %5328, %v199_v13   ;;  %247 = vperm.xlu2 %5330, %v200_v14  }
  0x33   : > { %298 = vperm.xlu1 %5329, %v217_v15  }
  0x3a   : > { %301 = vperm.xlu0 %5328, %v218_v16   ;;  %304 = vperm.xlu2 %5330, %v219_v17  }
  0x3b   : > { %250 = vperm.xlu1 %5329, %v201_v18  }
  0x42   : > { %253 = vperm.xlu0 %5328, %v202_v19   ;;  %256 = vperm.xlu2 %5330, %v203_v20  }
  0x43   : > { %307 = vperm.xlu1 %5329, %v220_v21  }
  0x4a   : > { %310 = vperm.xlu0 %5328, %v221_v25   ;;  %313 = vperm.xlu2 %5330, %v222_v26  }
  0x4b   : > { %259 = vperm.xlu1 %5329, %v204_v27  }
  0x52   : > { %262 = vperm.xlu0 %5328, %v205_v30   ;;  %265 = vperm.xlu2 %5330, %v206_v31  }
  0x53   : > { %316 = vperm.xlu1 %5329, %v223_v32  }
  0x5a   : > { %319 = vperm.xlu0 %5328, %v224_v37   ;;  %322 = vperm.xlu2 %5330, %v225_v38  }
  0x5b   : > { %268 = vperm.xlu1 %5329, %v207_v39  }
  0x62   : > { %271 = vperm.xlu0 %5328, %v208_v43  }
  0x63   : > { %274 = vperm.xlu1 %5329, %v209_v45  }
  0x6c   : > { %v233_v54 = vpop.permute.xlu2 %232 }
  0x6d   : > { %vm325_vm2 = vcmp.eq.s32.totalorder %v5750_v50, %v233_v54  ;;  %v549_v54 = vld [vmem:[%s5825_s4] sm:$0xff] }
  0x74   : > { %v287_v57 = vpop.permute.xlu2 %286 }
  0x75   : > { %vm343_vm6 = vcmp.eq.s32.totalorder %v5750_v50, %v287_v57  ;;  %v554_v57 = vld [vmem:[%s5825_s4 + $0x28] sm:$0xff] }
  0x7c   : > { %v239_v60 = vpop.permute.xlu2 %238 }
  0x7d   : > { %vm327_vm7 = vcmp.eq.s32.totalorder %v5750_v50, %v239_v60  ;;  %v555_v60 = vld [vmem:[%s5825_s4 + $0x30] sm:$0xff] }
  0x84   : > { %v278_v51 = vpop.permute.xlu0 %277  ;;  %v296_v63 = vpop.permute.xlu2 %295 }
  0x85   : > { %vm340_vm0 = vcmp.eq.s32.totalorder %v5750_v50, %v278_v51  ;;  %v230_v52 = vpop.permute.xlu1 %229  ;;  %vm346_vm12 = vcmp.eq.s32.totalorder %v5750_v50, %v296_v63  ;;  %v560_v63 = vld [vmem:[%s5825_s4 + $0x58] sm:$0xff] }
  0x86   : > { %vm324_vm1 = vcmp.eq.s32.totalorder %v5750_v50, %v230_v52  ;;  %4927 = vmatmul.msk.f32.vlgmr.msra.gmra.mxu1 %vm340_vm0, %v5628_v53 }
  0x87   : > { %4911 = vmatmul.msk.f32.vlgmr.msra.gmra.mxu0 %vm324_vm1, %v5628_v53 }
  0x8c   : > { %v281_v55 = vpop.permute.xlu0 %280  ;;  %v248_v2 = vpop.permute.xlu2 %247 }
  0x8d   : > { %vm341_vm3 = vcmp.eq.s32.totalorder %v5750_v50, %v281_v55  ;;  %v284_v56 = vpop.permute.xlu1 %283  ;;  %vm330_vm13 = vcmp.eq.s32.totalorder %v5750_v50, %v248_v2  ;;  %v552_v55 = vld [vmem:[%s5825_s4 + $0x18] sm:$0xff]  ;;  %v561_v2 = vld [vmem:[%s5825_s4 + $0x60] sm:$0xff] }
  0x8e   : > { %4928 = vmatmul.msk.f32.gmra.mxu1 %vm341_vm3, %v5628_v53  ;;  %vm342_vm4 = vcmp.eq.s32.totalorder %v5750_v50, %v284_v56  ;;  %v551_v56 = vld [vmem:[%s5825_s4 + $0x10] sm:$0xff] }
  0x8f   : > { %4912 = vmatmul.msk.f32.gmra.mxu0 %vm325_vm2, %v5628_v53 }
  0x94   : > { %v236_v58 = vpop.permute.xlu0 %235  ;;  %v305_v5 = vpop.permute.xlu2 %304 }
  0x95   : > { %vm326_vm5 = vcmp.eq.s32.totalorder %v5750_v50, %v236_v58  ;;  %v290_v59 = vpop.permute.xlu1 %289  ;;  %vm349_vm2 = vcmp.eq.s32.totalorder %v5750_v50, %v305_v5  ;;  %v553_v58 = vld [vmem:[%s5825_s4 + $0x20] sm:$0xff]  ;;  %v566_v5 = vld [vmem:[%s5825_s4 + $0x88] sm:$0xff] }
  0x96   : > { %4929 = vmatmul.msk.f32.gmra.mxu1 %vm342_vm4, %v5628_v53  ;;  %vm344_vm8 = vcmp.eq.s32.totalorder %v5750_v50, %v290_v59  ;;  %v556_v59 = vld [vmem:[%s5825_s4 + $0x38] sm:$0xff] }
  0x97   : > { %4913 = vmatmul.msk.f32.gmra.mxu0 %vm326_vm5, %v5628_v53 }
  0x9c   : > { %v293_v61 = vpop.permute.xlu0 %292  ;;  %v257_v8 = vpop.permute.xlu2 %256 }
  0x9d   : > { %v242_v62 = vpop.permute.xlu1 %241  ;;  %vm345_vm10 = vcmp.eq.s32.totalorder %v5750_v50, %v293_v61  ;;  %vm333_vm3 = vcmp.eq.s32.totalorder %v5750_v50, %v257_v8  ;;  %v558_v61 = vld [vmem:[%s5825_s4 + $0x48] sm:$0xff]  ;;  %v5855_v8 = vld [vmem:[%s5825_s4 + $0x90] sm:$0xff] }
  0x9e   : > { %4930 = vmatmul.msk.f32.gmra.mxu1 %vm343_vm6, %v5628_v53  ;;  %vm328_vm9 = vcmp.eq.s32.totalorder %v5750_v50, %v242_v62  ;;  %v557_v62 = vld [vmem:[%s5825_s4 + $0x40] sm:$0xff] }
  0x9f   : > { %4914 = vmatmul.msk.f32.gmra.mxu0 %vm327_vm7, %v5628_v53 }
  0xa4   : > { %v245_v0 = vpop.permute.xlu0 %244  ;;  %v314_v11 = vpop.permute.xlu2 %313 }
  0xa5   : > { %vm329_vm11 = vcmp.eq.s32.totalorder %v5750_v50, %v245_v0  ;;  %v299_v1 = vpop.permute.xlu1 %298  ;;  %v559_v0 = vld [vmem:[%s5825_s4 + $0x50] sm:$0xff] }
  0xa6   : > { %4931 = vmatmul.msk.f32.gmra.mxu1 %vm344_vm8, %v5628_v53  ;;  %vm347_vm14 = vcmp.eq.s32.totalorder %v5750_v50, %v299_v1  ;;  %vm352_vm8 = vcmp.eq.s32.totalorder %v5750_v50, %v314_v11  ;;  %v562_v1 = vld [vmem:[%s5825_s4 + $0x68] sm:$0xff]  ;;  %v572_v11 = vld [vmem:[%s5825_s4 + $0xb8] sm:$0xff] }
  0xa7   : > { %4915 = vmatmul.msk.f32.gmra.mxu0 %vm328_vm9, %v5628_v53 }
  0xac   : > { %v302_v3 = vpop.permute.xlu0 %301  ;;  %v266_v14 = vpop.permute.xlu2 %265 }
  0xad   : > { %v251_v4 = vpop.permute.xlu1 %250  ;;  %vm348_vm0 = vcmp.eq.s32.totalorder %v5750_v50, %v302_v3  ;;  %vm336_vm9 = vcmp.eq.s32.totalorder %v5750_v50, %v266_v14  ;;  %v564_v3 = vld [vmem:[%s5825_s4 + $0x78] sm:$0xff]  ;;  %v5870_v14 = vld [vmem:[%s5825_s4 + $0xc0] sm:$0xff] }
  0xae   : > { %4932 = vmatmul.msk.f32.gmra.mxu1 %vm345_vm10, %v5628_v53  ;;  %vm331_vm15 = vcmp.eq.s32.totalorder %v5750_v50, %v251_v4  ;;  %v5845_v4 = vld [vmem:[%s5825_s4 + $0x70] sm:$0xff] }
  0xaf   : > { %4916 = vmatmul.msk.f32.gmra.mxu0 %vm329_vm11, %v5628_v53 }
  0xb4   : > { %v254_v6 = vpop.permute.xlu0 %253  ;;  %v323_v18 = vpop.permute.xlu2 %322 }
  0xb5   : > { %vm332_vm1 = vcmp.eq.s32.totalorder %v5750_v50, %v254_v6  ;;  %v308_v7 = vpop.permute.xlu1 %307  ;;  %v5850_v6 = vld [vmem:[%s5825_s4 + $0x80] sm:$0xff] }
  0xb6   : > { %4933 = vmatmul.msk.f32.gmra.mxu1 %vm346_vm12, %v5628_v53  ;;  %vm350_vm4 = vcmp.eq.s32.totalorder %v5750_v50, %v308_v7  ;;  %v568_v7 = vld [vmem:[%s5825_s4 + $0x98] sm:$0xff] }
  0xb7   : > { %4917 = vmatmul.msk.f32.gmra.mxu0 %vm330_vm13, %v5628_v53 }
  0xbc   : > { %v311_v9 = vpop.permute.xlu0 %310 }
  0xbd   : > { %v260_v10 = vpop.permute.xlu1 %259  ;;  %vm351_vm6 = vcmp.eq.s32.totalorder %v5750_v50, %v311_v9  ;;  %v570_v9 = vld [vmem:[%s5825_s4 + $0xa8] sm:$0xff] }
  0xbe   : > { %4934 = vmatmul.msk.f32.gmra.mxu1 %vm347_vm14, %v5628_v53  ;;  %vm334_vm5 = vcmp.eq.s32.totalorder %v5750_v50, %v260_v10  ;;  %vm355_vm14 = vcmp.eq.s32.totalorder %v5750_v50, %v323_v18  ;;  %v5860_v10 = vld [vmem:[%s5825_s4 + $0xa0] sm:$0xff] }
  0xbf   : > { %4918 = vmatmul.msk.f32.gmra.mxu0 %vm331_vm15, %v5628_v53  ;;  %v5880_v18 = vld [vmem:[%s5825_s4 + $0xe0] sm:$0xff] }
  0xc4   : > { %v263_v12 = vpop.permute.xlu0 %262 }
  0xc5   : > { %vm335_vm7 = vcmp.eq.s32.totalorder %v5750_v50, %v263_v12  ;;  %v317_v13 = vpop.permute.xlu1 %316  ;;  %v5865_v12 = vld [vmem:[%s5825_s4 + $0xb0] sm:$0xff] }
  0xc6   : > { %4935 = vmatmul.msk.f32.gmra.mxu1 %vm348_vm0, %v5628_v53  ;;  %vm353_vm10 = vcmp.eq.s32.totalorder %v5750_v50, %v317_v13  ;;  %v574_v13 = vld [vmem:[%s5825_s4 + $0xc8] sm:$0xff]  ;;  %vm852_vm0 = vcmask 261120  }
  0xc7   : > { %4919 = vmatmul.msk.f32.gmra.mxu0 %vm332_vm1, %v5628_v53  ;;  %vm3201_vm1 = vcmask 130048  }
  0xcc   : > { %v320_v15 = vpop.permute.xlu0 %319 }
  0xcd   : > { %v269_v16 = vpop.permute.xlu1 %268  ;;  %vm354_vm12 = vcmp.eq.s32.totalorder %v5750_v50, %v320_v15  ;;  %v576_v15 = vld [vmem:[%s5825_s4 + $0xd8] sm:$0xff] }
  0xce   : > { %4936 = vmatmul.msk.f32.gmra.mxu1 %vm349_vm2, %v5628_v53  ;;  %vm337_vm11 = vcmp.eq.s32.totalorder %v5750_v50, %v269_v16  ;;  %v5875_v16 = vld [vmem:[%s5825_s4 + $0xd0] sm:$0xff]  ;;  %vm3702_vm2 = vcmask 64512  }
  0xcf   : > { %4920 = vmatmul.msk.f32.gmra.mxu0 %vm333_vm3, %v5628_v53 }
  0xd4   : > { %v272_v17 = vpop.permute.xlu0 %271 }
  0xd5   : > { %vm338_vm13 = vcmp.eq.s32.totalorder %v5750_v50, %v272_v17  ;;  %v275_v19 = vpop.permute.xlu1 %274  ;;  %v578_v17 = vld [vmem:[%s5825_s4 + $0xe8] sm:$0xff] }
  0xd6   : > { %4937 = vmatmul.msk.f32.gmra.mxu1 %vm350_vm4, %v5628_v53  ;;  %vm339_vm15 = vcmp.eq.s32.totalorder %v5750_v50, %v275_v19  ;;  %v580_v19 = vld [vmem:[%s5825_s4 + $0xf8] sm:$0xff] }
  0xd7   : > { %4921 = vmatmul.msk.f32.gmra.mxu0 %vm334_vm5, %v5628_v53 }
  0xde   : > { %4938 = vmatmul.msk.f32.gmra.mxu1 %vm351_vm6, %v5628_v53 }
  0xdf   : > { %4922 = vmatmul.msk.f32.gmra.mxu0 %vm335_vm7, %v5628_v53 }
  0xe6   : > { %4939 = vmatmul.msk.f32.gmra.mxu1 %vm352_vm8, %v5628_v53 }
  0xe7   : > { %4923 = vmatmul.msk.f32.gmra.mxu0 %vm336_vm9, %v5628_v53 }
  0xee   : > { %4940 = vmatmul.msk.f32.gmra.mxu1 %vm353_vm10, %v5628_v53 }
  0xef   : > { %4924 = vmatmul.msk.f32.gmra.mxu0 %vm337_vm11, %v5628_v53 }
  0xf6   : > { %4941 = vmatmul.msk.f32.gmra.mxu1 %vm354_vm12, %v5628_v53 }
  0xf7   : > { %4925 = vmatmul.msk.f32.gmra.mxu0 %vm338_vm13, %v5628_v53 }
  0xfe   : > { %4942 = vmatmul.msk.f32.gmra.mxu1 %vm355_vm14, %v5628_v53 }
  0xff   : > { %4926 = vmatmul.msk.f32.gmra.mxu0 %vm339_vm15, %v5628_v53  ;;  %v550_v53 = vld [vmem:[%s5825_s4 + $0x8] sm:$0xff] }
 0x103   : > { %v5816_v20 = vpop.f32.mrf.mxu1 }
 0x104   : > { %v5818_v21 = vpop.f32.mrf.mxu0 }
 0x10b   : > { %v504_v22 = vpop.f32.mrf.mxu1 }
 0x10c   : > { %v456_v23 = vpop.f32.mrf.mxu0 }
 0x113   : > { %v507_v24 = vpop.f32.mrf.mxu1 }
 0x114   : > { %v459_v25 = vpop.f32.mrf.mxu0 }
 0x11b   : > { %v510_v26 = vpop.f32.mrf.mxu1 }
 0x11c   : > { %v462_v27 = vpop.f32.mrf.mxu0 }
 0x123   : > { %v513_v28 = vpop.f32.mrf.mxu1 }
 0x124   : > { %v465_v29 = vpop.f32.mrf.mxu0 }
 0x12b   : > { %v516_v30 = vpop.f32.mrf.mxu1 }
 0x12c   : > { %v468_v31 = vpop.f32.mrf.mxu0 }
 0x133   : > { %v519_v32 = vpop.f32.mrf.mxu1 }
 0x134   : > { %v471_v33 = vpop.f32.mrf.mxu0 }
 0x13b   : > { %v522_v34 = vpop.f32.mrf.mxu1 }
 0x13c   : > { %v474_v35 = vpop.f32.mrf.mxu0 }
 0x143   : > { %v525_v36 = vpop.f32.mrf.mxu1 }
 0x144   : > { %v477_v37 = vpop.f32.mrf.mxu0 }
 0x14b   : > { %v528_v38 = vpop.f32.mrf.mxu1 }
 0x14c   : > { %v480_v39 = vpop.f32.mrf.mxu0 }
 0x153   : > { %v531_v40 = vpop.f32.mrf.mxu1 }
 0x154   : > { %v483_v41 = vpop.f32.mrf.mxu0 }
 0x15b   : > { %v534_v42 = vpop.f32.mrf.mxu1 }
 0x15c   : > { %v486_v43 = vpop.f32.mrf.mxu0 }
 0x163   : > { %v537_v44 = vpop.f32.mrf.mxu1 }
 0x164   : > { %v489_v45 = vpop.f32.mrf.mxu0 }
 0x16b   : > { %v540_v46 = vpop.f32.mrf.mxu1 }
 0x16c   : > { %v492_v47 = vpop.f32.mrf.mxu0 }
 0x173   : > { %v543_v48 = vpop.f32.mrf.mxu1 }
 0x174   : > { %v495_v49 = vpop.f32.mrf.mxu0 }
 0x17b   : > { %v546_v51 = vpop.f32.mrf.mxu1 }
 0x17c   : > { %v498_v52 = vpop.f32.mrf.mxu0  ;;  %738 = vmatpush.msra.mxu2 %v546_v51 }
 0x17d   : > { %625 = vmatpush.msrb.mxu1 %v498_v52  ;;  %v594_v52 = vld [vmem:[%s5825_s4 + $0x168] sm:$0xff] }
 0x17e   : > { %739 = vmatpush.msra.mxu2 %v543_v48  ;;  %v5916_v48 = vld [vmem:[%s5825_s4 + $0x150] sm:$0xff] }
 0x17f   : > { %626 = vmatpush.msrb.mxu1 %v495_v49 }
 0x180   : > { %740 = vmatpush.msra.mxu2 %v540_v46  ;;  %v592_v46 = vld [vmem:[%s5825_s4 + $0x158] sm:$0xff] }
 0x181   : > { %627 = vmatpush.msrb.mxu1 %v492_v47 }
 0x182   : > { %741 = vmatpush.msra.mxu2 %v537_v44 }
 0x183   : > { %628 = vmatpush.msrb.mxu1 %v489_v45 }
 0x184   : > { %742 = vmatpush.msra.mxu2 %v534_v42 }
 0x185   : > { %629 = vmatpush.msrb.mxu1 %v486_v43  ;;  %v5909_v43 = vld [vmem:[%s5825_s4 + $0x140] sm:$0xff] }
 0x186   : > { %743 = vmatpush.msra.mxu2 %v531_v40 }
 0x187   : > { %630 = vmatpush.msrb.mxu1 %v483_v41  ;;  %v590_v41 = vld [vmem:[%s5825_s4 + $0x148] sm:$0xff] }
 0x188   : > { %744 = vmatpush.msra.mxu2 %v528_v38  ;;  %v5902_v38 = vld [vmem:[%s5825_s4 + $0x130] sm:$0xff] }
 0x189   : > { %631 = vmatpush.msrb.mxu1 %v480_v39 }
 0x18a   : > { %745 = vmatpush.msra.mxu2 %v525_v36  ;;  %v588_v36 = vld [vmem:[%s5825_s4 + $0x138] sm:$0xff] }
 0x18b   : > { %632 = vmatpush.msrb.mxu1 %v477_v37 }
 0x18c   : > { %746 = vmatpush.msra.mxu2 %v522_v34 }
 0x18d   : > { %633 = vmatpush.msrb.mxu1 %v474_v35 }
 0x18e   : > { %747 = vmatpush.msra.mxu2 %v519_v32 }
 0x18f   : > { %634 = vmatpush.msrb.mxu1 %v471_v33  ;;  %v5895_v33 = vld [vmem:[%s5825_s4 + $0x120] sm:$0xff] }
 0x190   : > { %748 = vmatpush.msra.mxu2 %v516_v30 }
 0x191   : > { %635 = vmatpush.msrb.mxu1 %v468_v31  ;;  %v586_v31 = vld [vmem:[%s5825_s4 + $0x128] sm:$0xff] }
 0x192   : > { %749 = vmatpush.msra.mxu2 %v513_v28  ;;  %v583_v28 = vld [vmem:[%s5825_s4 + $0x110] sm:$0xff] }
 0x193   : > { %636 = vmatpush.msrb.mxu1 %v465_v29 }
 0x194   : > { %750 = vmatpush.msra.mxu2 %v510_v26  ;;  %v584_v26 = vld [vmem:[%s5825_s4 + $0x118] sm:$0xff] }
 0x195   : > { %637 = vmatpush.msrb.mxu1 %v462_v27 }
 0x196   : > { %751 = vmatpush.msra.mxu2 %v507_v24 }
 0x197   : > { %638 = vmatpush.msrb.mxu1 %v459_v25 }
 0x198   : > { %752 = vmatpush.msra.mxu2 %v504_v22 }
 0x199   : > { %639 = vmatpush.msrb.mxu1 %v456_v23  ;;  %v581_v23 = vld [vmem:[%s5825_s4 + $0x100] sm:$0xff] }
 0x19a   : > { %753 = vmatpush.msra.mxu2 %v5816_v20  ;;  %v579_v20 = vld [vmem:[%s5825_s4 + $0xf0] sm:$0xff] }
 0x19b   : > { %640 = vmatpush.msrb.mxu1 %v5818_v21  ;;  %754 = vmatmul.f32.vlgmr.msra.gmra.mxu2 %v550_v53  ;;  %v582_v21 = vld [vmem:[%s5825_s4 + $0x108] sm:$0xff] }
 0x19c   : > { %641 = vmatmul.f32.vlgmr.msrb.gmra.mxu1 %v549_v54  ;;  %v5923_v54 = vld [vmem:[%s5825_s4 + $0x160] sm:$0xff] }
 0x1a3   : > { %757 = vmatmul.f32.gmra.mxu2 %v552_v55 }
 0x1a4   : > { %644 = vmatmul.f32.gmra.mxu1 %v551_v56 }
 0x1ab   : > { %760 = vmatmul.f32.gmra.mxu2 %v554_v57  ;;  %v596_v57 = vld [vmem:[%s5825_s4 + $0x178] sm:$0xff] }
 0x1ac   : > { %647 = vmatmul.f32.gmra.mxu1 %v553_v58 }
 0x1b3   : > { %763 = vmatmul.f32.gmra.mxu2 %v556_v59  ;;  %v5930_v59 = vld [vmem:[%s5825_s4 + $0x170] sm:$0xff] }
 0x1b4   : > { %650 = vmatmul.f32.gmra.mxu1 %v555_v60 }
 0x1bb   : > { %766 = vmatmul.f32.gmra.mxu2 %v558_v61 }
 0x1bc   : > { %653 = vmatmul.f32.gmra.mxu1 %v557_v62  ;;  %v598_v62 = vld [vmem:[%s5825_s4 + $0x188] sm:$0xff] }
 0x1c3   : > { %769 = vmatmul.f32.gmra.mxu2 %v560_v63 }
 0x1c4   : > { %656 = vmatmul.f32.gmra.mxu1 %v559_v0  ;;  %v5939_v0 = vld [vmem:[%s5825_s4 + $0x180] sm:$0xff] }
 0x1cb   : > { %772 = vmatmul.f32.gmra.mxu2 %v562_v1  ;;  %v616_v1 = vld [vmem:[%s8174_s2 + $0x98] sm:$0xff] }
 0x1cc   : > { %659 = vmatmul.f32.gmra.mxu1 %v561_v2  ;;  %961 = vmatpush.msrb.mxu2 %v616_v1 }
 0x1cd   : > { %5314 = vmatpush.msra.mxu3 %v616_v1 }
 0x1d3   : > { %775 = vmatmul.f32.gmra.mxu2 %v564_v3  ;;  %v600_v3 = vld [vmem:[%s5825_s4 + $0x198] sm:$0xff] }
 0x1d4   : > { %662 = vmatmul.f32.gmra.mxu1 %v5845_v4 }
 0x1db   : > { %778 = vmatmul.f32.gmra.mxu2 %v566_v5 }
 0x1dc   : > { %665 = vmatmul.f32.gmra.mxu1 %v5850_v6 }
 0x1e3   : > { %781 = vmatmul.f32.gmra.mxu2 %v568_v7  ;;  %v5951_v7 = vld [vmem:[%s5825_s4 + $0x190] sm:$0xff] }
 0x1e4   : > { %668 = vmatmul.f32.gmra.mxu1 %v5855_v8 }
 0x1eb   : > { %784 = vmatmul.f32.gmra.mxu2 %v570_v9  ;;  %v615_v9 = vld [vmem:[%s8174_s2 + $0x90] sm:$0xff] }
 0x1ec   : > { %671 = vmatmul.f32.gmra.mxu1 %v5860_v10  ;;  %5315 = vmatpush.msra.mxu3 %v615_v9 }
 0x1ed   : > { %962 = vmatpush.msrb.mxu2 %v615_v9 }
 0x1f3   : > { %787 = vmatmul.f32.gmra.mxu2 %v572_v11 }
 0x1f4   : > { %674 = vmatmul.f32.gmra.mxu1 %v5865_v12 }
 0x1fb   : > { %790 = vmatmul.f32.gmra.mxu2 %v574_v13  ;;  %v614_v13 = vld [vmem:[%s8174_s2 + $0x88] sm:$0xff] }
 0x1fc   : > { %677 = vmatmul.f32.gmra.mxu1 %v5870_v14  ;;  %5316 = vmatpush.msra.mxu3 %v614_v13 }
 0x1fd   : > { %963 = vmatpush.msrb.mxu2 %v614_v13 }
 0x203   : > { %793 = vmatmul.f32.gmra.mxu2 %v576_v15  ;;  %v613_v15 = vld [vmem:[%s8174_s2 + $0x80] sm:$0xff] }
 0x204   : > { %680 = vmatmul.f32.gmra.mxu1 %v5875_v16  ;;  %5317 = vmatpush.msra.mxu3 %v613_v15 }
 0x205   : > { %964 = vmatpush.msrb.mxu2 %v613_v15 }
 0x20b   : > { %796 = vmatmul.f32.gmra.mxu2 %v578_v17  ;;  %v602_v17 = vld [vmem:[%s5825_s4 + $0x1a8] sm:$0xff] }
 0x20c   : > { %683 = vmatmul.f32.gmra.mxu1 %v5880_v18 }
 0x213   : > { %799 = vmatmul.f32.gmra.mxu2 %v580_v19 }
 0x214   : > { %686 = vmatmul.f32.gmra.mxu1 %v579_v20  ;;  %v5969_v20 = vld [vmem:[%s5825_s4 + $0x1a0] sm:$0xff] }
 0x219   : > { %v642_v22 = vpop.f32.mrf.mxu1 }
 0x21b   : > { %802 = vmatmul.f32.gmra.mxu2 %v582_v21 }
 0x21c   : > { %689 = vmatmul.f32.gmra.mxu1 %v581_v23 }
 0x21e   : > { %v755_v24 = vpop.f32.mrf.mxu2 }
 0x21f   : > { %v5887_v25 = vadd.f32 %v755_v24, %v642_v22  ;;  %v604_v22 = vld [vmem:[%s5825_s4 + $0x1b8] sm:$0xff]  ;;  %v5978_v24 = vld [vmem:[%s5825_s4 + $0x1b0] sm:$0xff] }
 0x221   : > { %v645_v27 = vpop.f32.mrf.mxu1 }
 0x223   : > { %805 = vmatmul.f32.gmra.mxu2 %v584_v26 }
 0x224   : > { %692 = vmatmul.f32.gmra.mxu1 %v583_v28 }
 0x226   : > { %v758_v29 = vpop.f32.mrf.mxu2 }
 0x227   : > { %v5891_v30 = vadd.f32 %v758_v29, %v645_v27  ;;  %v606_v27 = vld [vmem:[%s5825_s4 + $0x1c8] sm:$0xff]  ;;  %v5987_v29 = vld [vmem:[%s5825_s4 + $0x1c0] sm:$0xff] }
 0x229   : > { %v648_v32 = vpop.f32.mrf.mxu1 }
 0x22b   : > { %808 = vmatmul.f32.gmra.mxu2 %v586_v31 }
 0x22c   : > { %695 = vmatmul.f32.gmra.mxu1 %v5895_v33 }
 0x22e   : > { %v761_v34 = vpop.f32.mrf.mxu2 }
 0x22f   : > { %v5898_v35 = vadd.f32 %v761_v34, %v648_v32  ;;  %v608_v32 = vld [vmem:[%s5825_s4 + $0x1d8] sm:$0xff] }
 0x231   : > { %v651_v37 = vpop.f32.mrf.mxu1 }
 0x233   : > { %811 = vmatmul.f32.gmra.mxu2 %v588_v36  ;;  %v5994_v36 = vld [vmem:[%s5825_s4 + $0x1d0] sm:$0xff] }
 0x234   : > { %698 = vmatmul.f32.gmra.mxu1 %v5902_v38 }
 0x236   : > { %v764_v39 = vpop.f32.mrf.mxu2 }
 0x237   : > { %v5905_v40 = vadd.f32 %v764_v39, %v651_v37 }
 0x239   : > { %v654_v42 = vpop.f32.mrf.mxu1 }
 0x23b   : > { %814 = vmatmul.f32.gmra.mxu2 %v590_v41  ;;  %v610_v41 = vld [vmem:[%s5825_s4 + $0x1e8] sm:$0xff] }
 0x23c   : > { %701 = vmatmul.f32.gmra.mxu1 %v5909_v43 }
 0x23e   : > { %v767_v44 = vpop.f32.mrf.mxu2 }
 0x23f   : > { %v5912_v45 = vadd.f32 %v767_v44, %v654_v42  ;;  %v6000_v44 = vld [vmem:[%s5825_s4 + $0x1e0] sm:$0xff] }
 0x241   : > { %v657_v47 = vpop.f32.mrf.mxu1 }
 0x243   : > { %817 = vmatmul.f32.gmra.mxu2 %v592_v46 }
 0x244   : > { %704 = vmatmul.f32.gmra.mxu1 %v5916_v48 }
 0x246   : > { %v770_v49 = vpop.f32.mrf.mxu2 }
 0x247   : > { %v5919_v51 = vadd.f32 %v770_v49, %v657_v47  ;;  %v612_v49 = vld [vmem:[%s5825_s4 + $0x1f8] sm:$0xff] }
 0x249   : > { %v660_v53 = vpop.f32.mrf.mxu1 }
 0x24b   : > { %820 = vmatmul.f32.gmra.mxu2 %v594_v52 }
 0x24c   : > { %707 = vmatmul.f32.gmra.mxu1 %v5923_v54 }
 0x24e   : > { %v773_v55 = vpop.f32.mrf.mxu2 }
 0x24f   : > { %v5926_v56 = vadd.f32 %v773_v55, %v660_v53  ;;  %v6006_v53 = vld [vmem:[%s5825_s4 + $0x1f0] sm:$0xff] }
 0x251   : > { %v663_v58 = vpop.f32.mrf.mxu1 }
 0x253   : > { %823 = vmatmul.f32.gmra.mxu2 %v596_v57 }
 0x254   : > { %710 = vmatmul.f32.gmra.mxu1 %v5930_v59 }
 0x256   : > { %v776_v60 = vpop.f32.mrf.mxu2 }
 0x257   : > { %v5933_v61 = vadd.f32 %v776_v60, %v663_v58 }
 0x259   : > { %v5936_v63 = vpop.f32.mrf.mxu1 }
 0x25b   : > { %826 = vmatmul.f32.gmra.mxu2 %v598_v62 }
 0x25c   : > { %713 = vmatmul.f32.gmra.mxu1 %v5939_v0 }
 0x25e   : > { %v5945_v2 = vpop.f32.mrf.mxu2 }
 0x261   : > { %v5948_v5 = vpop.f32.mrf.mxu1 }
 0x263   : > { %829 = vmatmul.f32.gmra.mxu2 %v600_v3 }
 0x264   : > { %716 = vmatmul.f32.gmra.mxu1 %v5951_v7 }
 0x266   : > { %v5957_v11 = vpop.f32.mrf.mxu2 }
 0x269   : > { %v5966_v19 = vpop.f32.mrf.mxu1 }
 0x26b   : > { %832 = vmatmul.f32.gmra.mxu2 %v602_v17 }
 0x26c   : > { %719 = vmatmul.f32.gmra.mxu1 %v5969_v20 }
 0x26e   : > { %v5972_v21 = vpop.f32.mrf.mxu2 }
 0x271   : > { %v5975_v23 = vpop.f32.mrf.mxu1 }
 0x273   : > { %835 = vmatmul.f32.gmra.mxu2 %v604_v22 }
 0x274   : > { %722 = vmatmul.f32.gmra.mxu1 %v5978_v24 }
 0x276   : > { %v5981_v26 = vpop.f32.mrf.mxu2 }
 0x279   : > { %v5984_v28 = vpop.f32.mrf.mxu1 }
 0x27b   : > { %838 = vmatmul.f32.gmra.mxu2 %v606_v27 }
 0x27c   : > { %725 = vmatmul.f32.gmra.mxu1 %v5987_v29 }
 0x27e   : > { %v5990_v31 = vpop.f32.mrf.mxu2 }
 0x281   : > { %v681_v34 = vpop.f32.mrf.mxu1 }
 0x283   : > { %841 = vmatmul.f32.gmra.mxu2 %v608_v32 }
 0x284   : > { %728 = vmatmul.f32.gmra.mxu1 %v5994_v36 }
 0x286   : > { %v794_v37 = vpop.f32.mrf.mxu2 }
 0x287   : > { %v795_v39 = vadd.f32 %v794_v37, %v681_v34 }
 0x289   : > { %4956 = vmatmul.msk.f32.vlgmr.msra.gmra.mxu3 %vm852_vm0, %v795_v39  ;;  %v684_v42 = vpop.f32.mrf.mxu1 }
 0x28b   : > { %844 = vmatmul.f32.gmra.mxu2 %v610_v41 }
 0x28c   : > { %731 = vmatmul.f32.gmra.mxu1 %v6000_v44 }
 0x28e   : > { %v797_v46 = vpop.f32.mrf.mxu2 }
 0x28f   : > { %v798_v47 = vadd.f32 %v797_v46, %v684_v42 }
 0x291   : > { %4957 = vmatmul.msk.f32.gmra.mxu3 %vm852_vm0, %v798_v47  ;;  %v687_v52 = vpop.f32.mrf.mxu1 }
 0x293   : > { %847 = vmatmul.f32.gmra.mxu2 %v612_v49 }
 0x294   : > { %734 = vmatmul.f32.gmra.mxu1 %v6006_v53 }
 0x296   : > { %v800_v55 = vpop.f32.mrf.mxu2 }
 0x297   : > { %v801_v57 = vadd.f32 %v800_v55, %v687_v52  ;;  %v783_v55 = vadd.f32 %v5957_v11, %v5948_v5  ;;  %v789_v5 = vadd.f32 %v5981_v26, %v5975_v23  ;;  %v620_v23 = vld [vmem:[%s8174_s2 + $0xb8] sm:$0xff] }
 0x298   : > { %1269 = vmatpush.msrb.mxu3 %v620_v23 }
 0x299   : > { %4958 = vmatmul.msk.f32.gmra.mxu3 %vm852_vm0, %v801_v57  ;;  %v690_v58 = vpop.f32.mrf.mxu1 }
 0x29b   : > { %4943 = vmatmul.msk.f32.vlgmr.msrb.gmra.mxu2 %vm852_vm0, %v5887_v25 }
 0x29e   : > { %v803_v60 = vpop.f32.mrf.mxu2 }
 0x29f   : > { %v804_v62 = vadd.f32 %v803_v60, %v690_v58 }
 0x2a1   : > { %4959 = vmatmul.msk.f32.gmra.mxu3 %vm852_vm0, %v804_v62  ;;  %v693_v1 = vpop.f32.mrf.mxu1 }
 0x2a3   : > { %4944 = vmatmul.msk.f32.gmra.mxu2 %vm852_vm0, %v5891_v30 }
 0x2a6   : > { %v806_v3 = vpop.f32.mrf.mxu2 }
 0x2a7   : > { %v807_v9 = vadd.f32 %v806_v3, %v693_v1 }
 0x2a9   : > { %4960 = vmatmul.msk.f32.gmra.mxu3 %vm852_vm0, %v807_v9  ;;  %v696_v13 = vpop.f32.mrf.mxu1 }
 0x2ab   : > { %4945 = vmatmul.msk.f32.gmra.mxu2 %vm852_vm0, %v5898_v35 }
 0x2ae   : > { %v809_v15 = vpop.f32.mrf.mxu2 }
 0x2af   : > { %v810_v17 = vadd.f32 %v809_v15, %v696_v13  ;;  %v619_v15 = vld [vmem:[%s8174_s2 + $0xb0] sm:$0xff] }
 0x2b0   : > { %1270 = vmatpush.msrb.mxu3 %v619_v15 }
 0x2b1   : > { %4961 = vmatmul.msk.f32.gmra.mxu3 %vm852_vm0, %v810_v17  ;;  %v699_v25 = vpop.f32.mrf.mxu1  ;;  %v617_v17 = vld [vmem:[%s8174_s2 + $0xa0] sm:$0xff] }
 0x2b3   : > { %4946 = vmatmul.msk.f32.gmra.mxu2 %vm852_vm0, %v5905_v40 }
 0x2b6   : > { %v812_v22 = vpop.f32.mrf.mxu2 }
 0x2b7   : > { %v813_v27 = vadd.f32 %v812_v22, %v699_v25 }
 0x2b9   : > { %4962 = vmatmul.msk.f32.gmra.mxu3 %vm852_vm0, %v813_v27  ;;  %v702_v30 = vpop.f32.mrf.mxu1 }
 0x2bb   : > { %4947 = vmatmul.msk.f32.gmra.mxu2 %vm852_vm0, %v5912_v45 }
 0x2be   : > { %v815_v32 = vpop.f32.mrf.mxu2 }
 0x2bf   : > { %v816_v34 = vadd.f32 %v815_v32, %v702_v30 }
 0x2c1   : > { %4963 = vmatmul.msk.f32.gmra.mxu3 %vm852_vm0, %v816_v34  ;;  %v705_v35 = vpop.f32.mrf.mxu1 }
 0x2c3   : > { %4948 = vmatmul.msk.f32.gmra.mxu2 %vm852_vm0, %v5919_v51  ;;  %v780_v51 = vadd.f32 %v5945_v2, %v5936_v63  ;;  %v786_v63 = vadd.f32 %v5972_v21, %v5966_v19  ;;  %v792_v19 = vadd.f32 %v5990_v31, %v5984_v28  ;;  %v618_v28 = vld [vmem:[%s8174_s2 + $0xa8] sm:$0xff] }
 0x2c4   : > { %1271 = vmatpush.msrb.mxu3 %v618_v28 }
 0x2c6   : > { %v818_v37 = vpop.f32.mrf.mxu2  ;;  %1272 = vmatpush.msrb.mxu3 %v617_v17 }
 0x2c7   : > { %v819_v39 = vadd.f32 %v818_v37, %v705_v35 }
 0x2c9   : > { %4964 = vmatmul.msk.f32.gmra.mxu3 %vm852_vm0, %v819_v39  ;;  %v708_v40 = vpop.f32.mrf.mxu1 }
 0x2cb   : > { %4949 = vmatmul.msk.f32.gmra.mxu2 %vm852_vm0, %v5926_v56 }
 0x2ce   : > { %v821_v41 = vpop.f32.mrf.mxu2 }
 0x2cf   : > { %v822_v42 = vadd.f32 %v821_v41, %v708_v40  ;;  %v6078_v41 = vld [vmem:[%s8174_s2 + $0xc0] ss:$0 sm:$0xff] }
 0x2d1   : > { %4965 = vmatmul.msk.f32.gmra.mxu3 %vm852_vm0, %v822_v42  ;;  %v711_v45 = vpop.f32.mrf.mxu1 }
 0x2d3   : > { %4950 = vmatmul.msk.f32.gmra.mxu2 %vm852_vm0, %v5933_v61 }
 0x2d6   : > { %v824_v46 = vpop.f32.mrf.mxu2 }
 0x2d7   : > { %v825_v47 = vadd.f32 %v824_v46, %v711_v45  ;;  %v6084_v46 = vld [vmem:[%s8174_s2 + $0xc1] ss:$0 sm:$0xff] }
 0x2d9   : > { %4966 = vmatmul.msk.f32.gmra.mxu3 %vm852_vm0, %v825_v47  ;;  %v714_v49 = vpop.f32.mrf.mxu1 }
 0x2db   : > { %4951 = vmatmul.msk.f32.gmra.mxu2 %vm852_vm0, %v780_v51  ;;  %v6089_v51 = vld [vmem:[%s8174_s2 + $0xc2] ss:$0 sm:$0xff] }
 0x2de   : > { %v827_v52 = vpop.f32.mrf.mxu2 }
 0x2df   : > { %v828_v56 = vadd.f32 %v827_v52, %v714_v49 }
 0x2e1   : > { %4967 = vmatmul.msk.f32.gmra.mxu3 %vm852_vm0, %v828_v56  ;;  %v717_v57 = vpop.f32.mrf.mxu1 }
 0x2e3   : > { %4952 = vmatmul.msk.f32.gmra.mxu2 %vm852_vm0, %v783_v55 }
 0x2e6   : > { %v830_v61 = vpop.f32.mrf.mxu2 }
 0x2e7   : > { %v831_v58 = vadd.f32 %v830_v61, %v717_v57 }
 0x2e9   : > { %4968 = vmatmul.msk.f32.gmra.mxu3 %vm852_vm0, %v831_v58  ;;  %v720_v2 = vpop.f32.mrf.mxu1 }
 0x2eb   : > { %4953 = vmatmul.msk.f32.gmra.mxu2 %vm852_vm0, %v786_v63 }
 0x2ee   : > { %v833_v60 = vpop.f32.mrf.mxu2 }
 0x2ef   : > { %v834_v62 = vadd.f32 %v833_v60, %v720_v2 }
 0x2f1   : > { %4969 = vmatmul.msk.f32.gmra.mxu3 %vm852_vm0, %v834_v62  ;;  %v723_v11 = vpop.f32.mrf.mxu1 }
 0x2f3   : > { %4954 = vmatmul.msk.f32.gmra.mxu2 %vm852_vm0, %v789_v5 }
 0x2f6   : > { %v836_v1 = vpop.f32.mrf.mxu2 }
 0x2f7   : > { %v837_v3 = vadd.f32 %v836_v1, %v723_v11 }
 0x2f9   : > { %4970 = vmatmul.msk.f32.gmra.mxu3 %vm852_vm0, %v837_v3  ;;  %v726_v21 = vpop.f32.mrf.mxu1 }
 0x2fb   : > { %4955 = vmatmul.msk.f32.gmra.mxu2 %vm852_vm0, %v792_v19 }
 0x2fe   : > { %v839_v9 = vpop.f32.mrf.mxu2 }
 0x2ff   : > { %v840_v13 = vadd.f32 %v839_v9, %v726_v21 }
 0x301   : > { %4971 = vmatmul.msk.f32.gmra.mxu3 %vm852_vm0, %v840_v13  ;;  %v729_v26 = vpop.f32.mrf.mxu1 }
 0x306   : > { %v842_v31 = vpop.f32.mrf.mxu2 }
 0x307   : > { %v843_v25 = vadd.f32 %v842_v31, %v729_v26 }
 0x309   : > { %4972 = vmatmul.msk.f32.gmra.mxu3 %vm852_vm0, %v843_v25  ;;  %v732_v22 = vpop.f32.mrf.mxu1 }
 0x30c   : > { %v6067_v27 = vpop.f32.mrf.mxu3 }
 0x30e   : > { %v845_v30 = vpop.f32.mrf.mxu2 }
 0x30f   : > { %v846_v32 = vadd.f32 %v845_v30, %v732_v22 }
 0x311   : > { %4973 = vmatmul.msk.f32.gmra.mxu3 %vm852_vm0, %v846_v32  ;;  %v735_v35 = vpop.f32.mrf.mxu1 }
 0x314   : > { %v6070_v34 = vpop.f32.mrf.mxu3 }
 0x316   : > { %v848_v37 = vpop.f32.mrf.mxu2 }
 0x317   : > { %v849_v39 = vadd.f32 %v848_v37, %v735_v35 }
 0x319   : > { %4974 = vmatmul.msk.f32.gmra.mxu3 %vm852_vm0, %v849_v39 }
 0x31c   : > { %v6073_v40 = vpop.f32.mrf.mxu3 }
 0x31e   : > { %v966_v42 = vpop.f32.mrf.mxu2 }
 0x31f   : > { %v967_v45 = vadd.f32 %v6078_v41, %v966_v42 }
 0x321   : > { %v1062_v47 = vmax.f32 %v967_v45, 0.0 }
 0x323   : > { %v1095_v49 = vmul.f32 %v6084_v46, %v1062_v47 }
 0x324   : > { %v6092_v52 = vpop.f32.mrf.mxu3 }
 0x325   : > { %v1128_v56 = vadd.f32 %v6089_v51, %v1095_v49 }
 0x326   : > { %v969_v55 = vpop.f32.mrf.mxu2 }
 0x327   : > { %v970_v57 = vadd.f32 %v6078_v41, %v969_v55  ;;  %4975 = vmatmul.msk.f32.vlgmr.msrb.gmra.mxu3 %vm852_vm0, %v1128_v56 }
 0x329   : > { %v1063_v61 = vmax.f32 %v970_v57, 0.0 }
 0x32b   : > { %v1096_v58 = vmul.f32 %v6084_v46, %v1063_v61 }
 0x32c   : > { %v6098_v63 = vpop.f32.mrf.mxu3 }
 0x32d   : > { %v1129_v2 = vadd.f32 %v6089_v51, %v1096_v58 }
 0x32e   : > { %v972_v60 = vpop.f32.mrf.mxu2 }
 0x32f   : > { %v973_v62 = vadd.f32 %v6078_v41, %v972_v60  ;;  %4976 = vmatmul.msk.f32.gmra.mxu3 %vm852_vm0, %v1129_v2 }
 0x331   : > { %v1064_v5 = vmax.f32 %v973_v62, 0.0 }
 0x333   : > { %v1097_v11 = vmul.f32 %v6084_v46, %v1064_v5 }
 0x334   : > { %v6104_v1 = vpop.f32.mrf.mxu3 }
 0x335   : > { %v1130_v3 = vadd.f32 %v6089_v51, %v1097_v11 }
 0x336   : > { %v975_v19 = vpop.f32.mrf.mxu2 }
 0x337   : > { %v976_v21 = vadd.f32 %v6078_v41, %v975_v19  ;;  %4977 = vmatmul.msk.f32.gmra.mxu3 %vm852_vm0, %v1130_v3 }
 0x339   : > { %v1065_v9 = vmax.f32 %v976_v21, 0.0 }
 0x33b   : > { %v1098_v13 = vmul.f32 %v6084_v46, %v1065_v9 }
 0x33c   : > { %v6110_v23 = vpop.f32.mrf.mxu3 }
 0x33d   : > { %v1131_v26 = vadd.f32 %v6089_v51, %v1098_v13 }
 0x33e   : > { %v978_v15 = vpop.f32.mrf.mxu2 }
 0x33f   : > { %v979_v28 = vadd.f32 %v6078_v41, %v978_v15  ;;  %4978 = vmatmul.msk.f32.gmra.mxu3 %vm852_vm0, %v1131_v26 }
 0x341   : > { %v1066_v31 = vmax.f32 %v979_v28, 0.0 }
 0x343   : > { %v1099_v17 = vmul.f32 %v6084_v46, %v1066_v31 }
 0x344   : > { %v6116_v25 = vpop.f32.mrf.mxu3 }
 0x345   : > { %v1132_v22 = vadd.f32 %v6089_v51, %v1099_v17 }
 0x346   : > { %v981_v30 = vpop.f32.mrf.mxu2 }
 0x347   : > { %v982_v32 = vadd.f32 %v6078_v41, %v981_v30  ;;  %4979 = vmatmul.msk.f32.gmra.mxu3 %vm852_vm0, %v1132_v22 }
 0x349   : > { %v1067_v35 = vmax.f32 %v982_v32, 0.0 }
 0x34b   : > { %v1100_v37 = vmul.f32 %v6084_v46, %v1067_v35 }
 0x34c   : > { %v6122_v39 = vpop.f32.mrf.mxu3 }
 0x34d   : > { %v1133_v42 = vadd.f32 %v6089_v51, %v1100_v37 }
 0x34e   : > { %v984_v45 = vpop.f32.mrf.mxu2 }
 0x34f   : > { %v985_v47 = vadd.f32 %v6078_v41, %v984_v45  ;;  %4980 = vmatmul.msk.f32.gmra.mxu3 %vm852_vm0, %v1133_v42 }
 0x351   : > { %v1068_v49 = vmax.f32 %v985_v47, 0.0 }
 0x353   : > { %v1101_v56 = vmul.f32 %v6084_v46, %v1068_v49 }
 0x354   : > { %v6128_v55 = vpop.f32.mrf.mxu3 }
 0x355   : > { %v1134_v57 = vadd.f32 %v6089_v51, %v1101_v56 }
 0x356   : > { %v987_v61 = vpop.f32.mrf.mxu2 }
 0x357   : > { %v988_v58 = vadd.f32 %v6078_v41, %v987_v61  ;;  %4981 = vmatmul.msk.f32.gmra.mxu3 %vm852_vm0, %v1134_v57 }
 0x359   : > { %v1069_v2 = vmax.f32 %v988_v58, 0.0 }
 0x35b   : > { %v1102_v60 = vmul.f32 %v6084_v46, %v1069_v2 }
 0x35c   : > { %v6134_v62 = vpop.f32.mrf.mxu3 }
 0x35d   : > { %v1135_v5 = vadd.f32 %v6089_v51, %v1102_v60 }
 0x35e   : > { %v990_v11 = vpop.f32.mrf.mxu2 }
 0x35f   : > { %v991_v3 = vadd.f32 %v6078_v41, %v990_v11  ;;  %4982 = vmatmul.msk.f32.gmra.mxu3 %vm852_vm0, %v1135_v5  ;;  %v1006_v5 = vadd.f32 %v6078_v41, %v6067_v27 }
 0x361   : > { %v1070_v19 = vmax.f32 %v991_v3, 0.0 }
 0x363   : > { %v1103_v21 = vmul.f32 %v6084_v46, %v1070_v19 }
 0x364   : > { %v6140_v9 = vpop.f32.mrf.mxu3 }
 0x365   : > { %v1136_v13 = vadd.f32 %v6089_v51, %v1103_v21  ;;  %v1075_v21 = vmax.f32 %v1006_v5, 0.0 }
 0x366   : > { %v993_v26 = vpop.f32.mrf.mxu2 }
 0x367   : > { %v994_v15 = vadd.f32 %v6078_v41, %v993_v26  ;;  %4983 = vmatmul.msk.f32.gmra.mxu3 %vm852_vm0, %v1136_v13  ;;  %v1108_v26 = vmul.f32 %v6084_v46, %v1075_v21  ;;  %v1024_v21 = vadd.f32 %v6078_v41, %v6110_v23 }
 0x369   : > { %v1071_v28 = vmax.f32 %v994_v15, 0.0  ;;  %v1009_v15 = vadd.f32 %v6078_v41, %v6070_v34 }
 0x36b   : > { %v1104_v31 = vmul.f32 %v6084_v46, %v1071_v28  ;;  %v1141_v28 = vadd.f32 %v6089_v51, %v1108_v26 }
 0x36c   : > { %v6146_v17 = vpop.f32.mrf.mxu3 }
 0x36d   : > { %v1137_v22 = vadd.f32 %v6089_v51, %v1104_v31  ;;  %v1076_v31 = vmax.f32 %v1009_v15, 0.0  ;;  %v1081_v15 = vmax.f32 %v1024_v21, 0.0 }
 0x36e   : > { %v996_v30 = vpop.f32.mrf.mxu2 }
 0x36f   : > { %v997_v32 = vadd.f32 %v6078_v41, %v996_v30  ;;  %4984 = vmatmul.msk.f32.gmra.mxu3 %vm852_vm0, %v1137_v22  ;;  %v1109_v27 = vmul.f32 %v6084_v46, %v1076_v31  ;;  %v1012_v30 = vadd.f32 %v6078_v41, %v6073_v40  ;;  %v1018_v40 = vadd.f32 %v6078_v41, %v6098_v63 }
 0x371   : > { %v1072_v35 = vmax.f32 %v997_v32, 0.0  ;;  %v1142_v32 = vadd.f32 %v6089_v51, %v1109_v27 }
 0x373   : > { %v1105_v37 = vmul.f32 %v6084_v46, %v1072_v35  ;;  %v1077_v35 = vmax.f32 %v1012_v30, 0.0 }
 0x374   : > { %v6152_v42 = vpop.f32.mrf.mxu3 }
 0x375   : > { %v1138_v45 = vadd.f32 %v6089_v51, %v1105_v37  ;;  %v1110_v34 = vmul.f32 %v6084_v46, %v1077_v35 }
 0x376   : > { %v999_v47 = vpop.f32.mrf.mxu2 }
 0x377   : > { %v1000_v49 = vadd.f32 %v6078_v41, %v999_v47  ;;  %4985 = vmatmul.msk.f32.gmra.mxu3 %vm852_vm0, %v1138_v45  ;;  %v1015_v45 = vadd.f32 %v6078_v41, %v6092_v52  ;;  %v1143_v47 = vadd.f32 %v6089_v51, %v1110_v34  ;;  %v1021_v52 = vadd.f32 %v6078_v41, %v6104_v1 }
 0x378   : > { %v1114_v1 = vmul.f32 %v6084_v46, %v1081_v15 }
 0x379   : > { %v1073_v56 = vmax.f32 %v1000_v49, 0.0  ;;  %v1078_v49 = vmax.f32 %v1015_v45, 0.0 }
 0x37a   : > { %v1147_v27 = vadd.f32 %v6089_v51, %v1114_v1 }
 0x37b   : > { %v1106_v57 = vmul.f32 %v6084_v46, %v1073_v56  ;;  %v1111_v56 = vmul.f32 %v6084_v46, %v1078_v49 }
 0x37c   : > { %v6158_v61 = vpop.f32.mrf.mxu3 }
 0x37d   : > { %v1139_v58 = vadd.f32 %v6089_v51, %v1106_v57 }
 0x37e   : > { %v1002_v2 = vpop.f32.mrf.mxu2 }
 0x37f   : > { %v1003_v60 = vadd.f32 %v6078_v41, %v1002_v2  ;;  %4986 = vmatmul.msk.f32.gmra.mxu3 %vm852_vm0, %v1139_v58  ;;  %v1144_v58 = vadd.f32 %v6089_v51, %v1111_v56  ;;  %v1079_v2 = vmax.f32 %v1018_v40, 0.0 }
 0x381   : > { %v1074_v11 = vmax.f32 %v1003_v60, 0.0  ;;  %v1112_v60 = vmul.f32 %v6084_v46, %v1079_v2 }
 0x383   : > { %v1107_v3 = vmul.f32 %v6084_v46, %v1074_v11  ;;  %v1145_v11 = vadd.f32 %v6089_v51, %v1112_v60 }
 0x384   : > { %v6166_v19 = vpop.f32.mrf.mxu3 }
 0x385   : > { %v1140_v13 = vadd.f32 %v6089_v51, %v1107_v3  ;;  %v1080_v3 = vmax.f32 %v1021_v52, 0.0 }
 0x387   : > { %4987 = vmatmul.msk.f32.gmra.mxu3 %vm852_vm0, %v1140_v13  ;;  %v1113_v63 = vmul.f32 %v6084_v46, %v1080_v3 }
 0x389   : > { %v1146_v26 = vadd.f32 %v6089_v51, %v1113_v63 }
 0x38c   : > { %v6174_v22 = vpop.f32.mrf.mxu3 }
 0x38f   : > { %4988 = vmatmul.msk.f32.gmra.mxu3 %vm852_vm0, %v1141_v28  ;;  %v1027_v28 = vadd.f32 %v6078_v41, %v6116_v25 }
 0x391   : > { %v1082_v30 = vmax.f32 %v1027_v28, 0.0 }
 0x393   : > { %v1115_v23 = vmul.f32 %v6084_v46, %v1082_v30 }
 0x394   : > { %v6182_v37 = vpop.f32.mrf.mxu3 }
 0x395   : > { %v1148_v34 = vadd.f32 %v6089_v51, %v1115_v23 }
 0x397   : > { %4989 = vmatmul.msk.f32.gmra.mxu3 %vm852_vm0, %v1142_v32  ;;  %v1030_v32 = vadd.f32 %v6078_v41, %v6122_v39 }
 0x399   : > { %v1083_v45 = vmax.f32 %v1030_v32, 0.0 }
 0x39b   : > { %v1116_v25 = vmul.f32 %v6084_v46, %v1083_v45 }
 0x39c   : > { %v6192_v57 = vpop.f32.mrf.mxu3 }
 0x39d   : > { %v1149_v56 = vadd.f32 %v6089_v51, %v1116_v25 }
 0x39f   : > { %4990 = vmatmul.msk.f32.gmra.mxu3 %vm852_vm0, %v1143_v47  ;;  %v1033_v47 = vadd.f32 %v6078_v41, %v6128_v55 }
 0x3a1   : > { %v1084_v40 = vmax.f32 %v1033_v47, 0.0 }
 0x3a3   : > { %v1117_v39 = vmul.f32 %v6084_v46, %v1084_v40 }
 0x3a5   : > { %v1150_v60 = vadd.f32 %v6089_v51, %v1117_v39 }
 0x3a7   : > { %4991 = vmatmul.msk.f32.gmra.mxu3 %vm852_vm0, %v1144_v58  ;;  %v1036_v58 = vadd.f32 %v6078_v41, %v6134_v62 }
 0x3a9   : > { %v1085_v52 = vmax.f32 %v1036_v58, 0.0 }
 0x3aa   : > { %v6199_v5 = vpop.f32.mrf.mxu3 }
 0x3ab   : > { %v1118_v55 = vmul.f32 %v6084_v46, %v1085_v52 }
 0x3ad   : > { %v1151_v63 = vadd.f32 %v6089_v51, %v1118_v55 }
 0x3af   : > { %4992 = vmatmul.msk.f32.gmra.mxu3 %vm852_vm0, %v1145_v11  ;;  %v1039_v11 = vadd.f32 %v6078_v41, %v6140_v9 }
 0x3b1   : > { %v1086_v21 = vmax.f32 %v1039_v11, 0.0 }
 0x3b2   : > { %v6206_v13 = vpop.f32.mrf.mxu3 }
 0x3b3   : > { %v1119_v62 = vmul.f32 %v6084_v46, %v1086_v21 }
 0x3b5   : > { %v1152_v1 = vadd.f32 %v6089_v51, %v1119_v62 }
 0x3b7   : > { %4993 = vmatmul.msk.f32.gmra.mxu3 %vm852_vm0, %v1146_v26  ;;  %v1042_v26 = vadd.f32 %v6078_v41, %v6146_v17 }
 0x3b9   : > { %v1087_v28 = vmax.f32 %v1042_v26, 0.0 }
 0x3ba   : > { %v6213_v31 = vpop.f32.mrf.mxu3 }
 0x3bb   : > { %v1120_v9 = vmul.f32 %v6084_v46, %v1087_v28 }
 0x3bd   : > { %v1153_v23 = vadd.f32 %v6089_v51, %v1120_v9 }
 0x3bf   : > { %4994 = vmatmul.msk.f32.gmra.mxu3 %vm852_vm0, %v1147_v27  ;;  %v1045_v27 = vadd.f32 %v6078_v41, %v6152_v42  ;;  %v1051_v42 = vadd.f32 %v6078_v41, %v6166_v19  ;;  %v1057_v19 = vadd.f32 %v6078_v41, %v6182_v37 }
 0x3c1   : > { %v1088_v32 = vmax.f32 %v1045_v27, 0.0  ;;  %v1090_v58 = vmax.f32 %v1051_v42, 0.0  ;;  %v1092_v26 = vmax.f32 %v1057_v19, 0.0 }
 0x3c2   : > { %v6220_v35 = vpop.f32.mrf.mxu3 }
 0x3c3   : > { %v1121_v17 = vmul.f32 %v6084_v46, %v1088_v32 }
 0x3c5   : > { %v1154_v25 = vadd.f32 %v6089_v51, %v1121_v17  ;;  %v6288_v17 = vld [vmem:[%s8174_s2 + $0xc3] ss:$0 sm:$0xff] }
 0x3c7   : > { %4995 = vmatmul.msk.f32.gmra.mxu3 %vm852_vm0, %v1148_v34  ;;  %v1048_v34 = vadd.f32 %v6078_v41, %v6158_v61  ;;  %v1054_v61 = vadd.f32 %v6078_v41, %v6174_v22  ;;  %v1060_v22 = vadd.f32 %v6078_v41, %v6192_v57 }
 0x3c9   : > { %v1089_v47 = vmax.f32 %v1048_v34, 0.0  ;;  %v1091_v11 = vmax.f32 %v1054_v61, 0.0  ;;  %v1093_v27 = vmax.f32 %v1060_v22, 0.0  ;;  %v6345_v22 = vld [vmem:[%s5825_s4 + $0x60] sm:$0xff] }
 0x3ca   : > { %v6227_v49 = vpop.f32.mrf.mxu3 }
 0x3cf   : > { %4996 = vmatmul.msk.f32.gmra.mxu3 %vm852_vm0, %v1149_v56  ;;  %v1122_v56 = vmul.f32 %v6084_v46, %v1089_v47 }
 0x3d1   : > { %v1155_v39 = vadd.f32 %v6089_v51, %v1122_v56 }
 0x3d2   : > { %v6234_v2 = vpop.f32.mrf.mxu3 }
 0x3d7   : > { %4997 = vmatmul.msk.f32.gmra.mxu3 %vm852_vm0, %v1150_v60  ;;  %v1123_v60 = vmul.f32 %v6084_v46, %v1090_v58 }
 0x3d9   : > { %v1156_v55 = vadd.f32 %v6089_v51, %v1123_v60 }
 0x3da   : > { %v6241_v3 = vpop.f32.mrf.mxu3 }
 0x3db   : > { %v1293_v61 = vadd.f32 %v6288_v17, %v6241_v3  ;;  %v1281_v3 = vadd.f32 %v6288_v17, %v6213_v31  ;;  %v6325_v31 = vld [vmem:[%s5825_s4 + $0x10] sm:$0xff] }
 0x3df   : > { %4998 = vmatmul.msk.f32.gmra.mxu3 %vm852_vm0, %v1151_v63  ;;  %v1124_v63 = vmul.f32 %v6084_v46, %v1091_v11 }
 0x3e1   : > { %v1157_v62 = vadd.f32 %v6089_v51, %v1124_v63 }
 0x3e2   : > { %v6248_v15 = vpop.f32.mrf.mxu3 }
 0x3e3   : > { %v1296_v60 = vadd.f32 %v6288_v17, %v6248_v15  ;;  %v1284_v15 = vadd.f32 %v6288_v17, %v6220_v35 }
 0x3e7   : > { %4999 = vmatmul.msk.f32.gmra.mxu3 %vm852_vm0, %v1152_v1  ;;  %v1125_v1 = vmul.f32 %v6084_v46, %v1092_v26  ;;  %v6341_v26 = vld [vmem:[%s5825_s4 + $0x50] sm:$0xff] }
 0x3e9   : > { %v1158_v9 = vadd.f32 %v6089_v51, %v1125_v1 }
 0x3ea   : > { %v1298_v30 = vpop.f32.mrf.mxu3 }
 0x3ef   : > { %5000 = vmatmul.msk.f32.gmra.mxu3 %vm852_vm0, %v1153_v23  ;;  %v1126_v23 = vmul.f32 %v6084_v46, %v1093_v27 }
 0x3f1   : > { %v1159_v32 = vadd.f32 %v6089_v51, %v1126_v23 }
 0x3f2   : > { %v1301_v45 = vpop.f32.mrf.mxu3 }
 0x3f3   : > { %v1302_v42 = vadd.f32 %v6288_v17, %v1301_v45 }
 0x3f7   : > { %5001 = vmatmul.msk.f32.gmra.mxu3 %vm852_vm0, %v1154_v25 }
 0x3fa   : > { %v1304_v40 = vpop.f32.mrf.mxu3 }
 0x3fb   : > { %v1305_v56 = vadd.f32 %v6288_v17, %v1304_v40  ;;  %v1290_v40 = vadd.f32 %v6288_v17, %v6234_v2  ;;  %v1278_v2 = vadd.f32 %v6288_v17, %v6206_v13  ;;  %v6329_v13 = vld [vmem:[%s5825_s4 + $0x20] sm:$0xff] }
 0x3ff   : > { %5002 = vmatmul.msk.f32.gmra.mxu3 %vm852_vm0, %v1155_v39  ;;  %v1299_v39 = vadd.f32 %v6288_v17, %v1298_v30  ;;  %v1287_v30 = vadd.f32 %v6288_v17, %v6227_v49  ;;  %v1275_v49 = vadd.f32 %v6288_v17, %v6199_v5  ;;  %v6333_v5 = vld [vmem:[%s5825_s4 + $0x30] sm:$0xff] }
 0x402   : > { %v1307_v52 = vpop.f32.mrf.mxu3 }
 0x403   : > { %v1308_v47 = vadd.f32 %v6288_v17, %v1307_v52 }
 0x407   : > { %5003 = vmatmul.msk.f32.gmra.mxu3 %vm852_vm0, %v1156_v55  ;;  %v6321_v55 = vld [vmem:[%s5825_s4] sm:$0xff] }
 0x40a   : > { %v1310_v21 = vpop.f32.mrf.mxu3 }
 0x40b   : > { %v1311_v46 = vadd.f32 %v6288_v17, %v1310_v21  ;;  %v6337_v21 = vld [vmem:[%s5825_s4 + $0x40] sm:$0xff] }
 0x40f   : > { %5004 = vmatmul.msk.f32.gmra.mxu3 %vm852_vm0, %v1157_v62 }
 0x412   : > { %v1313_v28 = vpop.f32.mrf.mxu3 }
 0x413   : > { %v1314_v25 = vadd.f32 %v6288_v17, %v1313_v28 }
 0x417   : > { %5005 = vmatmul.msk.f32.gmra.mxu3 %vm852_vm0, %v1158_v9 }
 0x41a   : > { %v1316_v37 = vpop.f32.mrf.mxu3 }
 0x41b   : > { %v1317_v57 = vadd.f32 %v6288_v17, %v1316_v37 }
 0x41f   : > { %5006 = vmatmul.msk.f32.gmra.mxu3 %vm852_vm0, %v1159_v32 }
 0x422   : > { %v1319_v34 = vpop.f32.mrf.mxu3 }
 0x423   : > { %v1320_v41 = vadd.f32 %v6288_v17, %v1319_v34 }
 0x425   : > { %1382 = vmatpush.msrb.mxu0 %v1320_v41 }
 0x427   : > { %1383 = vmatpush.msrb.mxu0 %v1317_v57 }
 0x429   : > { %1384 = vmatpush.msrb.mxu0 %v1314_v25 }
 0x42a   : > { %v6294_v51 = vpop.f32.mrf.mxu3 }
 0x42b   : > { %1385 = vmatpush.msrb.mxu0 %v1311_v46 }
 0x42d   : > { %1386 = vmatpush.msrb.mxu0 %v1308_v47 }
 0x42f   : > { %1387 = vmatpush.msrb.mxu0 %v1305_v56  ;;  %v6370_v56 = vld [vmem:[%s5825_s4 + $0xf0] sm:$0xff] }
 0x431   : > { %1388 = vmatpush.msrb.mxu0 %v1302_v42 }
 0x432   : > { %v6300_v58 = vpop.f32.mrf.mxu3 }
 0x433   : > { %1389 = vmatpush.msrb.mxu0 %v1299_v39  ;;  %v1326_v42 = vadd.f32 %v6288_v17, %v6300_v58  ;;  %v1323_v39 = vadd.f32 %v6288_v17, %v6294_v51  ;;  %v6392_v58 = vld [vmem:[%s5825_s4 + $0x110] sm:$0xff]  ;;  %v6401_v51 = vld [vmem:[%s5825_s4 + $0x38] sm:$0xff] }
 0x435   : > { %1390 = vmatpush.msrb.mxu0 %v1296_v60  ;;  %v6380_v60 = vld [vmem:[%s5825_s4 + $0x8] sm:$0xff] }
 0x437   : > { %1391 = vmatpush.msrb.mxu0 %v1293_v61  ;;  %v6384_v61 = vld [vmem:[%s5825_s4 + $0x100] sm:$0xff] }
 0x439   : > { %1392 = vmatpush.msrb.mxu0 %v1290_v40  ;;  %v6388_v40 = vld [vmem:[%s5825_s4 + $0x18] sm:$0xff] }
 0x43a   : > { %v6310_v45 = vpop.f32.mrf.mxu3 }
 0x43b   : > { %1393 = vmatpush.msrb.mxu0 %v1287_v30  ;;  %v6406_v30 = vld [vmem:[%s5825_s4 + $0x48] sm:$0xff] }
 0x43d   : > { %1394 = vmatpush.msrb.mxu0 %v1284_v15  ;;  %v6430_v15 = vld [vmem:[%s5825_s4 + $0x98] sm:$0xff] }
 0x43f   : > { %1395 = vmatpush.msrb.mxu0 %v1281_v3  ;;  %v1372_v3 = vld [vmem:[%s8174_s2 + $0xd8] sm:$0xff] }
 0x441   : > { %1396 = vmatpush.msrb.mxu0 %v1278_v2 }
 0x442   : > { %v1331_v52 = vpop.f32.mrf.mxu3 }
 0x443   : > { %1397 = vmatpush.msrb.mxu0 %v1275_v49  ;;  %v1332_v47 = vadd.f32 %v6288_v17, %v1331_v52  ;;  %v1371_v49 = vld [vmem:[%s8174_s2 + $0xd0] sm:$0xff]  ;;  %v1370_v52 = vld [vmem:[%s8174_s2 + $0xc8] sm:$0xff] }
 0x444   : > { %1398 = vmatmul.f32.vlgmr.msrb.gmra.mxu0 %v6321_v55 }
 0x44a   : > { %v1334_v35 = vpop.f32.mrf.mxu3 }
 0x44b   : > { %v1335_v46 = vadd.f32 %v6288_v17, %v1334_v35  ;;  %v6455_v35 = vld [vmem:[%s5825_s4 + $0xc8] sm:$0xff] }
 0x44c   : > { %1401 = vmatmul.f32.gmra.mxu0 %v6325_v31 }
 0x452   : > { %v1337_v11 = vpop.f32.mrf.mxu3 }
 0x454   : > { %1404 = vmatmul.f32.gmra.mxu0 %v6329_v13 }
 0x45a   : > { %v1340_v63 = vpop.f32.mrf.mxu3 }
 0x45b   : > { %v1341_v25 = vadd.f32 %v6288_v17, %v1340_v63 }
 0x45c   : > { %1407 = vmatmul.f32.gmra.mxu0 %v6333_v5 }
 0x462   : > { %v1343_v19 = vpop.f32.mrf.mxu3 }
 0x463   : > { %v1344_v57 = vadd.f32 %v6288_v17, %v1343_v19  ;;  %v6465_v19 = vld [vmem:[%s5825_s4 + $0xe8] sm:$0xff] }
 0x464   : > { %1410 = vmatmul.f32.gmra.mxu0 %v6337_v21 }
 0x46a   : > { %v1346_v62 = vpop.f32.mrf.mxu3 }
 0x46c   : > { %1413 = vmatmul.f32.gmra.mxu0 %v6341_v26 }
 0x472   : > { %v1349_v1 = vpop.f32.mrf.mxu3 }
 0x474   : > { %1416 = vmatmul.f32.gmra.mxu0 %v6345_v22 }
 0x47a   : > { %v1352_v28 = vpop.f32.mrf.mxu3 }
 0x47c   : > { %1419 = vmatmul.f32.gmra.mxu0 %v5845_v4 }
 0x482   : > { %v1355_v9 = vpop.f32.mrf.mxu3 }
 0x484   : > { %1422 = vmatmul.f32.gmra.mxu0 %v5850_v6 }
 0x48a   : > { %v1358_v27 = vpop.f32.mrf.mxu3 }
 0x48b   : > { %v1359_v6 = vadd.f32 %v6288_v17, %v1358_v27  ;;  %v6475_v27 = vld [vmem:[%s5825_s4 + $0x108] sm:$0xff] }
 0x48c   : > { %1425 = vmatmul.f32.gmra.mxu0 %v5855_v8  ;;  %v1356_v8 = vadd.f32 %v6288_v17, %v1355_v9 }
 0x492   : > { %v1361_v23 = vpop.f32.mrf.mxu3 }
 0x493   : > { %v1362_v4 = vadd.f32 %v6288_v17, %v1361_v23 }
 0x494   : > { %1428 = vmatmul.f32.gmra.mxu0 %v5860_v10  ;;  %v1353_v10 = vadd.f32 %v6288_v17, %v1352_v28 }
 0x49a   : > { %v1364_v37 = vpop.f32.mrf.mxu3 }
 0x49b   : > { %v1365_v41 = vadd.f32 %v6288_v17, %v1364_v37  ;;  %v6481_v37 = vld [vmem:[%s5825_s4 + $0x118] sm:$0xff] }
 0x49c   : > { %1431 = vmatmul.f32.gmra.mxu0 %v5865_v12  ;;  %v1350_v12 = vadd.f32 %v6288_v17, %v1349_v1  ;;  %v6470_v1 = vld [vmem:[%s5825_s4 + $0xf8] sm:$0xff] }
 0x4a2   : > { %v1367_v32 = vpop.f32.mrf.mxu3 }
 0x4a3   : > { %v1368_v34 = vadd.f32 %v6288_v17, %v1367_v32 }
 0x4a4   : > { %1434 = vmatmul.f32.gmra.mxu0 %v5870_v14  ;;  %v1347_v14 = vadd.f32 %v6288_v17, %v1346_v62 }
 0x4a5   : > { %1495 = vmatpush.msra.mxu1 %v1368_v34 }
 0x4a7   : > { %1496 = vmatpush.msra.mxu1 %v1365_v41  ;;  %v6487_v41 = vld [vmem:[%s5825_s4 + $0x128] sm:$0xff] }
 0x4a9   : > { %1497 = vmatpush.msra.mxu1 %v1362_v4 }
 0x4ab   : > { %1498 = vmatpush.msra.mxu1 %v1359_v6 }
 0x4ac   : > { %1437 = vmatmul.f32.gmra.mxu0 %v5875_v16  ;;  %v1338_v16 = vadd.f32 %v6288_v17, %v1337_v11 }
 0x4ad   : > { %1499 = vmatpush.msra.mxu1 %v1356_v8  ;;  %v6493_v8 = vld [vmem:[%s5825_s4 + $0x138] sm:$0xff] }
 0x4af   : > { %1500 = vmatpush.msra.mxu1 %v1353_v10 }
 0x4b1   : > { %1501 = vmatpush.msra.mxu1 %v1350_v12 }
 0x4b3   : > { %1502 = vmatpush.msra.mxu1 %v1347_v14  ;;  %v6498_v14 = vld [vmem:[%s5825_s4 + $0x148] sm:$0xff] }
 0x4b4   : > { %1440 = vmatmul.f32.gmra.mxu0 %v5880_v18  ;;  %v1329_v18 = vadd.f32 %v6288_v17, %v6310_v45  ;;  %v6396_v17 = vld [vmem:[%s5825_s4 + $0x28] sm:$0xff]  ;;  %v6411_v45 = vld [vmem:[%s5825_s4 + $0x58] sm:$0xff] }
 0x4b5   : > { %1503 = vmatpush.msra.mxu1 %v1344_v57 }
 0x4b7   : > { %1504 = vmatpush.msra.mxu1 %v1341_v25 }
 0x4b9   : > { %1505 = vmatpush.msra.mxu1 %v1338_v16  ;;  %v6503_v16 = vld [vmem:[%s5825_s4 + $0x158] sm:$0xff] }
 0x4bb   : > { %1506 = vmatpush.msra.mxu1 %v1335_v46 }
 0x4bc   : > { %1443 = vmatmul.f32.gmra.mxu0 %v6370_v56 }
 0x4bd   : > { %1507 = vmatpush.msra.mxu1 %v1332_v47 }
 0x4bf   : > { %1508 = vmatpush.msra.mxu1 %v1329_v18 }
 0x4c1   : > { %1509 = vmatpush.msra.mxu1 %v1326_v42  ;;  %v1399_v2 = vpop.f32.mrf.mxu0  ;;  %v6508_v42 = vld [vmem:[%s5825_s4 + $0x168] sm:$0xff] }
 0x4c3   : > { %1510 = vmatpush.msra.mxu1 %v1323_v39 }
 0x4c4   : > { %1511 = vmatmul.f32.vlgmr.msra.gmra.mxu1 %v6380_v60  ;;  %1446 = vmatmul.f32.gmra.mxu0 %v6384_v61 }
 0x4c9   : > { %v1402_v11 = vpop.f32.mrf.mxu0 }
 0x4cc   : > { %1514 = vmatmul.f32.gmra.mxu1 %v6388_v40  ;;  %1449 = vmatmul.f32.gmra.mxu0 %v6392_v58 }
 0x4d1   : > { %v1405_v63 = vpop.f32.mrf.mxu0 }
 0x4d4   : > { %1517 = vmatmul.f32.gmra.mxu1 %v6396_v17  ;;  %1452 = vmatmul.f32.gmra.mxu0 %v5895_v33  ;;  %v6416_v33 = vld [vmem:[%s5825_s4 + $0x68] sm:$0xff] }
 0x4d9   : > { %v1408_v62 = vpop.f32.mrf.mxu0 }
 0x4dc   : > { %1520 = vmatmul.f32.gmra.mxu1 %v6401_v51  ;;  %1455 = vmatmul.f32.gmra.mxu0 %v5902_v38  ;;  %v6421_v38 = vld [vmem:[%s5825_s4 + $0x78] sm:$0xff] }
 0x4e4   : > { %1523 = vmatmul.f32.gmra.mxu1 %v6406_v30  ;;  %1458 = vmatmul.f32.gmra.mxu0 %v5909_v43  ;;  %v6426_v43 = vld [vmem:[%s5825_s4 + $0x88] sm:$0xff] }
 0x4ec   : > { %1526 = vmatmul.f32.gmra.mxu1 %v6411_v45  ;;  %1461 = vmatmul.f32.gmra.mxu0 %v5916_v48  ;;  %v6434_v48 = vld [vmem:[%s5825_s4 + $0xa8] sm:$0xff] }
 0x4f4   : > { %1529 = vmatmul.f32.gmra.mxu1 %v6416_v33  ;;  %1464 = vmatmul.f32.gmra.mxu0 %v5923_v54  ;;  %v6438_v54 = vld [vmem:[%s5825_s4 + $0xb8] sm:$0xff] }
 0x4fc   : > { %1532 = vmatmul.f32.gmra.mxu1 %v6421_v38  ;;  %1467 = vmatmul.f32.gmra.mxu0 %v5930_v59  ;;  %v1373_v59 = vld [vmem:[%s8174_s2 + $0xe0] sm:$0xff] }
 0x4fd   : > { %1717 = vmatpush.msra.mxu2 %v1373_v59 }
 0x4ff   : > { %1718 = vmatpush.msra.mxu2 %v1372_v3 }
 0x501   : > { %1719 = vmatpush.msra.mxu2 %v1371_v49 }
 0x503   : > { %1720 = vmatpush.msra.mxu2 %v1370_v52 }
 0x504   : > { %1535 = vmatmul.f32.gmra.mxu1 %v6426_v43  ;;  %1470 = vmatmul.f32.gmra.mxu0 %v5939_v0  ;;  %v6460_v0 = vld [vmem:[%s5825_s4 + $0xd8] sm:$0xff] }
 0x50c   : > { %1538 = vmatmul.f32.gmra.mxu1 %v6430_v15  ;;  %1473 = vmatmul.f32.gmra.mxu0 %v5951_v7  ;;  %v1411_v7 = vpop.f32.mrf.mxu0 }
 0x514   : > { %1541 = vmatmul.f32.gmra.mxu1 %v6434_v48  ;;  %1476 = vmatmul.f32.gmra.mxu0 %v5969_v20  ;;  %v1414_v20 = vpop.f32.mrf.mxu0 }
 0x51c   : > { %1544 = vmatmul.f32.gmra.mxu1 %v6438_v54  ;;  %1479 = vmatmul.f32.gmra.mxu0 %v5978_v24 }
 0x524   : > { %1547 = vmatmul.f32.gmra.mxu1 %v6455_v35  ;;  %1482 = vmatmul.f32.gmra.mxu0 %v5987_v29  ;;  %v1417_v29 = vpop.f32.mrf.mxu0 }
 0x52c   : > { %1550 = vmatmul.f32.gmra.mxu1 %v6460_v0  ;;  %1485 = vmatmul.f32.gmra.mxu0 %v5994_v36  ;;  %v1420_v36 = vpop.f32.mrf.mxu0 }
 0x534   : > { %1553 = vmatmul.f32.gmra.mxu1 %v6465_v19  ;;  %1488 = vmatmul.f32.gmra.mxu0 %v6000_v44  ;;  %v1423_v44 = vpop.f32.mrf.mxu0 }
 0x53c   : > { %1556 = vmatmul.f32.gmra.mxu1 %v6470_v1  ;;  %1491 = vmatmul.f32.gmra.mxu0 %v6006_v53  ;;  %v1426_v53 = vpop.f32.mrf.mxu0 }
 0x541   : > { %v1512_v28 = vpop.f32.mrf.mxu1 }
 0x542   : > { %v1513_v9 = vadd.f32 %v1512_v28, %v1399_v2  ;;  %v6513_v2 = vld [vmem:[%s5825_s4 + $0x178] sm:$0xff] }
 0x544   : > { %1559 = vmatmul.f32.gmra.mxu1 %v6475_v27  ;;  %5007 = vmatmul.msk.f32.vlgmr.msra.gmra.mxu2 %vm852_vm0, %v1513_v9  ;;  %v1429_v46 = vpop.f32.mrf.mxu0  ;;  %v6523_v9 = vld [vmem:[%s5825_s4 + $0x198] sm:$0xff] }
 0x545   : > { %8186 = vst [vmem:[#allocation3_spill] sm:$0xff] %v6523_v9 }
 0x549   : > { %v1515_v24 = vpop.f32.mrf.mxu1 }
 0x54a   : > { %v1516_v23 = vadd.f32 %v1515_v24, %v1402_v11 }
 0x54c   : > { %1562 = vmatmul.f32.gmra.mxu1 %v6481_v37  ;;  %5008 = vmatmul.msk.f32.gmra.mxu2 %vm852_vm0, %v1516_v23  ;;  %v1432_v39 = vpop.f32.mrf.mxu0 }
 0x551   : > { %v1518_v32 = vpop.f32.mrf.mxu1 }
 0x552   : > { %v1519_v34 = vadd.f32 %v1518_v32, %v1405_v63  ;;  %v6518_v63 = vld [vmem:[%s5825_s4 + $0x188] sm:$0xff] }
 0x553   : > { %v6531_v32 = vld [vmem:[%s5825_s4 + $0x1a8] sm:$0xff] }
 0x554   : > { %1565 = vmatmul.f32.gmra.mxu1 %v6487_v41  ;;  %5009 = vmatmul.msk.f32.gmra.mxu2 %vm852_vm0, %v1519_v34  ;;  %v1435_v49 = vpop.f32.mrf.mxu0  ;;  %8187 = vst [vmem:[#allocation4_spill] sm:$0xff] %v6531_v32 }
 0x559   : > { %v1521_v4 = vpop.f32.mrf.mxu1 }
 0x55a   : > { %v1522_v6 = vadd.f32 %v1521_v4, %v1408_v62 }
 0x55c   : > { %1568 = vmatmul.f32.gmra.mxu1 %v6493_v8  ;;  %5010 = vmatmul.msk.f32.gmra.mxu2 %vm852_vm0, %v1522_v6  ;;  %v1438_v62 = vpop.f32.mrf.mxu0  ;;  %v6536_v6 = vld [vmem:[%s5825_s4 + $0x1b8] sm:$0xff] }
 0x55d   : > { %8188 = vst [vmem:[#allocation5_spill] sm:$0xff] %v6536_v6 }
 0x561   : > { %v1524_v10 = vpop.f32.mrf.mxu1 }
 0x562   : > { %v1525_v12 = vadd.f32 %v1524_v10, %v1411_v7 }
 0x564   : > { %1571 = vmatmul.f32.gmra.mxu1 %v6498_v14  ;;  %5011 = vmatmul.msk.f32.gmra.mxu2 %vm852_vm0, %v1525_v12 }
 0x569   : > { %v1527_v57 = vpop.f32.mrf.mxu1 }
 0x56a   : > { %v1528_v25 = vadd.f32 %v1527_v57, %v1414_v20  ;;  %v1441_v20 = vpop.f32.mrf.mxu0 }
 0x56c   : > { %1574 = vmatmul.f32.gmra.mxu1 %v6503_v16  ;;  %5012 = vmatmul.msk.f32.gmra.mxu2 %vm852_vm0, %v1528_v25 }
 0x571   : > { %v1530_v47 = vpop.f32.mrf.mxu1 }
 0x572   : > { %v1531_v18 = vadd.f32 %v1530_v47, %v1417_v29  ;;  %v1377_v29 = vld [vmem:[%s8174_s2 + $0x100] sm:$0xff]  ;;  %v1444_v34 = vpop.f32.mrf.mxu0  ;;  %v1376_v47 = vld [vmem:[%s8174_s2 + $0xf8] sm:$0xff] }
 0x573   : > { %2025 = vmatpush.msra.mxu3 %v1377_v29 }
 0x574   : > { %1577 = vmatmul.f32.gmra.mxu1 %v6508_v42  ;;  %5013 = vmatmul.msk.f32.gmra.mxu2 %vm852_vm0, %v1531_v18  ;;  %v6549_v18 = vld [vmem:[%s5825_s4 + $0x1d8] sm:$0xff] }
 0x575   : > { %8190 = vst [vmem:[#allocation7_spill] sm:$0xff] %v6549_v18  ;;  %2026 = vmatpush.msra.mxu3 %v1376_v47 }
 0x579   : > { %v1533_v59 = vpop.f32.mrf.mxu1 }
 0x57a   : > { %v1534_v3 = vadd.f32 %v1533_v59, %v1420_v36  ;;  %v1447_v10 = vpop.f32.mrf.mxu0  ;;  %v1374_v59 = vld [vmem:[%s8174_s2 + $0xe8] sm:$0xff] }
 0x57c   : > { %1580 = vmatmul.f32.gmra.mxu1 %v6513_v2  ;;  %5014 = vmatmul.msk.f32.gmra.mxu2 %vm852_vm0, %v1534_v3 }
 0x581   : > { %v1536_v52 = vpop.f32.mrf.mxu1 }
 0x582   : > { %v1537_v11 = vadd.f32 %v1536_v52, %v1423_v44  ;;  %v6560_v52 = vld [vmem:[%s5825_s4 + $0x1e8] sm:$0xff] }
 0x583   : > { %8191 = vst [vmem:[#allocation8_spill] sm:$0xff] %v6560_v52 }
 0x584   : > { %1583 = vmatmul.f32.gmra.mxu1 %v6518_v63  ;;  %5015 = vmatmul.msk.f32.gmra.mxu2 %vm852_vm0, %v1537_v11 }
 0x589   : > { %v1539_v7 = vpop.f32.mrf.mxu1 }
 0x58a   : > { %v1540_v28 = vadd.f32 %v1539_v7, %v1426_v53  ;;  %v6541_v53 = vld [vmem:[%s5825_s4 + $0x1c8] sm:$0xff] }
 0x58b   : > { %8189 = vst [vmem:[#allocation6_spill] sm:$0xff] %v6541_v53 }
 0x58c   : > { %1586 = vmatmul.f32.gmra.mxu1 %v6523_v9  ;;  %5016 = vmatmul.msk.f32.gmra.mxu2 %vm852_vm0, %v1540_v28  ;;  %v6565_v28 = vld [vmem:[%s5825_s4 + $0x1f8] sm:$0xff] }
 0x58d   : > { %8192 = vst [vmem:[#allocation9_spill] sm:$0xff] %v6565_v28 }
 0x591   : > { %v1542_v24 = vpop.f32.mrf.mxu1 }
 0x592   : > { %v1543_v23 = vadd.f32 %v1542_v24, %v1429_v46  ;;  %v1450_v46 = vpop.f32.mrf.mxu0 }
 0x594   : > { %1589 = vmatmul.f32.gmra.mxu1 %v6531_v32  ;;  %5017 = vmatmul.msk.f32.gmra.mxu2 %vm852_vm0, %v1543_v23 }
 0x599   : > { %v1545_v36 = vpop.f32.mrf.mxu1 }
 0x59a   : > { %v1546_v4 = vadd.f32 %v1545_v36, %v1432_v39  ;;  %v1375_v39 = vld [vmem:[%s8174_s2 + $0xf0] sm:$0xff]  ;;  %v1453_v11 = vpop.f32.mrf.mxu0 }
 0x59b   : > { %2027 = vmatpush.msra.mxu3 %v1375_v39 }
 0x59c   : > { %1592 = vmatmul.f32.gmra.mxu1 %v6536_v6  ;;  %5018 = vmatmul.msk.f32.gmra.mxu2 %vm852_vm0, %v1546_v4 }
 0x59d   : > { %2028 = vmatpush.msra.mxu3 %v1374_v59 }
 0x5a1   : > { %v1548_v44 = vpop.f32.mrf.mxu1 }
 0x5a2   : > { %v1549_v12 = vadd.f32 %v1548_v44, %v1435_v49  ;;  %v1456_v24 = vpop.f32.mrf.mxu0 }
 0x5a4   : > { %1595 = vmatmul.f32.gmra.mxu1 %v6541_v53  ;;  %5019 = vmatmul.msk.f32.gmra.mxu2 %vm852_vm0, %v1549_v12 }
 0x5a9   : > { %v1551_v57 = vpop.f32.mrf.mxu1 }
 0x5aa   : > { %v1552_v25 = vadd.f32 %v1551_v57, %v1438_v62  ;;  %v1459_v12 = vpop.f32.mrf.mxu0 }
 0x5ac   : > { %1598 = vmatmul.f32.gmra.mxu1 %v6549_v18  ;;  %5020 = vmatmul.msk.f32.gmra.mxu2 %vm852_vm0, %v1552_v25 }
 0x5b1   : > { %v1554_v3 = vpop.f32.mrf.mxu1 }
 0x5b2   : > { %v1555_v49 = vadd.f32 %v1554_v3, %v1441_v20  ;;  %v6573_v20 = vld [vmem:[%s8174_s2 + $0x108] ss:$0 sm:$0xff] }
 0x5b4   : > { %1601 = vmatmul.f32.gmra.mxu1 %v6560_v52  ;;  %5021 = vmatmul.msk.f32.gmra.mxu2 %vm852_vm0, %v1555_v49 }
 0x5b9   : > { %v1557_v62 = vpop.f32.mrf.mxu1 }
 0x5ba   : > { %v1558_v7 = vadd.f32 %v1557_v62, %v1444_v34  ;;  %v6579_v34 = vld [vmem:[%s8174_s2 + $0x109] ss:$0 sm:$0xff] }
 0x5bc   : > { %1604 = vmatmul.f32.gmra.mxu1 %v6565_v28  ;;  %5022 = vmatmul.msk.f32.gmra.mxu2 %vm852_vm0, %v1558_v7 }
 0x5c1   : > { %v1560_v23 = vpop.f32.mrf.mxu1 }
 0x5c2   : > { %v1561_v29 = vadd.f32 %v1560_v23, %v1447_v10  ;;  %v6584_v10 = vld [vmem:[%s8174_s2 + $0x10a] ss:$0 sm:$0xff]  ;;  %v1462_v23 = vpop.f32.mrf.mxu0 }
 0x5c4   : > { %5023 = vmatmul.msk.f32.gmra.mxu2 %vm852_vm0, %v1561_v29 }
 0x5c7   : > { %v1722_v36 = vpop.f32.mrf.mxu2 }
 0x5c8   : > { %v1723_v4 = vadd.f32 %v6573_v20, %v1722_v36 }
 0x5c9   : > { %v1563_v44 = vpop.f32.mrf.mxu1 }
 0x5ca   : > { %v1818_v57 = vmax.f32 %v1723_v4, 0.0  ;;  %v1564_v25 = vadd.f32 %v1563_v44, %v1450_v46 }
 0x5cc   : > { %v1851_v47 = vmul.f32 %v6579_v34, %v1818_v57  ;;  %5024 = vmatmul.msk.f32.gmra.mxu2 %vm852_vm0, %v1564_v25 }
 0x5ce   : > { %v1884_v39 = vadd.f32 %v6584_v10, %v1851_v47 }
 0x5cf   : > { %v1725_v59 = vpop.f32.mrf.mxu2 }
 0x5d0   : > { %v1726_v3 = vadd.f32 %v6573_v20, %v1725_v59  ;;  %5039 = vmatmul.msk.f32.vlgmr.msra.gmra.mxu3 %vm852_vm0, %v1884_v39 }
 0x5d1   : > { %v1566_v49 = vpop.f32.mrf.mxu1 }
 0x5d2   : > { %v1819_v62 = vmax.f32 %v1726_v3, 0.0  ;;  %v1567_v7 = vadd.f32 %v1566_v49, %v1453_v11  ;;  %v1465_v11 = vpop.f32.mrf.mxu0 }
 0x5d4   : > { %v1852_v29 = vmul.f32 %v6579_v34, %v1819_v62  ;;  %5025 = vmatmul.msk.f32.gmra.mxu2 %vm852_vm0, %v1567_v7 }
 0x5d6   : > { %v1885_v46 = vadd.f32 %v6584_v10, %v1852_v29 }
 0x5d7   : > { %v1728_v36 = vpop.f32.mrf.mxu2 }
 0x5d8   : > { %v1729_v4 = vadd.f32 %v6573_v20, %v1728_v36  ;;  %5040 = vmatmul.msk.f32.gmra.mxu3 %vm852_vm0, %v1885_v46 }
 0x5d9   : > { %v1569_v44 = vpop.f32.mrf.mxu1 }
 0x5da   : > { %v1820_v57 = vmax.f32 %v1729_v4, 0.0  ;;  %v1570_v25 = vadd.f32 %v1569_v44, %v1456_v24  ;;  %v1468_v36 = vpop.f32.mrf.mxu0 }
 0x5dc   : > { %v1853_v47 = vmul.f32 %v6579_v34, %v1820_v57  ;;  %5026 = vmatmul.msk.f32.gmra.mxu2 %vm852_vm0, %v1570_v25 }
 0x5de   : > { %v1886_v39 = vadd.f32 %v6584_v10, %v1853_v47 }
 0x5df   : > { %v1731_v59 = vpop.f32.mrf.mxu2 }
 0x5e0   : > { %v1732_v3 = vadd.f32 %v6573_v20, %v1731_v59  ;;  %5041 = vmatmul.msk.f32.gmra.mxu3 %vm852_vm0, %v1886_v39 }
 0x5e1   : > { %v1572_v49 = vpop.f32.mrf.mxu1 }
 0x5e2   : > { %v1821_v62 = vmax.f32 %v1732_v3, 0.0  ;;  %v1573_v7 = vadd.f32 %v1572_v49, %v1459_v12  ;;  %v1471_v49 = vpop.f32.mrf.mxu0 }
 0x5e4   : > { %v1854_v29 = vmul.f32 %v6579_v34, %v1821_v62  ;;  %5027 = vmatmul.msk.f32.gmra.mxu2 %vm852_vm0, %v1573_v7 }
 0x5e6   : > { %v1887_v24 = vadd.f32 %v6584_v10, %v1854_v29 }
 0x5e7   : > { %v1734_v46 = vpop.f32.mrf.mxu2 }
 0x5e8   : > { %v1735_v4 = vadd.f32 %v6573_v20, %v1734_v46  ;;  %5042 = vmatmul.msk.f32.gmra.mxu3 %vm852_vm0, %v1887_v24 }
 0x5e9   : > { %v1575_v44 = vpop.f32.mrf.mxu1 }
 0x5ea   : > { %v1822_v57 = vmax.f32 %v1735_v4, 0.0  ;;  %v1576_v25 = vadd.f32 %v1575_v44, %v1462_v23 }
 0x5ec   : > { %v1855_v47 = vmul.f32 %v6579_v34, %v1822_v57  ;;  %5028 = vmatmul.msk.f32.gmra.mxu2 %vm852_vm0, %v1576_v25  ;;  %v1474_v25 = vpop.f32.mrf.mxu0 }
 0x5ee   : > { %v1888_v12 = vadd.f32 %v6584_v10, %v1855_v47 }
 0x5ef   : > { %v1737_v39 = vpop.f32.mrf.mxu2 }
 0x5f0   : > { %v1738_v59 = vadd.f32 %v6573_v20, %v1737_v39  ;;  %5043 = vmatmul.msk.f32.gmra.mxu3 %vm852_vm0, %v1888_v12 }
 0x5f1   : > { %v1578_v3 = vpop.f32.mrf.mxu1 }
 0x5f2   : > { %v1823_v62 = vmax.f32 %v1738_v59, 0.0  ;;  %v1579_v7 = vadd.f32 %v1578_v3, %v1465_v11 }
 0x5f4   : > { %v1856_v29 = vmul.f32 %v6579_v34, %v1823_v62  ;;  %5029 = vmatmul.msk.f32.gmra.mxu2 %vm852_vm0, %v1579_v7 }
 0x5f6   : > { %v1889_v23 = vadd.f32 %v6584_v10, %v1856_v29 }
 0x5f7   : > { %v1740_v24 = vpop.f32.mrf.mxu2 }
 0x5f8   : > { %v1741_v46 = vadd.f32 %v6573_v20, %v1740_v24  ;;  %5044 = vmatmul.msk.f32.gmra.mxu3 %vm852_vm0, %v1889_v23 }
 0x5f9   : > { %v1581_v4 = vpop.f32.mrf.mxu1 }
 0x5fa   : > { %v1824_v44 = vmax.f32 %v1741_v46, 0.0  ;;  %v1582_v57 = vadd.f32 %v1581_v4, %v1468_v36  ;;  %v1477_v36 = vpop.f32.mrf.mxu0 }
 0x5fc   : > { %v1857_v47 = vmul.f32 %v6579_v34, %v1824_v44  ;;  %5030 = vmatmul.msk.f32.gmra.mxu2 %vm852_vm0, %v1582_v57 }
 0x5fe   : > { %v1890_v11 = vadd.f32 %v6584_v10, %v1857_v47 }
 0x5ff   : > { %v1743_v12 = vpop.f32.mrf.mxu2 }
 0x600   : > { %v1744_v39 = vadd.f32 %v6573_v20, %v1743_v12  ;;  %5045 = vmatmul.msk.f32.gmra.mxu3 %vm852_vm0, %v1890_v11 }
 0x601   : > { %v1584_v59 = vpop.f32.mrf.mxu1 }
 0x602   : > { %v1825_v3 = vmax.f32 %v1744_v39, 0.0  ;;  %v1585_v62 = vadd.f32 %v1584_v59, %v1471_v49  ;;  %v1480_v11 = vpop.f32.mrf.mxu0 }
 0x604   : > { %v1858_v7 = vmul.f32 %v6579_v34, %v1825_v3  ;;  %5031 = vmatmul.msk.f32.gmra.mxu2 %vm852_vm0, %v1585_v62 }
 0x606   : > { %v1891_v29 = vadd.f32 %v6584_v10, %v1858_v7 }
 0x607   : > { %v1746_v23 = vpop.f32.mrf.mxu2 }
 0x608   : > { %v1747_v24 = vadd.f32 %v6573_v20, %v1746_v23  ;;  %5046 = vmatmul.msk.f32.gmra.mxu3 %vm852_vm0, %v1891_v29 }
 0x609   : > { %v1587_v46 = vpop.f32.mrf.mxu1 }
 0x60a   : > { %v1826_v4 = vmax.f32 %v1747_v24, 0.0  ;;  %v1588_v44 = vadd.f32 %v1587_v46, %v1474_v25  ;;  %v1483_v24 = vpop.f32.mrf.mxu0 }
 0x60c   : > { %v1859_v57 = vmul.f32 %v6579_v34, %v1826_v4  ;;  %5032 = vmatmul.msk.f32.gmra.mxu2 %vm852_vm0, %v1588_v44 }
 0x60e   : > { %v1892_v49 = vadd.f32 %v6584_v10, %v1859_v57 }
 0x60f   : > { %v1749_v47 = vpop.f32.mrf.mxu2 }
 0x610   : > { %v1750_v12 = vadd.f32 %v6573_v20, %v1749_v47  ;;  %5047 = vmatmul.msk.f32.gmra.mxu3 %vm852_vm0, %v1892_v49 }
 0x611   : > { %v1590_v39 = vpop.f32.mrf.mxu1 }
 0x612   : > { %v1827_v59 = vmax.f32 %v1750_v12, 0.0  ;;  %v1591_v3 = vadd.f32 %v1590_v39, %v1477_v36 }
 0x614   : > { %v1860_v62 = vmul.f32 %v6579_v34, %v1827_v59  ;;  %5033 = vmatmul.msk.f32.gmra.mxu2 %vm852_vm0, %v1591_v3  ;;  %v1486_v59 = vpop.f32.mrf.mxu0 }
 0x616   : > { %v1893_v25 = vadd.f32 %v6584_v10, %v1860_v62 }
 0x617   : > { %v1752_v7 = vpop.f32.mrf.mxu2 }
 0x618   : > { %v1753_v29 = vadd.f32 %v6573_v20, %v1752_v7  ;;  %5048 = vmatmul.msk.f32.gmra.mxu3 %vm852_vm0, %v1893_v25 }
 0x619   : > { %v1593_v23 = vpop.f32.mrf.mxu1 }
 0x61a   : > { %v1828_v46 = vmax.f32 %v1753_v29, 0.0  ;;  %v1594_v4 = vadd.f32 %v1593_v23, %v1480_v11 }
 0x61c   : > { %v1861_v44 = vmul.f32 %v6579_v34, %v1828_v46  ;;  %5034 = vmatmul.msk.f32.gmra.mxu2 %vm852_vm0, %v1594_v4 }
 0x61e   : > { %v1894_v36 = vadd.f32 %v6584_v10, %v1861_v44 }
 0x61f   : > { %v1755_v57 = vpop.f32.mrf.mxu2 }
 0x620   : > { %v1756_v49 = vadd.f32 %v6573_v20, %v1755_v57  ;;  %5049 = vmatmul.msk.f32.gmra.mxu3 %vm852_vm0, %v1894_v36 }
 0x621   : > { %v1596_v47 = vpop.f32.mrf.mxu1 }
 0x622   : > { %v1829_v12 = vmax.f32 %v1756_v49, 0.0  ;;  %v1597_v39 = vadd.f32 %v1596_v47, %v1483_v24  ;;  %v1489_v24 = vpop.f32.mrf.mxu0 }
 0x624   : > { %v1862_v3 = vmul.f32 %v6579_v34, %v1829_v12  ;;  %5035 = vmatmul.msk.f32.gmra.mxu2 %vm852_vm0, %v1597_v39 }
 0x626   : > { %v1895_v11 = vadd.f32 %v6584_v10, %v1862_v3 }
 0x627   : > { %v1758_v62 = vpop.f32.mrf.mxu2 }
 0x628   : > { %v1759_v25 = vadd.f32 %v6573_v20, %v1758_v62  ;;  %5050 = vmatmul.msk.f32.gmra.mxu3 %vm852_vm0, %v1895_v11 }
 0x629   : > { %v1599_v7 = vpop.f32.mrf.mxu1 }
 0x62a   : > { %v1830_v29 = vmax.f32 %v1759_v25, 0.0  ;;  %v1600_v23 = vadd.f32 %v1599_v7, %v1486_v59  ;;  %v1492_v3 = vpop.f32.mrf.mxu0 }
 0x62c   : > { %v1863_v46 = vmul.f32 %v6579_v34, %v1830_v29  ;;  %5036 = vmatmul.msk.f32.gmra.mxu2 %vm852_vm0, %v1600_v23 }
 0x62e   : > { %v1896_v4 = vadd.f32 %v6584_v10, %v1863_v46 }
 0x62f   : > { %v1761_v44 = vpop.f32.mrf.mxu2 }
 0x630   : > { %v1762_v36 = vadd.f32 %v6573_v20, %v1761_v44  ;;  %5051 = vmatmul.msk.f32.gmra.mxu3 %vm852_vm0, %v1896_v4 }
 0x631   : > { %v1602_v57 = vpop.f32.mrf.mxu1 }
 0x632   : > { %v1831_v49 = vmax.f32 %v1762_v36, 0.0  ;;  %v1603_v47 = vadd.f32 %v1602_v57, %v1489_v24 }
 0x634   : > { %v1864_v12 = vmul.f32 %v6579_v34, %v1831_v49  ;;  %5037 = vmatmul.msk.f32.gmra.mxu2 %vm852_vm0, %v1603_v47 }
 0x636   : > { %v1897_v39 = vadd.f32 %v6584_v10, %v1864_v12 }
 0x637   : > { %v1764_v59 = vpop.f32.mrf.mxu2 }
 0x638   : > { %v1765_v11 = vadd.f32 %v6573_v20, %v1764_v59  ;;  %5052 = vmatmul.msk.f32.gmra.mxu3 %vm852_vm0, %v1897_v39 }
 0x639   : > { %v1605_v62 = vpop.f32.mrf.mxu1 }
 0x63a   : > { %v1832_v25 = vmax.f32 %v1765_v11, 0.0  ;;  %v1606_v7 = vadd.f32 %v1605_v62, %v1492_v3 }
 0x63c   : > { %v1865_v29 = vmul.f32 %v6579_v34, %v1832_v25  ;;  %5038 = vmatmul.msk.f32.gmra.mxu2 %vm852_vm0, %v1606_v7 }
 0x63e   : > { %v1898_v23 = vadd.f32 %v6584_v10, %v1865_v29 }
 0x63f   : > { %v1767_v46 = vpop.f32.mrf.mxu2 }
 0x640   : > { %v1768_v24 = vadd.f32 %v6573_v20, %v1767_v46  ;;  %5053 = vmatmul.msk.f32.gmra.mxu3 %vm852_vm0, %v1898_v23 }
 0x642   : > { %v1833_v4 = vmax.f32 %v1768_v24, 0.0 }
 0x644   : > { %v1866_v44 = vmul.f32 %v6579_v34, %v1833_v4 }
 0x646   : > { %v1899_v36 = vadd.f32 %v6584_v10, %v1866_v44 }
 0x647   : > { %v1770_v57 = vpop.f32.mrf.mxu2 }
 0x648   : > { %v1771_v49 = vadd.f32 %v6573_v20, %v1770_v57  ;;  %5054 = vmatmul.msk.f32.gmra.mxu3 %vm852_vm0, %v1899_v36 }
 0x64a   : > { %v1834_v47 = vmax.f32 %v1771_v49, 0.0 }
 0x64c   : > { %v1867_v12 = vmul.f32 %v6579_v34, %v1834_v47 }
 0x64e   : > { %v1900_v39 = vadd.f32 %v6584_v10, %v1867_v12 }
 0x64f   : > { %v1773_v59 = vpop.f32.mrf.mxu2 }
 0x650   : > { %v1774_v3 = vadd.f32 %v6573_v20, %v1773_v59  ;;  %5055 = vmatmul.msk.f32.gmra.mxu3 %vm852_vm0, %v1900_v39 }
 0x652   : > { %v1835_v11 = vmax.f32 %v1774_v3, 0.0 }
 0x653   : > { %v6669_v62 = vpop.f32.mrf.mxu3 }
 0x654   : > { %v1868_v25 = vmul.f32 %v6579_v34, %v1835_v11 }
 0x656   : > { %v1901_v7 = vadd.f32 %v6584_v10, %v1868_v25 }
 0x657   : > { %v1776_v29 = vpop.f32.mrf.mxu2 }
 0x658   : > { %v1777_v23 = vadd.f32 %v6573_v20, %v1776_v29  ;;  %5056 = vmatmul.msk.f32.gmra.mxu3 %vm852_vm0, %v1901_v7 }
 0x65a   : > { %v1836_v46 = vmax.f32 %v1777_v23, 0.0 }
 0x65b   : > { %v6675_v24 = vpop.f32.mrf.mxu3 }
 0x65c   : > { %v1869_v4 = vmul.f32 %v6579_v34, %v1836_v46 }
 0x65e   : > { %v1902_v44 = vadd.f32 %v6584_v10, %v1869_v4 }
 0x65f   : > { %v1779_v36 = vpop.f32.mrf.mxu2 }
 0x660   : > { %v1780_v57 = vadd.f32 %v6573_v20, %v1779_v36  ;;  %5057 = vmatmul.msk.f32.gmra.mxu3 %vm852_vm0, %v1902_v44 }
 0x662   : > { %v1837_v49 = vmax.f32 %v1780_v57, 0.0 }
 0x663   : > { %v6681_v47 = vpop.f32.mrf.mxu3 }
 0x664   : > { %v1870_v12 = vmul.f32 %v6579_v34, %v1837_v49 }
 0x666   : > { %v1903_v39 = vadd.f32 %v6584_v10, %v1870_v12 }
 0x667   : > { %v1782_v59 = vpop.f32.mrf.mxu2 }
 0x668   : > { %v1783_v3 = vadd.f32 %v6573_v20, %v1782_v59  ;;  %5058 = vmatmul.msk.f32.gmra.mxu3 %vm852_vm0, %v1903_v39 }
 0x66a   : > { %v1838_v11 = vmax.f32 %v1783_v3, 0.0 }
 0x66b   : > { %v6687_v25 = vpop.f32.mrf.mxu3 }
 0x66c   : > { %v1871_v7 = vmul.f32 %v6579_v34, %v1838_v11 }
 0x66e   : > { %v1904_v29 = vadd.f32 %v6584_v10, %v1871_v7 }
 0x66f   : > { %v1785_v23 = vpop.f32.mrf.mxu2 }
 0x670   : > { %v1786_v46 = vadd.f32 %v6573_v20, %v1785_v23  ;;  %5059 = vmatmul.msk.f32.gmra.mxu3 %vm852_vm0, %v1904_v29 }
 0x672   : > { %v1839_v4 = vmax.f32 %v1786_v46, 0.0 }
 0x673   : > { %v6693_v44 = vpop.f32.mrf.mxu3 }
 0x674   : > { %v1872_v36 = vmul.f32 %v6579_v34, %v1839_v4 }
 0x676   : > { %v1905_v57 = vadd.f32 %v6584_v10, %v1872_v36 }
 0x677   : > { %v1788_v49 = vpop.f32.mrf.mxu2 }
 0x678   : > { %v1789_v12 = vadd.f32 %v6573_v20, %v1788_v49  ;;  %5060 = vmatmul.msk.f32.gmra.mxu3 %vm852_vm0, %v1905_v57 }
 0x67a   : > { %v1840_v39 = vmax.f32 %v1789_v12, 0.0 }
 0x67b   : > { %v6699_v59 = vpop.f32.mrf.mxu3 }
 0x67c   : > { %v1873_v3 = vmul.f32 %v6579_v34, %v1840_v39 }
 0x67e   : > { %v1906_v11 = vadd.f32 %v6584_v10, %v1873_v3 }
 0x67f   : > { %v1791_v7 = vpop.f32.mrf.mxu2 }
 0x680   : > { %v1792_v29 = vadd.f32 %v6573_v20, %v1791_v7  ;;  %5061 = vmatmul.msk.f32.gmra.mxu3 %vm852_vm0, %v1906_v11 }
 0x682   : > { %v1841_v23 = vmax.f32 %v1792_v29, 0.0 }
 0x683   : > { %v6705_v46 = vpop.f32.mrf.mxu3 }
 0x684   : > { %v1874_v4 = vmul.f32 %v6579_v34, %v1841_v23 }
 0x686   : > { %v1907_v36 = vadd.f32 %v6584_v10, %v1874_v4 }
 0x687   : > { %v1794_v57 = vpop.f32.mrf.mxu2 }
 0x688   : > { %v1795_v49 = vadd.f32 %v6573_v20, %v1794_v57  ;;  %5062 = vmatmul.msk.f32.gmra.mxu3 %vm852_vm0, %v1907_v36 }
 0x68a   : > { %v1842_v12 = vmax.f32 %v1795_v49, 0.0 }
 0x68b   : > { %v6711_v39 = vpop.f32.mrf.mxu3 }
 0x68c   : > { %v1875_v3 = vmul.f32 %v6579_v34, %v1842_v12 }
 0x68e   : > { %v1908_v7 = vadd.f32 %v6584_v10, %v1875_v3 }
 0x68f   : > { %v1797_v11 = vpop.f32.mrf.mxu2 }
 0x690   : > { %v1798_v29 = vadd.f32 %v6573_v20, %v1797_v11  ;;  %5063 = vmatmul.msk.f32.gmra.mxu3 %vm852_vm0, %v1908_v7 }
 0x692   : > { %v1843_v23 = vmax.f32 %v1798_v29, 0.0 }
 0x693   : > { %v2054_v50 = vpop.f32.mrf.mxu3 }
 0x694   : > { %v1876_v4 = vmul.f32 %v6579_v34, %v1843_v23 }
 0x696   : > { %v1909_v57 = vadd.f32 %v6584_v10, %v1876_v4 }
 0x697   : > { %v1800_v28 = vpop.f32.mrf.mxu2 }
 0x698   : > { %v1801_v36 = vadd.f32 %v6573_v20, %v1800_v28  ;;  %5064 = vmatmul.msk.f32.gmra.mxu3 %vm852_vm0, %v1909_v57 }
 0x69a   : > { %v1844_v49 = vmax.f32 %v1801_v36, 0.0 }
 0x69b   : > { %v2057_v12 = vpop.f32.mrf.mxu3 }
 0x69c   : > { %v1877_v3 = vmul.f32 %v6579_v34, %v1844_v49 }
 0x69e   : > { %v1910_v52 = vadd.f32 %v6584_v10, %v1877_v3 }
 0x69f   : > { %v1803_v11 = vpop.f32.mrf.mxu2 }
 0x6a0   : > { %v1804_v7 = vadd.f32 %v6573_v20, %v1803_v11  ;;  %5065 = vmatmul.msk.f32.gmra.mxu3 %vm852_vm0, %v1910_v52 }
 0x6a2   : > { %v1845_v29 = vmax.f32 %v1804_v7, 0.0 }
 0x6a3   : > { %v2060_v23 = vpop.f32.mrf.mxu3 }
 0x6a4   : > { %v1878_v4 = vmul.f32 %v6579_v34, %v1845_v29 }
 0x6a6   : > { %v1911_v18 = vadd.f32 %v6584_v10, %v1878_v4 }
 0x6a7   : > { %v1806_v28 = vpop.f32.mrf.mxu2 }
 0x6a8   : > { %v1807_v57 = vadd.f32 %v6573_v20, %v1806_v28  ;;  %5066 = vmatmul.msk.f32.gmra.mxu3 %vm852_vm0, %v1911_v18 }
 0x6aa   : > { %v1846_v36 = vmax.f32 %v1807_v57, 0.0 }
 0x6ab   : > { %v2063_v49 = vpop.f32.mrf.mxu3 }
 0x6ac   : > { %v1879_v3 = vmul.f32 %v6579_v34, %v1846_v36 }
 0x6ae   : > { %v1912_v53 = vadd.f32 %v6584_v10, %v1879_v3 }
 0x6af   : > { %v1809_v11 = vpop.f32.mrf.mxu2 }
 0x6b0   : > { %v1810_v52 = vadd.f32 %v6573_v20, %v1809_v11  ;;  %5067 = vmatmul.msk.f32.gmra.mxu3 %vm852_vm0, %v1912_v53 }
 0x6b2   : > { %v1847_v7 = vmax.f32 %v1810_v52, 0.0 }
 0x6b3   : > { %v2066_v29 = vpop.f32.mrf.mxu3 }
 0x6b4   : > { %v1880_v4 = vmul.f32 %v6579_v34, %v1847_v7 }
 0x6b6   : > { %v1913_v6 = vadd.f32 %v6584_v10, %v1880_v4 }
 0x6b7   : > { %v1812_v28 = vpop.f32.mrf.mxu2 }
 0x6b8   : > { %v1813_v18 = vadd.f32 %v6573_v20, %v1812_v28  ;;  %5068 = vmatmul.msk.f32.gmra.mxu3 %vm852_vm0, %v1913_v6  ;;  %v6747_v6 = vld [vmem:[%s8174_s2 + $0x10b] ss:$0 sm:$0xff] }
 0x6ba   : > { %v1848_v57 = vmax.f32 %v1813_v18, 0.0 }
 0x6bb   : > { %v2069_v36 = vpop.f32.mrf.mxu3 }
 0x6bc   : > { %v1881_v3 = vmul.f32 %v6579_v34, %v1848_v57  ;;  %v2061_v57 = vadd.f32 %v6747_v6, %v2060_v23  ;;  %v2046_v23 = vadd.f32 %v6747_v6, %v6699_v59  ;;  %v2031_v59 = vadd.f32 %v6747_v6, %v6669_v62 }
 0x6be   : > { %v1914_v32 = vadd.f32 %v6584_v10, %v1881_v3  ;;  %v2058_v3 = vadd.f32 %v6747_v6, %v2057_v12  ;;  %v2043_v12 = vadd.f32 %v6747_v6, %v6693_v44 }
 0x6bf   : > { %v1815_v11 = vpop.f32.mrf.mxu2 }
 0x6c0   : > { %v1816_v53 = vadd.f32 %v6573_v20, %v1815_v11  ;;  %5069 = vmatmul.msk.f32.gmra.mxu3 %vm852_vm0, %v1914_v32  ;;  %v2070_v32 = vadd.f32 %v6747_v6, %v2069_v36  ;;  %v2055_v11 = vadd.f32 %v6747_v6, %v2054_v50  ;;  %v2049_v36 = vadd.f32 %v6747_v6, %v6705_v46 }
 0x6c1   : > { %v2034_v46 = vadd.f32 %v6747_v6, %v6675_v24 }
 0x6c2   : > { %v1849_v52 = vmax.f32 %v1816_v53, 0.0 }
 0x6c3   : > { %v2072_v7 = vpop.f32.mrf.mxu3 }
 0x6c4   : > { %v1882_v4 = vmul.f32 %v6579_v34, %v1849_v52  ;;  %v2073_v20 = vadd.f32 %v6747_v6, %v2072_v7  ;;  %v2067_v34 = vadd.f32 %v6747_v6, %v2066_v29  ;;  %v2052_v29 = vadd.f32 %v6747_v6, %v6711_v39 }
 0x6c5   : > { %v2037_v39 = vadd.f32 %v6747_v6, %v6681_v47 }
 0x6c6   : > { %v1915_v9 = vadd.f32 %v6584_v10, %v1882_v4  ;;  %v5588_v4 = vld [vmem:[%s5825_s4 + $0x80] sm:$0xff] }
 0x6c8   : > { %5070 = vmatmul.msk.f32.gmra.mxu3 %vm852_vm0, %v1915_v9  ;;  %v2064_v9 = vadd.f32 %v6747_v6, %v2063_v49  ;;  %v2040_v49 = vadd.f32 %v6747_v6, %v6687_v25 }
 0x6cb   : > { %v2075_v28 = vpop.f32.mrf.mxu3 }
 0x6cc   : > { %v2076_v18 = vadd.f32 %v6747_v6, %v2075_v28 }
 0x6ce   : > { %2138 = vmatpush.msra.mxu0 %v2076_v18 }
 0x6d0   : > { %2139 = vmatpush.msra.mxu0 %v2073_v20  ;;  %v5590_v20 = vld [vmem:[%s5825_s4 + $0xa0] sm:$0xff] }
 0x6d2   : > { %2140 = vmatpush.msra.mxu0 %v2070_v32 }
 0x6d3   : > { %v6753_v10 = vpop.f32.mrf.mxu3 }
 0x6d4   : > { %2141 = vmatpush.msra.mxu0 %v2067_v34  ;;  %v5592_v34 = vld [vmem:[%s5825_s4 + $0xc0] sm:$0xff] }
 0x6d6   : > { %2142 = vmatpush.msra.mxu0 %v2064_v9 }
 0x6d8   : > { %2143 = vmatpush.msra.mxu0 %v2061_v57 }
 0x6da   : > { %2144 = vmatpush.msra.mxu0 %v2058_v3 }
 0x6db   : > { %v6759_v53 = vpop.f32.mrf.mxu3 }
 0x6dc   : > { %2145 = vmatpush.msra.mxu0 %v2055_v11 }
 0x6de   : > { %2146 = vmatpush.msra.mxu0 %v2052_v29  ;;  %v5593_v29 = vld [vmem:[%s5825_s4 + $0xd0] sm:$0xff] }
 0x6e0   : > { %2147 = vmatpush.msra.mxu0 %v2049_v36 }
 0x6e2   : > { %2148 = vmatpush.msra.mxu0 %v2046_v23 }
 0x6e3   : > { %v6769_v50 = vpop.f32.mrf.mxu3 }
 0x6e4   : > { %2149 = vmatpush.msra.mxu0 %v2043_v12 }
 0x6e6   : > { %2150 = vmatpush.msra.mxu0 %v2040_v49 }
 0x6e8   : > { %2151 = vmatpush.msra.mxu0 %v2037_v39  ;;  %v2129_v39 = vld [vmem:[%s8174_s2 + $0x128] sm:$0xff] }
 0x6e9   : > { %2473 = vmatpush.msrb.mxu2 %v2129_v39  ;;  %v8193_v39 = vld [vmem:[#allocation3_spill] sm:$0xff] }
 0x6ea   : > { %2152 = vmatpush.msra.mxu0 %v2034_v46  ;;  %v5594_v46 = vld [vmem:[%s5825_s4 + $0xe0] sm:$0xff] }
 0x6eb   : > { %v2087_v44 = vpop.f32.mrf.mxu3 }
 0x6ec   : > { %2153 = vmatpush.msra.mxu0 %v2031_v59 }
 0x6ed   : > { %2154 = vmatmul.f32.vlgmr.msra.gmra.mxu0 %v6321_v55 }
 0x6f3   : > { %v2090_v52 = vpop.f32.mrf.mxu3 }
 0x6f5   : > { %2157 = vmatmul.f32.gmra.mxu0 %v6325_v31  ;;  %v5587_v31 = vld [vmem:[%s5825_s4 + $0x70] sm:$0xff] }
 0x6fb   : > { %v2093_v25 = vpop.f32.mrf.mxu3 }
 0x6fd   : > { %2160 = vmatmul.f32.gmra.mxu0 %v6329_v13 }
 0x703   : > { %v2096_v47 = vpop.f32.mrf.mxu3 }
 0x704   : > { %v2097_v59 = vadd.f32 %v6747_v6, %v2096_v47  ;;  %v2082_v47 = vadd.f32 %v6747_v6, %v6759_v53 }
 0x705   : > { %2163 = vmatmul.f32.gmra.mxu0 %v6333_v5  ;;  %v5589_v5 = vld [vmem:[%s5825_s4 + $0x90] sm:$0xff] }
 0x70b   : > { %v2099_v24 = vpop.f32.mrf.mxu3 }
 0x70c   : > { %v2100_v49 = vadd.f32 %v6747_v6, %v2099_v24  ;;  %v2088_v24 = vadd.f32 %v6747_v6, %v2087_v44 }
 0x70d   : > { %2166 = vmatmul.f32.gmra.mxu0 %v6337_v21 }
 0x713   : > { %v2102_v62 = vpop.f32.mrf.mxu3 }
 0x714   : > { %v2103_v12 = vadd.f32 %v6747_v6, %v2102_v62  ;;  %v2085_v62 = vadd.f32 %v6747_v6, %v6769_v50  ;;  %v5605_v50 = vld [vmem:[%s5825_s4 + $0x1c0] sm:$0xff] }
 0x715   : > { %2169 = vmatmul.f32.gmra.mxu0 %v6341_v26  ;;  %v5591_v26 = vld [vmem:[%s5825_s4 + $0xb0] sm:$0xff] }
 0x71b   : > { %v2105_v55 = vpop.f32.mrf.mxu3 }
 0x71c   : > { %v2106_v23 = vadd.f32 %v6747_v6, %v2105_v55  ;;  %v2091_v55 = vadd.f32 %v6747_v6, %v2090_v52  ;;  %v2079_v52 = vadd.f32 %v6747_v6, %v6753_v10  ;;  %v5597_v10 = vld [vmem:[%s5825_s4 + $0x140] sm:$0xff] }
 0x71d   : > { %2172 = vmatmul.f32.gmra.mxu0 %v6345_v22 }
 0x723   : > { %v2108_v7 = vpop.f32.mrf.mxu3 }
 0x724   : > { %v2109_v36 = vadd.f32 %v6747_v6, %v2108_v7  ;;  %v2094_v7 = vadd.f32 %v6747_v6, %v2093_v25  ;;  %v5606_v25 = vld [vmem:[%s5825_s4 + $0x1d0] sm:$0xff] }
 0x725   : > { %2175 = vmatmul.f32.gmra.mxu0 %v5587_v31 }
 0x72b   : > { %v2111_v13 = vpop.f32.mrf.mxu3 }
 0x72c   : > { %v2112_v11 = vadd.f32 %v6747_v6, %v2111_v13 }
 0x72d   : > { %2178 = vmatmul.f32.gmra.mxu0 %v5588_v4  ;;  %v5607_v4 = vld [vmem:[%s5825_s4 + $0x1e0] sm:$0xff] }
 0x733   : > { %v2114_v28 = vpop.f32.mrf.mxu3 }
 0x734   : > { %v2115_v3 = vadd.f32 %v6747_v6, %v2114_v28 }
 0x735   : > { %2181 = vmatmul.f32.gmra.mxu0 %v5589_v5 }
 0x73b   : > { %v2117_v18 = vpop.f32.mrf.mxu3 }
 0x73c   : > { %v2118_v57 = vadd.f32 %v6747_v6, %v2117_v18  ;;  %v5608_v18 = vld [vmem:[%s5825_s4 + $0x1f0] sm:$0xff] }
 0x73d   : > { %2184 = vmatmul.f32.gmra.mxu0 %v5590_v20 }
 0x743   : > { %v2120_v21 = vpop.f32.mrf.mxu3 }
 0x744   : > { %v2121_v9 = vadd.f32 %v6747_v6, %v2120_v21 }
 0x745   : > { %2187 = vmatmul.f32.gmra.mxu0 %v5591_v26 }
 0x74b   : > { %v2123_v32 = vpop.f32.mrf.mxu3 }
 0x74c   : > { %v2124_v22 = vadd.f32 %v6747_v6, %v2123_v32  ;;  %v5596_v6 = vld [vmem:[%s5825_s4 + $0x130] sm:$0xff] }
 0x74d   : > { %2190 = vmatmul.f32.gmra.mxu0 %v5592_v34 }
 0x74e   : > { %2251 = vmatpush.msrb.mxu1 %v2124_v22 }
 0x750   : > { %2252 = vmatpush.msrb.mxu1 %v2121_v9 }
 0x752   : > { %2253 = vmatpush.msrb.mxu1 %v2118_v57 }
 0x754   : > { %2254 = vmatpush.msrb.mxu1 %v2115_v3 }
 0x755   : > { %2193 = vmatmul.f32.gmra.mxu0 %v5593_v29 }
 0x756   : > { %2255 = vmatpush.msrb.mxu1 %v2112_v11 }
 0x758   : > { %2256 = vmatpush.msrb.mxu1 %v2109_v36 }
 0x75a   : > { %2257 = vmatpush.msrb.mxu1 %v2106_v23 }
 0x75c   : > { %2258 = vmatpush.msrb.mxu1 %v2103_v12 }
 0x75d   : > { %2196 = vmatmul.f32.gmra.mxu0 %v5594_v46 }
 0x75e   : > { %2259 = vmatpush.msrb.mxu1 %v2100_v49 }
 0x760   : > { %2260 = vmatpush.msrb.mxu1 %v2097_v59 }
 0x762   : > { %2261 = vmatpush.msrb.mxu1 %v2094_v7  ;;  %v8194_v7 = vld [vmem:[#allocation4_spill] sm:$0xff] }
 0x764   : > { %2262 = vmatpush.msrb.mxu1 %v2091_v55 }
 0x765   : > { %2199 = vmatmul.f32.gmra.mxu0 %v6370_v56  ;;  %v5595_v56 = vld [vmem:[%s5825_s4 + $0x120] sm:$0xff] }
 0x766   : > { %2263 = vmatpush.msrb.mxu1 %v2088_v24 }
 0x768   : > { %2264 = vmatpush.msrb.mxu1 %v2085_v62 }
 0x76a   : > { %2265 = vmatpush.msrb.mxu1 %v2082_v47 }
 0x76c   : > { %2266 = vmatpush.msrb.mxu1 %v2079_v52 }
 0x76d   : > { %2267 = vmatmul.f32.vlgmr.msrb.gmra.mxu1 %v6380_v60  ;;  %2202 = vmatmul.f32.gmra.mxu0 %v6384_v61  ;;  %v5598_v60 = vld [vmem:[%s5825_s4 + $0x150] sm:$0xff]  ;;  %v2128_v61 = vld [vmem:[%s8174_s2 + $0x120] sm:$0xff] }
 0x76e   : > { %2474 = vmatpush.msrb.mxu2 %v2128_v61 }
 0x775   : > { %2270 = vmatmul.f32.gmra.mxu1 %v6388_v40  ;;  %2205 = vmatmul.f32.gmra.mxu0 %v6392_v58  ;;  %v5599_v40 = vld [vmem:[%s5825_s4 + $0x160] sm:$0xff]  ;;  %v5600_v58 = vld [vmem:[%s5825_s4 + $0x170] sm:$0xff] }
 0x77d   : > { %2273 = vmatmul.f32.gmra.mxu1 %v6396_v17  ;;  %2208 = vmatmul.f32.gmra.mxu0 %v5595_v56  ;;  %v2155_v17 = vpop.f32.mrf.mxu0 }
 0x785   : > { %2276 = vmatmul.f32.gmra.mxu1 %v6401_v51  ;;  %2211 = vmatmul.f32.gmra.mxu0 %v5596_v6  ;;  %v5601_v51 = vld [vmem:[%s5825_s4 + $0x180] sm:$0xff] }
 0x786   : > { %v8196_v6 = vld [vmem:[#allocation6_spill] sm:$0xff] }
 0x78d   : > { %2279 = vmatmul.f32.gmra.mxu1 %v6406_v30  ;;  %2214 = vmatmul.f32.gmra.mxu0 %v5597_v10  ;;  %v2127_v30 = vld [vmem:[%s8174_s2 + $0x118] sm:$0xff] }
 0x78e   : > { %2475 = vmatpush.msrb.mxu2 %v2127_v30 }
 0x795   : > { %2282 = vmatmul.f32.gmra.mxu1 %v6411_v45  ;;  %2217 = vmatmul.f32.gmra.mxu0 %v5598_v60  ;;  %v2126_v45 = vld [vmem:[%s8174_s2 + $0x110] sm:$0xff] }
 0x796   : > { %2476 = vmatpush.msrb.mxu2 %v2126_v45  ;;  %v8198_v45 = vld [vmem:[#allocation8_spill] sm:$0xff] }
 0x79d   : > { %2285 = vmatmul.f32.gmra.mxu1 %v6416_v33  ;;  %2220 = vmatmul.f32.gmra.mxu0 %v5599_v40  ;;  %v2158_v33 = vpop.f32.mrf.mxu0  ;;  %v8197_v40 = vld [vmem:[#allocation7_spill] sm:$0xff] }
 0x7a5   : > { %2288 = vmatmul.f32.gmra.mxu1 %v6421_v38  ;;  %2223 = vmatmul.f32.gmra.mxu0 %v5600_v58  ;;  %v5602_v38 = vld [vmem:[%s5825_s4 + $0x190] sm:$0xff]  ;;  %v2131_v58 = vld [vmem:[%s8174_s2 + $0x138] sm:$0xff] }
 0x7ad   : > { %2291 = vmatmul.f32.gmra.mxu1 %v6426_v43  ;;  %2226 = vmatmul.f32.gmra.mxu0 %v5601_v51  ;;  %v2161_v43 = vpop.f32.mrf.mxu0 }
 0x7b5   : > { %2294 = vmatmul.f32.gmra.mxu1 %v6430_v15  ;;  %2229 = vmatmul.f32.gmra.mxu0 %v5602_v38  ;;  %v5603_v15 = vld [vmem:[%s5825_s4 + $0x1a0] sm:$0xff] }
 0x7bd   : > { %2297 = vmatmul.f32.gmra.mxu1 %v6434_v48  ;;  %2232 = vmatmul.f32.gmra.mxu0 %v5603_v15  ;;  %v2164_v48 = vpop.f32.mrf.mxu0  ;;  %v8199_v15 = vld [vmem:[#allocation9_spill] sm:$0xff] }
 0x7c5   : > { %2300 = vmatmul.f32.gmra.mxu1 %v6438_v54  ;;  %v5604_v54 = vld [vmem:[%s5825_s4 + $0x1b0] sm:$0xff]  ;;  %v2167_v53 = vpop.f32.mrf.mxu0 }
 0x7c6   : > { %2235 = vmatmul.f32.gmra.mxu0 %v5604_v54 }
 0x7cd   : > { %2303 = vmatmul.f32.gmra.mxu1 %v6455_v35 }
 0x7ce   : > { %2238 = vmatmul.f32.gmra.mxu0 %v5605_v50  ;;  %v6906_v50 = vld [vmem:[%s8174_s2 + $0x150] ss:$0 sm:$0xff] }
 0x7d5   : > { %2306 = vmatmul.f32.gmra.mxu1 %v6460_v0  ;;  %v2133_v0 = vld [vmem:[%s8174_s2 + $0x148] sm:$0xff] }
 0x7d6   : > { %2781 = vmatpush.msrb.mxu3 %v2133_v0  ;;  %v6912_v0 = vld [vmem:[%s8174_s2 + $0x151] ss:$0 sm:$0xff] }
 0x7dd   : > { %2309 = vmatmul.f32.gmra.mxu1 %v6465_v19  ;;  %v2170_v19 = vpop.f32.mrf.mxu0  ;;  %2241 = vmatmul.f32.gmra.mxu0 %v5606_v25 }
 0x7e5   : > { %2312 = vmatmul.f32.gmra.mxu1 %v6470_v1  ;;  %v2173_v13 = vpop.f32.mrf.mxu0  ;;  %2244 = vmatmul.f32.gmra.mxu0 %v5607_v4 }
 0x7ea   : > { %v2268_v35 = vpop.f32.mrf.mxu1 }
 0x7eb   : > { %v2269_v44 = vadd.f32 %v2268_v35, %v2155_v17  ;;  %v2130_v17 = vld [vmem:[%s8174_s2 + $0x130] sm:$0xff] }
 0x7ed   : > { %2315 = vmatmul.f32.gmra.mxu1 %v6475_v27  ;;  %5071 = vmatmul.msk.f32.vlgmr.msrb.gmra.mxu2 %vm852_vm0, %v2269_v44  ;;  %v2176_v27 = vpop.f32.mrf.mxu0 }
 0x7ee   : > { %2247 = vmatmul.f32.gmra.mxu0 %v5608_v18 }
 0x7f2   : > { %v2271_v1 = vpop.f32.mrf.mxu1 }
 0x7f3   : > { %v2272_v31 = vadd.f32 %v2271_v1, %v2158_v33 }
 0x7f5   : > { %2318 = vmatmul.f32.gmra.mxu1 %v6481_v37  ;;  %5072 = vmatmul.msk.f32.gmra.mxu2 %vm852_vm0, %v2272_v31  ;;  %v2179_v37 = vpop.f32.mrf.mxu0  ;;  %v6917_v31 = vld [vmem:[%s8174_s2 + $0x152] ss:$0 sm:$0xff] }
 0x7fa   : > { %v2274_v28 = vpop.f32.mrf.mxu1 }
 0x7fb   : > { %v2275_v5 = vadd.f32 %v2274_v28, %v2161_v43 }
 0x7fd   : > { %2321 = vmatmul.f32.gmra.mxu1 %v6487_v41  ;;  %5073 = vmatmul.msk.f32.gmra.mxu2 %vm852_vm0, %v2275_v5  ;;  %v2182_v22 = vpop.f32.mrf.mxu0  ;;  %v2885_v5 = vld [vmem:[%s8174_s2 + $0x170] sm:$0xff] }
 0x7fe   : > { %2998 = vmatpush.msrb.mxu0 %v2885_v5 }
 0x802   : > { %v2277_v20 = vpop.f32.mrf.mxu1 }
 0x803   : > { %v2278_v21 = vadd.f32 %v2277_v20, %v2164_v48 }
 0x805   : > { %2324 = vmatmul.f32.gmra.mxu1 %v6493_v8  ;;  %5074 = vmatmul.msk.f32.gmra.mxu2 %vm852_vm0, %v2278_v21  ;;  %v2185_v9 = vpop.f32.mrf.mxu0 }
 0x80a   : > { %v2280_v26 = vpop.f32.mrf.mxu1 }
 0x80b   : > { %v2281_v32 = vadd.f32 %v2280_v26, %v2167_v53 }
 0x80d   : > { %2327 = vmatmul.f32.gmra.mxu1 %v6498_v14  ;;  %5075 = vmatmul.msk.f32.gmra.mxu2 %vm852_vm0, %v2281_v32  ;;  %v2188_v8 = vpop.f32.mrf.mxu0 }
 0x812   : > { %v2283_v41 = vpop.f32.mrf.mxu1 }
 0x813   : > { %v2284_v34 = vadd.f32 %v2283_v41, %v2170_v19 }
 0x815   : > { %2330 = vmatmul.f32.gmra.mxu1 %v6503_v16  ;;  %5076 = vmatmul.msk.f32.gmra.mxu2 %vm852_vm0, %v2284_v34  ;;  %v2191_v14 = vpop.f32.mrf.mxu0  ;;  %v2132_v16 = vld [vmem:[%s8174_s2 + $0x140] sm:$0xff] }
 0x816   : > { %2782 = vmatpush.msrb.mxu3 %v2132_v16 }
 0x818   : > { %2783 = vmatpush.msrb.mxu3 %v2131_v58 }
 0x81a   : > { %v2286_v57 = vpop.f32.mrf.mxu1  ;;  %2784 = vmatpush.msrb.mxu3 %v2130_v17 }
 0x81b   : > { %v2287_v3 = vadd.f32 %v2286_v57, %v2173_v13 }
 0x81d   : > { %2333 = vmatmul.f32.gmra.mxu1 %v6508_v42  ;;  %5077 = vmatmul.msk.f32.gmra.mxu2 %vm852_vm0, %v2287_v3  ;;  %v2194_v42 = vpop.f32.mrf.mxu0 }
 0x822   : > { %v2289_v11 = vpop.f32.mrf.mxu1 }
 0x823   : > { %v2290_v29 = vadd.f32 %v2289_v11, %v2176_v27 }
 0x825   : > { %2336 = vmatmul.f32.gmra.mxu1 %v6513_v2  ;;  %5078 = vmatmul.msk.f32.gmra.mxu2 %vm852_vm0, %v2290_v29  ;;  %v2197_v2 = vpop.f32.mrf.mxu0 }
 0x82a   : > { %v2292_v36 = vpop.f32.mrf.mxu1 }
 0x82b   : > { %v2293_v23 = vadd.f32 %v2292_v36, %v2179_v37 }
 0x82d   : > { %2339 = vmatmul.f32.gmra.mxu1 %v6518_v63  ;;  %5079 = vmatmul.msk.f32.gmra.mxu2 %vm852_vm0, %v2293_v23  ;;  %v2200_v55 = vpop.f32.mrf.mxu0  ;;  %v8195_v63 = vld [vmem:[#allocation5_spill] sm:$0xff] }
 0x832   : > { %v2295_v12 = vpop.f32.mrf.mxu1 }
 0x833   : > { %v2296_v49 = vadd.f32 %v2295_v12, %v2182_v22 }
 0x835   : > { %2342 = vmatmul.f32.gmra.mxu1 %v8193_v39  ;;  %5080 = vmatmul.msk.f32.gmra.mxu2 %vm852_vm0, %v2296_v49  ;;  %v2203_v52 = vpop.f32.mrf.mxu0 }
 0x83a   : > { %v2298_v46 = vpop.f32.mrf.mxu1 }
 0x83b   : > { %v2299_v59 = vadd.f32 %v2298_v46, %v2185_v9 }
 0x83d   : > { %2345 = vmatmul.f32.gmra.mxu1 %v8194_v7  ;;  %5081 = vmatmul.msk.f32.gmra.mxu2 %vm852_vm0, %v2299_v59  ;;  %v2206_v61 = vpop.f32.mrf.mxu0 }
 0x842   : > { %v2301_v24 = vpop.f32.mrf.mxu1 }
 0x843   : > { %v2302_v62 = vadd.f32 %v2301_v24, %v2188_v8 }
 0x845   : > { %2348 = vmatmul.f32.gmra.mxu1 %v8195_v63  ;;  %5082 = vmatmul.msk.f32.gmra.mxu2 %vm852_vm0, %v2302_v62  ;;  %v2209_v33 = vpop.f32.mrf.mxu0 }
 0x84a   : > { %v2304_v47 = vpop.f32.mrf.mxu1 }
 0x84b   : > { %v2305_v56 = vadd.f32 %v2304_v47, %v2191_v14 }
 0x84d   : > { %2351 = vmatmul.f32.gmra.mxu1 %v8196_v6  ;;  %5083 = vmatmul.msk.f32.gmra.mxu2 %vm852_vm0, %v2305_v56  ;;  %v2212_v48 = vpop.f32.mrf.mxu0 }
 0x852   : > { %v2307_v10 = vpop.f32.mrf.mxu1 }
 0x853   : > { %v2308_v60 = vadd.f32 %v2307_v10, %v2194_v42 }
 0x855   : > { %2354 = vmatmul.f32.gmra.mxu1 %v8197_v40  ;;  %5084 = vmatmul.msk.f32.gmra.mxu2 %vm852_vm0, %v2308_v60  ;;  %v2215_v25 = vpop.f32.mrf.mxu0 }
 0x85a   : > { %v2310_v51 = vpop.f32.mrf.mxu1 }
 0x85b   : > { %v2311_v30 = vadd.f32 %v2310_v51, %v2197_v2 }
 0x85d   : > { %2357 = vmatmul.f32.gmra.mxu1 %v8198_v45  ;;  %5085 = vmatmul.msk.f32.gmra.mxu2 %vm852_vm0, %v2311_v30  ;;  %v2218_v26 = vpop.f32.mrf.mxu0 }
 0x862   : > { %v2313_v38 = vpop.f32.mrf.mxu1 }
 0x863   : > { %v2314_v43 = vadd.f32 %v2313_v38, %v2200_v55 }
 0x865   : > { %2360 = vmatmul.f32.gmra.mxu1 %v8199_v15  ;;  %5086 = vmatmul.msk.f32.gmra.mxu2 %vm852_vm0, %v2314_v43  ;;  %v2221_v11 = vpop.f32.mrf.mxu0 }
 0x86a   : > { %v2316_v54 = vpop.f32.mrf.mxu1 }
 0x86b   : > { %v2317_v53 = vadd.f32 %v2316_v54, %v2203_v52 }
 0x86d   : > { %5087 = vmatmul.msk.f32.gmra.mxu2 %vm852_vm0, %v2317_v53  ;;  %v2224_v2 = vpop.f32.mrf.mxu0 }
 0x870   : > { %v2478_v35 = vpop.f32.mrf.mxu2 }
 0x871   : > { %v2479_v44 = vadd.f32 %v6906_v50, %v2478_v35 }
 0x872   : > { %v2319_v19 = vpop.f32.mrf.mxu1 }
 0x873   : > { %v2574_v1 = vmax.f32 %v2479_v44, 0.0  ;;  %v2320_v13 = vadd.f32 %v2319_v19, %v2206_v61 }
 0x875   : > { %v2607_v4 = vmul.f32 %v6912_v0, %v2574_v1  ;;  %5088 = vmatmul.msk.f32.gmra.mxu2 %vm852_vm0, %v2320_v13  ;;  %v2227_v56 = vpop.f32.mrf.mxu0 }
 0x877   : > { %v2640_v28 = vadd.f32 %v6917_v31, %v2607_v4 }
 0x878   : > { %v2481_v27 = vpop.f32.mrf.mxu2 }
 0x879   : > { %v2482_v18 = vadd.f32 %v6906_v50, %v2481_v27  ;;  %5103 = vmatmul.msk.f32.vlgmr.msrb.gmra.mxu3 %vm852_vm0, %v2640_v28 }
 0x87a   : > { %v2322_v20 = vpop.f32.mrf.mxu1 }
 0x87b   : > { %v2575_v21 = vmax.f32 %v2482_v18, 0.0  ;;  %v2323_v37 = vadd.f32 %v2322_v20, %v2209_v33  ;;  %v2884_v18 = vld [vmem:[%s8174_s2 + $0x168] sm:$0xff] }
 0x87c   : > { %2999 = vmatpush.msrb.mxu0 %v2884_v18 }
 0x87d   : > { %v2608_v32 = vmul.f32 %v6912_v0, %v2575_v21  ;;  %5089 = vmatmul.msk.f32.gmra.mxu2 %vm852_vm0, %v2323_v37  ;;  %v2230_v45 = vpop.f32.mrf.mxu0 }
 0x87f   : > { %v2641_v22 = vadd.f32 %v6917_v31, %v2608_v32 }
 0x880   : > { %v2484_v41 = vpop.f32.mrf.mxu2 }
 0x881   : > { %v2485_v34 = vadd.f32 %v6906_v50, %v2484_v41  ;;  %5104 = vmatmul.msk.f32.gmra.mxu3 %vm852_vm0, %v2641_v22 }
 0x882   : > { %v2325_v9 = vpop.f32.mrf.mxu1 }
 0x883   : > { %v2576_v57 = vmax.f32 %v2485_v34, 0.0  ;;  %v2326_v3 = vadd.f32 %v2325_v9, %v2212_v48 }
 0x885   : > { %v2609_v8 = vmul.f32 %v6912_v0, %v2576_v57  ;;  %5090 = vmatmul.msk.f32.gmra.mxu2 %vm852_vm0, %v2326_v3  ;;  %v2233_v44 = vpop.f32.mrf.mxu0 }
 0x887   : > { %v2642_v29 = vadd.f32 %v6917_v31, %v2609_v8 }
 0x888   : > { %v2487_v14 = vpop.f32.mrf.mxu2 }
 0x889   : > { %v2488_v36 = vadd.f32 %v6906_v50, %v2487_v14  ;;  %5105 = vmatmul.msk.f32.gmra.mxu3 %vm852_vm0, %v2642_v29 }
 0x88a   : > { %v2328_v23 = vpop.f32.mrf.mxu1 }
 0x88b   : > { %v2577_v16 = vmax.f32 %v2488_v36, 0.0  ;;  %v2329_v42 = vadd.f32 %v2328_v23, %v2215_v25 }
 0x88d   : > { %v2610_v12 = vmul.f32 %v6912_v0, %v2577_v16  ;;  %5091 = vmatmul.msk.f32.gmra.mxu2 %vm852_vm0, %v2329_v42  ;;  %v2236_v21 = vpop.f32.mrf.mxu0 }
 0x88f   : > { %v2643_v49 = vadd.f32 %v6917_v31, %v2610_v12 }
 0x890   : > { %v2490_v39 = vpop.f32.mrf.mxu2 }
 0x891   : > { %v2491_v46 = vadd.f32 %v6906_v50, %v2490_v39  ;;  %5106 = vmatmul.msk.f32.gmra.mxu3 %vm852_vm0, %v2643_v49 }
 0x892   : > { %v2331_v59 = vpop.f32.mrf.mxu1 }
 0x893   : > { %v2578_v7 = vmax.f32 %v2491_v46, 0.0  ;;  %v2332_v55 = vadd.f32 %v2331_v59, %v2218_v26 }
 0x895   : > { %v2611_v24 = vmul.f32 %v6912_v0, %v2578_v7  ;;  %5092 = vmatmul.msk.f32.gmra.mxu2 %vm852_vm0, %v2332_v55  ;;  %v2239_v8 = vpop.f32.mrf.mxu0 }
 0x897   : > { %v2644_v62 = vadd.f32 %v6917_v31, %v2611_v24 }
 0x898   : > { %v2493_v63 = vpop.f32.mrf.mxu2 }
 0x899   : > { %v2494_v47 = vadd.f32 %v6906_v50, %v2493_v63  ;;  %5107 = vmatmul.msk.f32.gmra.mxu3 %vm852_vm0, %v2644_v62 }
 0x89a   : > { %v2334_v52 = vpop.f32.mrf.mxu1 }
 0x89b   : > { %v2579_v6 = vmax.f32 %v2494_v47, 0.0  ;;  %v2335_v10 = vadd.f32 %v2334_v52, %v2221_v11 }
 0x89d   : > { %v2612_v60 = vmul.f32 %v6912_v0, %v2579_v6  ;;  %5093 = vmatmul.msk.f32.gmra.mxu2 %vm852_vm0, %v2335_v10  ;;  %v2242_v39 = vpop.f32.mrf.mxu0  ;;  %v3482_v6 = vld [vmem:[%s8174_s2 + $0x1a8] sm:$0xff] }
 0x89e   : > { %3497 = vmatpush.msra.mxu2 %v3482_v6 }
 0x89f   : > { %v2645_v61 = vadd.f32 %v6917_v31, %v2612_v60 }
 0x8a0   : > { %v2496_v40 = vpop.f32.mrf.mxu2 }
 0x8a1   : > { %v2497_v58 = vadd.f32 %v6906_v50, %v2496_v40  ;;  %5108 = vmatmul.msk.f32.gmra.mxu3 %vm852_vm0, %v2645_v61  ;;  %v3481_v61 = vld [vmem:[%s8174_s2 + $0x1a0] sm:$0xff] }
 0x8a2   : > { %v2337_v17 = vpop.f32.mrf.mxu1  ;;  %3498 = vmatpush.msra.mxu2 %v3481_v61 }
 0x8a3   : > { %v2580_v51 = vmax.f32 %v2497_v58, 0.0  ;;  %v2338_v30 = vadd.f32 %v2337_v17, %v2224_v2  ;;  %v2883_v17 = vld [vmem:[%s8174_s2 + $0x160] sm:$0xff] }
 0x8a4   : > { %3000 = vmatpush.msrb.mxu0 %v2883_v17 }
 0x8a5   : > { %v2613_v33 = vmul.f32 %v6912_v0, %v2580_v51  ;;  %5094 = vmatmul.msk.f32.gmra.mxu2 %vm852_vm0, %v2338_v30  ;;  %v2245_v47 = vpop.f32.mrf.mxu0  ;;  %v3480_v51 = vld [vmem:[%s8174_s2 + $0x198] sm:$0xff] }
 0x8a6   : > { %3499 = vmatpush.msra.mxu2 %v3480_v51 }
 0x8a7   : > { %v2646_v38 = vadd.f32 %v6917_v31, %v2613_v33  ;;  %v3479_v33 = vld [vmem:[%s8174_s2 + $0x190] sm:$0xff] }
 0x8a8   : > { %v2499_v43 = vpop.f32.mrf.mxu2  ;;  %3500 = vmatpush.msra.mxu2 %v3479_v33 }
 0x8a9   : > { %v2500_v15 = vadd.f32 %v6906_v50, %v2499_v43  ;;  %5109 = vmatmul.msk.f32.gmra.mxu3 %vm852_vm0, %v2646_v38 }
 0x8aa   : > { %v2340_v48 = vpop.f32.mrf.mxu1 }
 0x8ab   : > { %v2581_v54 = vmax.f32 %v2500_v15, 0.0  ;;  %v2341_v53 = vadd.f32 %v2340_v48, %v2227_v56 }
 0x8ad   : > { %v2614_v35 = vmul.f32 %v6912_v0, %v2581_v54  ;;  %5095 = vmatmul.msk.f32.gmra.mxu2 %vm852_vm0, %v2341_v53  ;;  %v2248_v15 = vpop.f32.mrf.mxu0 }
 0x8af   : > { %v2647_v19 = vadd.f32 %v6917_v31, %v2614_v35 }
 0x8b0   : > { %v2502_v25 = vpop.f32.mrf.mxu2 }
 0x8b1   : > { %v2503_v1 = vadd.f32 %v6906_v50, %v2502_v25  ;;  %5110 = vmatmul.msk.f32.gmra.mxu3 %vm852_vm0, %v2647_v19 }
 0x8b2   : > { %v2343_v13 = vpop.f32.mrf.mxu1 }
 0x8b3   : > { %v2582_v4 = vmax.f32 %v2503_v1, 0.0  ;;  %v2344_v28 = vadd.f32 %v2343_v13, %v2230_v45  ;;  %v2882_v45 = vld [vmem:[%s8174_s2 + $0x158] sm:$0xff] }
 0x8b4   : > { %3001 = vmatpush.msrb.mxu0 %v2882_v45 }
 0x8b5   : > { %v2615_v5 = vmul.f32 %v6912_v0, %v2582_v4  ;;  %5096 = vmatmul.msk.f32.gmra.mxu2 %vm852_vm0, %v2344_v28 }
 0x8b7   : > { %v2648_v27 = vadd.f32 %v6917_v31, %v2615_v5 }
 0x8b8   : > { %v2505_v20 = vpop.f32.mrf.mxu2 }
 0x8b9   : > { %v2506_v37 = vadd.f32 %v6906_v50, %v2505_v20  ;;  %5111 = vmatmul.msk.f32.gmra.mxu3 %vm852_vm0, %v2648_v27 }
 0x8ba   : > { %v2346_v26 = vpop.f32.mrf.mxu1 }
 0x8bb   : > { %v2583_v32 = vmax.f32 %v2506_v37, 0.0  ;;  %v2347_v22 = vadd.f32 %v2346_v26, %v2233_v44 }
 0x8bd   : > { %v2616_v41 = vmul.f32 %v6912_v0, %v2583_v32  ;;  %5097 = vmatmul.msk.f32.gmra.mxu2 %vm852_vm0, %v2347_v22  ;;  %v7029_v32 = vld [vmem:[%s8174_s2 + $0x153] ss:$0 sm:$0xff] }
 0x8bf   : > { %v2649_v34 = vadd.f32 %v6917_v31, %v2616_v41 }
 0x8c0   : > { %v2508_v9 = vpop.f32.mrf.mxu2 }
 0x8c1   : > { %v2509_v57 = vadd.f32 %v6906_v50, %v2508_v9  ;;  %5112 = vmatmul.msk.f32.gmra.mxu3 %vm852_vm0, %v2649_v34 }
 0x8c2   : > { %v2349_v3 = vpop.f32.mrf.mxu1 }
 0x8c3   : > { %v2584_v11 = vmax.f32 %v2509_v57, 0.0  ;;  %v2350_v29 = vadd.f32 %v2349_v3, %v2236_v21  ;;  %v2887_v3 = vld [vmem:[%s8174_s2 + $0x180] sm:$0xff] }
 0x8c4   : > { %3312 = vmatpush.msra.mxu1 %v2887_v3 }
 0x8c5   : > { %v2617_v14 = vmul.f32 %v6912_v0, %v2584_v11  ;;  %5098 = vmatmul.msk.f32.gmra.mxu2 %vm852_vm0, %v2350_v29 }
 0x8c7   : > { %v2650_v36 = vadd.f32 %v6917_v31, %v2617_v14 }
 0x8c8   : > { %v2511_v23 = vpop.f32.mrf.mxu2 }
 0x8c9   : > { %v2512_v16 = vadd.f32 %v6906_v50, %v2511_v23  ;;  %5113 = vmatmul.msk.f32.gmra.mxu3 %vm852_vm0, %v2650_v36 }
 0x8ca   : > { %v2352_v42 = vpop.f32.mrf.mxu1 }
 0x8cb   : > { %v2585_v12 = vmax.f32 %v2512_v16, 0.0  ;;  %v2353_v49 = vadd.f32 %v2352_v42, %v2239_v8 }
 0x8cd   : > { %v2618_v2 = vmul.f32 %v6912_v0, %v2585_v12  ;;  %5099 = vmatmul.msk.f32.gmra.mxu2 %vm852_vm0, %v2353_v49 }
 0x8cf   : > { %v2651_v46 = vadd.f32 %v6917_v31, %v2618_v2 }
 0x8d0   : > { %v2514_v59 = vpop.f32.mrf.mxu2 }
 0x8d1   : > { %v2515_v7 = vadd.f32 %v6906_v50, %v2514_v59  ;;  %5114 = vmatmul.msk.f32.gmra.mxu3 %vm852_vm0, %v2651_v46 }
 0x8d2   : > { %v2355_v55 = vpop.f32.mrf.mxu1 }
 0x8d3   : > { %v2586_v24 = vmax.f32 %v2515_v7, 0.0  ;;  %v2356_v62 = vadd.f32 %v2355_v55, %v2242_v39 }
 0x8d5   : > { %v2619_v63 = vmul.f32 %v6912_v0, %v2586_v24  ;;  %5100 = vmatmul.msk.f32.gmra.mxu2 %vm852_vm0, %v2356_v62 }
 0x8d7   : > { %v2652_v52 = vadd.f32 %v6917_v31, %v2619_v63 }
 0x8d8   : > { %v2517_v56 = vpop.f32.mrf.mxu2 }
 0x8d9   : > { %v2518_v10 = vadd.f32 %v6906_v50, %v2517_v56  ;;  %5115 = vmatmul.msk.f32.gmra.mxu3 %vm852_vm0, %v2652_v52 }
 0x8da   : > { %v2358_v60 = vpop.f32.mrf.mxu1 }
 0x8db   : > { %v2587_v40 = vmax.f32 %v2518_v10, 0.0  ;;  %v2359_v58 = vadd.f32 %v2358_v60, %v2245_v47 }
 0x8dd   : > { %v2620_v30 = vmul.f32 %v6912_v0, %v2587_v40  ;;  %5101 = vmatmul.msk.f32.gmra.mxu2 %vm852_vm0, %v2359_v58 }
 0x8df   : > { %v2653_v38 = vadd.f32 %v6917_v31, %v2620_v30 }
 0x8e0   : > { %v2520_v43 = vpop.f32.mrf.mxu2 }
 0x8e1   : > { %v2521_v48 = vadd.f32 %v6906_v50, %v2520_v43  ;;  %5116 = vmatmul.msk.f32.gmra.mxu3 %vm852_vm0, %v2653_v38 }
 0x8e2   : > { %v2361_v54 = vpop.f32.mrf.mxu1 }
 0x8e3   : > { %v2588_v53 = vmax.f32 %v2521_v48, 0.0  ;;  %v2362_v35 = vadd.f32 %v2361_v54, %v2248_v15 }
 0x8e5   : > { %v2621_v44 = vmul.f32 %v6912_v0, %v2588_v53  ;;  %5102 = vmatmul.msk.f32.gmra.mxu2 %vm852_vm0, %v2362_v35 }
 0x8e7   : > { %v2654_v19 = vadd.f32 %v6917_v31, %v2621_v44 }
 0x8e8   : > { %v2523_v25 = vpop.f32.mrf.mxu2 }
 0x8e9   : > { %v2524_v1 = vadd.f32 %v6906_v50, %v2523_v25  ;;  %5117 = vmatmul.msk.f32.gmra.mxu3 %vm852_vm0, %v2654_v19 }
 0x8eb   : > { %v2589_v13 = vmax.f32 %v2524_v1, 0.0 }
 0x8ed   : > { %v2622_v4 = vmul.f32 %v6912_v0, %v2589_v13 }
 0x8ef   : > { %v2655_v28 = vadd.f32 %v6917_v31, %v2622_v4 }
 0x8f0   : > { %v2526_v5 = vpop.f32.mrf.mxu2 }
 0x8f1   : > { %v2527_v27 = vadd.f32 %v6906_v50, %v2526_v5  ;;  %5118 = vmatmul.msk.f32.gmra.mxu3 %vm852_vm0, %v2655_v28 }
 0x8f3   : > { %v2590_v18 = vmax.f32 %v2527_v27, 0.0 }
 0x8f5   : > { %v2623_v20 = vmul.f32 %v6912_v0, %v2590_v18 }
 0x8f7   : > { %v2656_v21 = vadd.f32 %v6917_v31, %v2623_v20 }
 0x8f8   : > { %v2529_v37 = vpop.f32.mrf.mxu2 }
 0x8f9   : > { %v2530_v26 = vadd.f32 %v6906_v50, %v2529_v37  ;;  %5119 = vmatmul.msk.f32.gmra.mxu3 %vm852_vm0, %v2656_v21 }
 0x8fb   : > { %v2591_v22 = vmax.f32 %v2530_v26, 0.0 }
 0x8fc   : > { %v2786_v41 = vpop.f32.mrf.mxu3 }
 0x8fd   : > { %v2624_v34 = vmul.f32 %v6912_v0, %v2591_v22  ;;  %v2787_v9 = vadd.f32 %v7029_v32, %v2786_v41 }
 0x8ff   : > { %v2657_v57 = vadd.f32 %v6917_v31, %v2624_v34  ;;  %5135 = vmatmul.msk.f32.vlgmr.msrb.gmra.mxu0 %vm852_vm0, %v2787_v9  ;;  %5199 = vmatmul.msk.f32.vlgmr.msra.gmra.mxu2 %vm852_vm0, %v2787_v9 }
 0x900   : > { %v2532_v8 = vpop.f32.mrf.mxu2 }
 0x901   : > { %v2533_v11 = vadd.f32 %v6906_v50, %v2532_v8  ;;  %5120 = vmatmul.msk.f32.gmra.mxu3 %vm852_vm0, %v2657_v57 }
 0x903   : > { %v2592_v29 = vmax.f32 %v2533_v11, 0.0 }
 0x904   : > { %v2789_v14 = vpop.f32.mrf.mxu3 }
 0x905   : > { %v2625_v36 = vmul.f32 %v6912_v0, %v2592_v29  ;;  %v2790_v23 = vadd.f32 %v7029_v32, %v2789_v14 }
 0x907   : > { %v2658_v16 = vadd.f32 %v6917_v31, %v2625_v36  ;;  %5136 = vmatmul.msk.f32.gmra.mxu0 %vm852_vm0, %v2790_v23  ;;  %5200 = vmatmul.msk.f32.gmra.mxu2 %vm852_vm0, %v2790_v23 }
 0x908   : > { %v2535_v42 = vpop.f32.mrf.mxu2 }
 0x909   : > { %v2536_v12 = vadd.f32 %v6906_v50, %v2535_v42  ;;  %5121 = vmatmul.msk.f32.gmra.mxu3 %vm852_vm0, %v2658_v16 }
 0x90b   : > { %v2593_v49 = vmax.f32 %v2536_v12, 0.0 }
 0x90c   : > { %v2792_v39 = vpop.f32.mrf.mxu3 }
 0x90d   : > { %v2626_v2 = vmul.f32 %v6912_v0, %v2593_v49  ;;  %v2793_v46 = vadd.f32 %v7029_v32, %v2792_v39 }
 0x90f   : > { %v2659_v59 = vadd.f32 %v6917_v31, %v2626_v2  ;;  %5137 = vmatmul.msk.f32.gmra.mxu0 %vm852_vm0, %v2793_v46  ;;  %5201 = vmatmul.msk.f32.gmra.mxu2 %vm852_vm0, %v2793_v46 }
 0x910   : > { %v2538_v7 = vpop.f32.mrf.mxu2 }
 0x911   : > { %v2539_v55 = vadd.f32 %v6906_v50, %v2538_v7  ;;  %5122 = vmatmul.msk.f32.gmra.mxu3 %vm852_vm0, %v2659_v59 }
 0x913   : > { %v2594_v24 = vmax.f32 %v2539_v55, 0.0 }
 0x914   : > { %v2795_v62 = vpop.f32.mrf.mxu3 }
 0x915   : > { %v2627_v63 = vmul.f32 %v6912_v0, %v2594_v24  ;;  %v2796_v47 = vadd.f32 %v7029_v32, %v2795_v62 }
 0x917   : > { %v2660_v52 = vadd.f32 %v6917_v31, %v2627_v63  ;;  %5138 = vmatmul.msk.f32.gmra.mxu0 %vm852_vm0, %v2796_v47  ;;  %5202 = vmatmul.msk.f32.gmra.mxu2 %vm852_vm0, %v2796_v47 }
 0x918   : > { %v2541_v56 = vpop.f32.mrf.mxu2 }
 0x919   : > { %v2542_v6 = vadd.f32 %v6906_v50, %v2541_v56  ;;  %5123 = vmatmul.msk.f32.gmra.mxu3 %vm852_vm0, %v2660_v52 }
 0x91b   : > { %v2595_v10 = vmax.f32 %v2542_v6, 0.0 }
 0x91c   : > { %v2798_v60 = vpop.f32.mrf.mxu3 }
 0x91d   : > { %v2628_v61 = vmul.f32 %v6912_v0, %v2595_v10  ;;  %v2799_v40 = vadd.f32 %v7029_v32, %v2798_v60 }
 0x91f   : > { %v2661_v58 = vadd.f32 %v6917_v31, %v2628_v61  ;;  %5139 = vmatmul.msk.f32.gmra.mxu0 %vm852_vm0, %v2799_v40  ;;  %5203 = vmatmul.msk.f32.gmra.mxu2 %vm852_vm0, %v2799_v40 }
 0x920   : > { %v2544_v17 = vpop.f32.mrf.mxu2 }
 0x921   : > { %v2545_v51 = vadd.f32 %v6906_v50, %v2544_v17  ;;  %5124 = vmatmul.msk.f32.gmra.mxu3 %vm852_vm0, %v2661_v58  ;;  %v2886_v17 = vld [vmem:[%s8174_s2 + $0x178] sm:$0xff] }
 0x922   : > { %3313 = vmatpush.msra.mxu1 %v2886_v17 }
 0x923   : > { %v2596_v30 = vmax.f32 %v2545_v51, 0.0 }
 0x924   : > { %v2801_v45 = vpop.f32.mrf.mxu3 }
 0x925   : > { %v2629_v33 = vmul.f32 %v6912_v0, %v2596_v30  ;;  %v2802_v38 = vadd.f32 %v7029_v32, %v2801_v45 }
 0x927   : > { %v2662_v43 = vadd.f32 %v6917_v31, %v2629_v33  ;;  %5140 = vmatmul.msk.f32.gmra.mxu0 %vm852_vm0, %v2802_v38  ;;  %5204 = vmatmul.msk.f32.gmra.mxu2 %vm852_vm0, %v2802_v38 }
 0x928   : > { %v2547_v15 = vpop.f32.mrf.mxu2 }
 0x929   : > { %v2548_v48 = vadd.f32 %v6906_v50, %v2547_v15  ;;  %5125 = vmatmul.msk.f32.gmra.mxu3 %vm852_vm0, %v2662_v43  ;;  %v3700_v43 = vld [vmem:[%s8174_s2 + $0x1c8] sm:$0xff] }
 0x92a   : > { %3814 = vmatpush.msra.mxu3 %v3700_v43 }
 0x92b   : > { %v2597_v54 = vmax.f32 %v2548_v48, 0.0 }
 0x92c   : > { %v2804_v53 = vpop.f32.mrf.mxu3 }
 0x92d   : > { %v2630_v35 = vmul.f32 %v6912_v0, %v2597_v54  ;;  %v2805_v44 = vadd.f32 %v7029_v32, %v2804_v53 }
 0x92f   : > { %v2663_v19 = vadd.f32 %v6917_v31, %v2630_v35  ;;  %5141 = vmatmul.msk.f32.gmra.mxu0 %vm852_vm0, %v2805_v44  ;;  %5205 = vmatmul.msk.f32.gmra.mxu2 %vm852_vm0, %v2805_v44 }
 0x930   : > { %v2550_v25 = vpop.f32.mrf.mxu2 }
 0x931   : > { %v2551_v1 = vadd.f32 %v6906_v50, %v2550_v25  ;;  %5126 = vmatmul.msk.f32.gmra.mxu3 %vm852_vm0, %v2663_v19 }
 0x933   : > { %v2598_v13 = vmax.f32 %v2551_v1, 0.0 }
 0x934   : > { %v2807_v4 = vpop.f32.mrf.mxu3 }
 0x935   : > { %v2631_v28 = vmul.f32 %v6912_v0, %v2598_v13  ;;  %v2808_v5 = vadd.f32 %v7029_v32, %v2807_v4  ;;  %v7162_v4 = vld [vmem:[%s8174_s2 + $0x18a] ss:$0 sm:$0xff] }
 0x937   : > { %v2664_v27 = vadd.f32 %v6917_v31, %v2631_v28  ;;  %5142 = vmatmul.msk.f32.gmra.mxu0 %vm852_vm0, %v2808_v5  ;;  %5206 = vmatmul.msk.f32.gmra.mxu2 %vm852_vm0, %v2808_v5  ;;  %v7170_v5 = vld [vmem:[%s8174_s2 + $0x1b0] ss:$0 sm:$0xff] }
 0x938   : > { %v2553_v18 = vpop.f32.mrf.mxu2 }
 0x939   : > { %v2554_v20 = vadd.f32 %v6906_v50, %v2553_v18  ;;  %5127 = vmatmul.msk.f32.gmra.mxu3 %vm852_vm0, %v2664_v27  ;;  %v7176_v18 = vld [vmem:[%s8174_s2 + $0x1b1] ss:$0 sm:$0xff] }
 0x93b   : > { %v2599_v21 = vmax.f32 %v2554_v20, 0.0 }
 0x93c   : > { %v2810_v37 = vpop.f32.mrf.mxu3 }
 0x93d   : > { %v2632_v26 = vmul.f32 %v6912_v0, %v2599_v21  ;;  %v2811_v22 = vadd.f32 %v7029_v32, %v2810_v37  ;;  %v3699_v37 = vld [vmem:[%s8174_s2 + $0x1c0] sm:$0xff] }
 0x93e   : > { %4022 = vmatpush.msra.mxu0 %v3699_v37 }
 0x93f   : > { %v2665_v41 = vadd.f32 %v6917_v31, %v2632_v26  ;;  %5143 = vmatmul.msk.f32.gmra.mxu0 %vm852_vm0, %v2811_v22  ;;  %5207 = vmatmul.msk.f32.gmra.mxu2 %vm852_vm0, %v2811_v22  ;;  %v7185_v22 = vld [vmem:[%s8174_s2 + $0x1b2] ss:$0 sm:$0xff] }
 0x940   : > { %v2556_v34 = vpop.f32.mrf.mxu2 }
 0x941   : > { %v2557_v9 = vadd.f32 %v6906_v50, %v2556_v34  ;;  %5128 = vmatmul.msk.f32.gmra.mxu3 %vm852_vm0, %v2665_v41 }
 0x943   : > { %v2600_v57 = vmax.f32 %v2557_v9, 0.0 }
 0x944   : > { %v2813_v3 = vpop.f32.mrf.mxu3 }
 0x945   : > { %v2633_v8 = vmul.f32 %v6912_v0, %v2600_v57  ;;  %v2814_v11 = vadd.f32 %v7029_v32, %v2813_v3 }
 0x947   : > { %v2666_v29 = vadd.f32 %v6917_v31, %v2633_v8  ;;  %5144 = vmatmul.msk.f32.gmra.mxu0 %vm852_vm0, %v2814_v11  ;;  %5208 = vmatmul.msk.f32.gmra.mxu2 %vm852_vm0, %v2814_v11 }
 0x948   : > { %v2559_v14 = vpop.f32.mrf.mxu2 }
 0x949   : > { %v2560_v36 = vadd.f32 %v6906_v50, %v2559_v14  ;;  %5129 = vmatmul.msk.f32.gmra.mxu3 %vm852_vm0, %v2666_v29 }
 0x94b   : > { %v2601_v23 = vmax.f32 %v2560_v36, 0.0 }
 0x94c   : > { %v2816_v16 = vpop.f32.mrf.mxu3 }
 0x94d   : > { %v2634_v42 = vmul.f32 %v6912_v0, %v2601_v23  ;;  %v2817_v12 = vadd.f32 %v7029_v32, %v2816_v16 }
 0x94f   : > { %v2667_v49 = vadd.f32 %v6917_v31, %v2634_v42  ;;  %5145 = vmatmul.msk.f32.gmra.mxu0 %vm852_vm0, %v2817_v12  ;;  %5209 = vmatmul.msk.f32.gmra.mxu2 %vm852_vm0, %v2817_v12 }
 0x950   : > { %v2562_v39 = vpop.f32.mrf.mxu2 }
 0x951   : > { %v2563_v2 = vadd.f32 %v6906_v50, %v2562_v39  ;;  %5130 = vmatmul.msk.f32.gmra.mxu3 %vm852_vm0, %v2667_v49 }
 0x953   : > { %v2602_v46 = vmax.f32 %v2563_v2, 0.0 }
 0x954   : > { %v2819_v59 = vpop.f32.mrf.mxu3 }
 0x955   : > { %v2635_v7 = vmul.f32 %v6912_v0, %v2602_v46  ;;  %v2820_v55 = vadd.f32 %v7029_v32, %v2819_v59 }
 0x957   : > { %v2668_v24 = vadd.f32 %v6917_v31, %v2635_v7  ;;  %5146 = vmatmul.msk.f32.gmra.mxu0 %vm852_vm0, %v2820_v55  ;;  %5210 = vmatmul.msk.f32.gmra.mxu2 %vm852_vm0, %v2820_v55 }
 0x958   : > { %v2565_v62 = vpop.f32.mrf.mxu2 }
 0x959   : > { %v2566_v63 = vadd.f32 %v6906_v50, %v2565_v62  ;;  %5131 = vmatmul.msk.f32.gmra.mxu3 %vm852_vm0, %v2668_v24 }
 0x95b   : > { %v2603_v47 = vmax.f32 %v2566_v63, 0.0 }
 0x95c   : > { %v2822_v52 = vpop.f32.mrf.mxu3 }
 0x95d   : > { %v2636_v56 = vmul.f32 %v6912_v0, %v2603_v47  ;;  %v2823_v6 = vadd.f32 %v7029_v32, %v2822_v52 }
 0x95f   : > { %v2669_v10 = vadd.f32 %v6917_v31, %v2636_v56  ;;  %5147 = vmatmul.msk.f32.gmra.mxu0 %vm852_vm0, %v2823_v6  ;;  %5211 = vmatmul.msk.f32.gmra.mxu2 %vm852_vm0, %v2823_v6 }
 0x960   : > { %v2568_v60 = vpop.f32.mrf.mxu2 }
 0x961   : > { %v2569_v61 = vadd.f32 %v6906_v50, %v2568_v60  ;;  %5132 = vmatmul.msk.f32.gmra.mxu3 %vm852_vm0, %v2669_v10 }
 0x963   : > { %v2604_v40 = vmax.f32 %v2569_v61, 0.0 }
 0x964   : > { %v2825_v58 = vpop.f32.mrf.mxu3 }
 0x965   : > { %v2637_v51 = vmul.f32 %v6912_v0, %v2604_v40  ;;  %v2826_v30 = vadd.f32 %v7029_v32, %v2825_v58 }
 0x967   : > { %v2670_v45 = vadd.f32 %v6917_v31, %v2637_v51  ;;  %5148 = vmatmul.msk.f32.gmra.mxu0 %vm852_vm0, %v2826_v30  ;;  %5212 = vmatmul.msk.f32.gmra.mxu2 %vm852_vm0, %v2826_v30 }
 0x968   : > { %v2571_v33 = vpop.f32.mrf.mxu2 }
 0x969   : > { %v2572_v38 = vadd.f32 %v6906_v50, %v2571_v33  ;;  %5133 = vmatmul.msk.f32.gmra.mxu3 %vm852_vm0, %v2670_v45 }
 0x96b   : > { %v2605_v15 = vmax.f32 %v2572_v38, 0.0 }
 0x96c   : > { %v2828_v48 = vpop.f32.mrf.mxu3 }
 0x96d   : > { %v2638_v54 = vmul.f32 %v6912_v0, %v2605_v15  ;;  %v2829_v53 = vadd.f32 %v7029_v32, %v2828_v48  ;;  %v7150_v0 = vld [vmem:[%s8174_s2 + $0x188] ss:$0 sm:$0xff] }
 0x96f   : > { %v2671_v35 = vadd.f32 %v6917_v31, %v2638_v54  ;;  %5149 = vmatmul.msk.f32.gmra.mxu0 %vm852_vm0, %v2829_v53  ;;  %5213 = vmatmul.msk.f32.gmra.mxu2 %vm852_vm0, %v2829_v53  ;;  %v7155_v31 = vld [vmem:[%s8174_s2 + $0x189] ss:$0 sm:$0xff] }
 0x971   : > { %5134 = vmatmul.msk.f32.gmra.mxu3 %vm852_vm0, %v2671_v35 }
 0x974   : > { %v2831_v50 = vpop.f32.mrf.mxu3 }
 0x975   : > { %v2832_v44 = vadd.f32 %v7029_v32, %v2831_v50 }
 0x977   : > { %5150 = vmatmul.msk.f32.gmra.mxu0 %vm852_vm0, %v2832_v44  ;;  %5214 = vmatmul.msk.f32.gmra.mxu2 %vm852_vm0, %v2832_v44 }
 0x97c   : > { %v2834_v19 = vpop.f32.mrf.mxu3  ;;  %v3003_v25 = vpop.f32.mrf.mxu0 }
 0x97d   : > { %v2835_v1 = vadd.f32 %v7029_v32, %v2834_v19  ;;  %v3004_v13 = vadd.f32 %v7150_v0, %v3003_v25 }
 0x97f   : > { %v3101_v28 = vmul.f32 %v7155_v31, %v3004_v13  ;;  %5151 = vmatmul.msk.f32.gmra.mxu0 %vm852_vm0, %v2835_v1  ;;  %5215 = vmatmul.msk.f32.gmra.mxu2 %vm852_vm0, %v2835_v1 }
 0x981   : > { %v3135_v27 = vadd.f32 %v7162_v4, %v3101_v28 }
 0x982   : > { %v3502_v20 = vpop.f32.mrf.mxu2 }
 0x983   : > { %v3167_v21 = vmax.f32 %v3135_v27, 0.0  ;;  %v3503_v26 = vadd.f32 %v7170_v5, %v3502_v20 }
 0x984   : > { %v2837_v41 = vpop.f32.mrf.mxu3  ;;  %v3006_v34 = vpop.f32.mrf.mxu0 }
 0x985   : > { %v2838_v9 = vadd.f32 %v7029_v32, %v2837_v41  ;;  %v3007_v57 = vadd.f32 %v7150_v0, %v3006_v34  ;;  %5167 = vmatmul.msk.f32.vlgmr.msra.gmra.mxu1 %vm3201_vm1, %v3167_v21  ;;  %v3600_v3 = vmul.f32 %v7176_v18, %v3503_v26 }
 0x987   : > { %v3102_v8 = vmul.f32 %v7155_v31, %v3007_v57  ;;  %5152 = vmatmul.msk.f32.gmra.mxu0 %vm852_vm0, %v2838_v9  ;;  %v3634_v11 = vadd.f32 %v7185_v22, %v3600_v3  ;;  %5216 = vmatmul.msk.f32.gmra.mxu2 %vm852_vm0, %v2838_v9 }
 0x989   : > { %v3136_v29 = vadd.f32 %v7162_v4, %v3102_v8  ;;  %v3666_v14 = vmax.f32 %v3634_v11, 0.0 }
 0x98a   : > { %v3505_v36 = vpop.f32.mrf.mxu2 }
 0x98b   : > { %v3168_v23 = vmax.f32 %v3136_v29, 0.0  ;;  %v3506_v16 = vadd.f32 %v7170_v5, %v3505_v36  ;;  %5231 = vmatmul.msk.f32.vlgmr.msra.gmra.mxu3 %vm3702_vm2, %v3666_v14 }
 0x98c   : > { %v2840_v42 = vpop.f32.mrf.mxu3  ;;  %v3009_v12 = vpop.f32.mrf.mxu0 }
 0x98d   : > { %v2841_v49 = vadd.f32 %v7029_v32, %v2840_v42  ;;  %v3010_v39 = vadd.f32 %v7150_v0, %v3009_v12  ;;  %5168 = vmatmul.msk.f32.gmra.mxu1 %vm3201_vm1, %v3168_v23  ;;  %v3601_v2 = vmul.f32 %v7176_v18, %v3506_v16 }
 0x98f   : > { %v3103_v46 = vmul.f32 %v7155_v31, %v3010_v39  ;;  %5153 = vmatmul.msk.f32.gmra.mxu0 %vm852_vm0, %v2841_v49  ;;  %v3635_v59 = vadd.f32 %v7185_v22, %v3601_v2  ;;  %5217 = vmatmul.msk.f32.gmra.mxu2 %vm852_vm0, %v2841_v49 }
 0x991   : > { %v3137_v7 = vadd.f32 %v7162_v4, %v3103_v46  ;;  %v3667_v55 = vmax.f32 %v3635_v59, 0.0 }
 0x992   : > { %v3508_v24 = vpop.f32.mrf.mxu2 }
 0x993   : > { %v3169_v62 = vmax.f32 %v3137_v7, 0.0  ;;  %v3509_v63 = vadd.f32 %v7170_v5, %v3508_v24  ;;  %5232 = vmatmul.msk.f32.gmra.mxu3 %vm3702_vm2, %v3667_v55 }
 0x994   : > { %v2843_v47 = vpop.f32.mrf.mxu3  ;;  %v3012_v52 = vpop.f32.mrf.mxu0 }
 0x995   : > { %v2844_v56 = vadd.f32 %v7029_v32, %v2843_v47  ;;  %v3013_v6 = vadd.f32 %v7150_v0, %v3012_v52  ;;  %5169 = vmatmul.msk.f32.gmra.mxu1 %vm3201_vm1, %v3169_v62  ;;  %v3602_v10 = vmul.f32 %v7176_v18, %v3509_v63 }
 0x997   : > { %v3104_v60 = vmul.f32 %v7155_v31, %v3013_v6  ;;  %5154 = vmatmul.msk.f32.gmra.mxu0 %vm852_vm0, %v2844_v56  ;;  %v3636_v61 = vadd.f32 %v7185_v22, %v3602_v10  ;;  %5218 = vmatmul.msk.f32.gmra.mxu2 %vm852_vm0, %v2844_v56 }
 0x999   : > { %v3138_v40 = vadd.f32 %v7162_v4, %v3104_v60  ;;  %v3668_v58 = vmax.f32 %v3636_v61, 0.0 }
 0x99a   : > { %v3511_v17 = vpop.f32.mrf.mxu2 }
 0x99b   : > { %v3170_v51 = vmax.f32 %v3138_v40, 0.0  ;;  %v3512_v30 = vadd.f32 %v7170_v5, %v3511_v17  ;;  %5233 = vmatmul.msk.f32.gmra.mxu3 %vm3702_vm2, %v3668_v58 }
 0x99c   : > { %v2846_v45 = vpop.f32.mrf.mxu3  ;;  %v3015_v33 = vpop.f32.mrf.mxu0 }
 0x99d   : > { %v2847_v38 = vadd.f32 %v7029_v32, %v2846_v45  ;;  %v3016_v43 = vadd.f32 %v7150_v0, %v3015_v33  ;;  %5170 = vmatmul.msk.f32.gmra.mxu1 %vm3201_vm1, %v3170_v51  ;;  %v3603_v15 = vmul.f32 %v7176_v18, %v3512_v30 }
 0x99f   : > { %v3105_v48 = vmul.f32 %v7155_v31, %v3016_v43  ;;  %5155 = vmatmul.msk.f32.gmra.mxu0 %vm852_vm0, %v2847_v38  ;;  %v3637_v54 = vadd.f32 %v7185_v22, %v3603_v15  ;;  %5219 = vmatmul.msk.f32.gmra.mxu2 %vm852_vm0, %v2847_v38 }
 0x9a1   : > { %v3139_v53 = vadd.f32 %v7162_v4, %v3105_v48  ;;  %v3669_v35 = vmax.f32 %v3637_v54, 0.0 }
 0x9a2   : > { %v3514_v50 = vpop.f32.mrf.mxu2 }
 0x9a3   : > { %v3171_v44 = vmax.f32 %v3139_v53, 0.0  ;;  %v3515_v19 = vadd.f32 %v7170_v5, %v3514_v50  ;;  %5234 = vmatmul.msk.f32.gmra.mxu3 %vm3702_vm2, %v3669_v35 }
 0x9a4   : > { %v2849_v25 = vpop.f32.mrf.mxu3  ;;  %v3018_v1 = vpop.f32.mrf.mxu0 }
 0x9a5   : > { %v2850_v13 = vadd.f32 %v7029_v32, %v2849_v25  ;;  %v3019_v28 = vadd.f32 %v7150_v0, %v3018_v1  ;;  %5171 = vmatmul.msk.f32.gmra.mxu1 %vm3201_vm1, %v3171_v44  ;;  %v3604_v27 = vmul.f32 %v7176_v18, %v3515_v19 }
 0x9a7   : > { %v3106_v20 = vmul.f32 %v7155_v31, %v3019_v28  ;;  %5156 = vmatmul.msk.f32.gmra.mxu0 %vm852_vm0, %v2850_v13  ;;  %v3638_v21 = vadd.f32 %v7185_v22, %v3604_v27  ;;  %5220 = vmatmul.msk.f32.gmra.mxu2 %vm852_vm0, %v2850_v13 }
 0x9a9   : > { %v3140_v37 = vadd.f32 %v7162_v4, %v3106_v20  ;;  %v3670_v26 = vmax.f32 %v3638_v21, 0.0 }
 0x9aa   : > { %v3517_v41 = vpop.f32.mrf.mxu2 }
 0x9ab   : > { %v3172_v34 = vmax.f32 %v3140_v37, 0.0  ;;  %v3518_v9 = vadd.f32 %v7170_v5, %v3517_v41  ;;  %5235 = vmatmul.msk.f32.gmra.mxu3 %vm3702_vm2, %v3670_v26 }
 0x9ac   : > { %v2852_v57 = vpop.f32.mrf.mxu3  ;;  %v3021_v3 = vpop.f32.mrf.mxu0 }
 0x9ad   : > { %v2853_v8 = vadd.f32 %v7029_v32, %v2852_v57  ;;  %v3022_v11 = vadd.f32 %v7150_v0, %v3021_v3  ;;  %5172 = vmatmul.msk.f32.gmra.mxu1 %vm3201_vm1, %v3172_v34  ;;  %v3605_v29 = vmul.f32 %v7176_v18, %v3518_v9 }
 0x9af   : > { %v3107_v14 = vmul.f32 %v7155_v31, %v3022_v11  ;;  %5157 = vmatmul.msk.f32.gmra.mxu0 %vm852_vm0, %v2853_v8  ;;  %v3639_v36 = vadd.f32 %v7185_v22, %v3605_v29  ;;  %5221 = vmatmul.msk.f32.gmra.mxu2 %vm852_vm0, %v2853_v8 }
 0x9b1   : > { %v3141_v23 = vadd.f32 %v7162_v4, %v3107_v14  ;;  %v3671_v16 = vmax.f32 %v3639_v36, 0.0 }
 0x9b2   : > { %v3520_v42 = vpop.f32.mrf.mxu2 }
 0x9b3   : > { %v3173_v12 = vmax.f32 %v3141_v23, 0.0  ;;  %v3521_v49 = vadd.f32 %v7170_v5, %v3520_v42  ;;  %5236 = vmatmul.msk.f32.gmra.mxu3 %vm3702_vm2, %v3671_v16 }
 0x9b4   : > { %v2855_v39 = vpop.f32.mrf.mxu3  ;;  %v3024_v2 = vpop.f32.mrf.mxu0 }
 0x9b5   : > { %v2856_v46 = vadd.f32 %v7029_v32, %v2855_v39  ;;  %v3025_v59 = vadd.f32 %v7150_v0, %v3024_v2  ;;  %5173 = vmatmul.msk.f32.gmra.mxu1 %vm3201_vm1, %v3173_v12  ;;  %v3606_v7 = vmul.f32 %v7176_v18, %v3521_v49 }
 0x9b7   : > { %v3108_v55 = vmul.f32 %v7155_v31, %v3025_v59  ;;  %5158 = vmatmul.msk.f32.gmra.mxu0 %vm852_vm0, %v2856_v46  ;;  %v3640_v24 = vadd.f32 %v7185_v22, %v3606_v7  ;;  %5222 = vmatmul.msk.f32.gmra.mxu2 %vm852_vm0, %v2856_v46 }
 0x9b9   : > { %v3142_v62 = vadd.f32 %v7162_v4, %v3108_v55  ;;  %v3672_v63 = vmax.f32 %v3640_v24, 0.0 }
 0x9ba   : > { %v3523_v47 = vpop.f32.mrf.mxu2 }
 0x9bb   : > { %v3174_v52 = vmax.f32 %v3142_v62, 0.0  ;;  %v3524_v56 = vadd.f32 %v7170_v5, %v3523_v47  ;;  %5237 = vmatmul.msk.f32.gmra.mxu3 %vm3702_vm2, %v3672_v63 }
 0x9bc   : > { %v2858_v6 = vpop.f32.mrf.mxu3  ;;  %v3027_v10 = vpop.f32.mrf.mxu0 }
 0x9bd   : > { %v2859_v60 = vadd.f32 %v7029_v32, %v2858_v6  ;;  %v3028_v61 = vadd.f32 %v7150_v0, %v3027_v10  ;;  %5174 = vmatmul.msk.f32.gmra.mxu1 %vm3201_vm1, %v3174_v52  ;;  %v3607_v40 = vmul.f32 %v7176_v18, %v3524_v56 }
 0x9bf   : > { %v3109_v58 = vmul.f32 %v7155_v31, %v3028_v61  ;;  %5159 = vmatmul.msk.f32.gmra.mxu0 %vm852_vm0, %v2859_v60  ;;  %v3641_v17 = vadd.f32 %v7185_v22, %v3607_v40  ;;  %5223 = vmatmul.msk.f32.gmra.mxu2 %vm852_vm0, %v2859_v60 }
 0x9c1   : > { %v3143_v51 = vadd.f32 %v7162_v4, %v3109_v58  ;;  %v3673_v30 = vmax.f32 %v3641_v17, 0.0 }
 0x9c2   : > { %v3526_v45 = vpop.f32.mrf.mxu2 }
 0x9c3   : > { %v3175_v33 = vmax.f32 %v3143_v51, 0.0  ;;  %v3527_v38 = vadd.f32 %v7170_v5, %v3526_v45  ;;  %5238 = vmatmul.msk.f32.gmra.mxu3 %vm3702_vm2, %v3673_v30 }
 0x9c4   : > { %v2861_v43 = vpop.f32.mrf.mxu3  ;;  %v3030_v15 = vpop.f32.mrf.mxu0 }
 0x9c5   : > { %v2862_v48 = vadd.f32 %v7029_v32, %v2861_v43  ;;  %v3031_v54 = vadd.f32 %v7150_v0, %v3030_v15  ;;  %5175 = vmatmul.msk.f32.gmra.mxu1 %vm3201_vm1, %v3175_v33  ;;  %v3608_v53 = vmul.f32 %v7176_v18, %v3527_v38  ;;  %v3698_v33 = vld [vmem:[%s8174_s2 + $0x1b8] sm:$0xff] }
 0x9c6   : > { %4023 = vmatpush.msra.mxu0 %v3698_v33 }
 0x9c7   : > { %v3110_v35 = vmul.f32 %v7155_v31, %v3031_v54  ;;  %5160 = vmatmul.msk.f32.gmra.mxu0 %vm852_vm0, %v2862_v48  ;;  %v3642_v50 = vadd.f32 %v7185_v22, %v3608_v53  ;;  %5224 = vmatmul.msk.f32.gmra.mxu2 %vm852_vm0, %v2862_v48 }
 0x9c9   : > { %v3144_v44 = vadd.f32 %v7162_v4, %v3110_v35  ;;  %v3674_v19 = vmax.f32 %v3642_v50, 0.0 }
 0x9ca   : > { %v3529_v25 = vpop.f32.mrf.mxu2 }
 0x9cb   : > { %v3176_v1 = vmax.f32 %v3144_v44, 0.0  ;;  %v3530_v13 = vadd.f32 %v7170_v5, %v3529_v25  ;;  %5239 = vmatmul.msk.f32.gmra.mxu3 %vm3702_vm2, %v3674_v19 }
 0x9cc   : > { %v2864_v28 = vpop.f32.mrf.mxu3  ;;  %v3033_v27 = vpop.f32.mrf.mxu0 }
 0x9cd   : > { %v2865_v20 = vadd.f32 %v7029_v32, %v2864_v28  ;;  %v3034_v21 = vadd.f32 %v7150_v0, %v3033_v27  ;;  %5176 = vmatmul.msk.f32.gmra.mxu1 %vm3201_vm1, %v3176_v1  ;;  %v3609_v37 = vmul.f32 %v7176_v18, %v3530_v13 }
 0x9cf   : > { %v3111_v26 = vmul.f32 %v7155_v31, %v3034_v21  ;;  %5161 = vmatmul.msk.f32.gmra.mxu0 %vm852_vm0, %v2865_v20  ;;  %v3643_v41 = vadd.f32 %v7185_v22, %v3609_v37  ;;  %5225 = vmatmul.msk.f32.gmra.mxu2 %vm852_vm0, %v2865_v20 }
 0x9d1   : > { %v3145_v34 = vadd.f32 %v7162_v4, %v3111_v26  ;;  %v3675_v9 = vmax.f32 %v3643_v41, 0.0 }
 0x9d2   : > { %v3532_v57 = vpop.f32.mrf.mxu2 }
 0x9d3   : > { %v3177_v3 = vmax.f32 %v3145_v34, 0.0  ;;  %v3533_v8 = vadd.f32 %v7170_v5, %v3532_v57  ;;  %5240 = vmatmul.msk.f32.gmra.mxu3 %vm3702_vm2, %v3675_v9 }
 0x9d4   : > { %v2867_v11 = vpop.f32.mrf.mxu3  ;;  %v3036_v29 = vpop.f32.mrf.mxu0 }
 0x9d5   : > { %v2868_v14 = vadd.f32 %v7029_v32, %v2867_v11  ;;  %v3037_v36 = vadd.f32 %v7150_v0, %v3036_v29  ;;  %5177 = vmatmul.msk.f32.gmra.mxu1 %vm3201_vm1, %v3177_v3  ;;  %v3610_v23 = vmul.f32 %v7176_v18, %v3533_v8 }
 0x9d7   : > { %v3112_v16 = vmul.f32 %v7155_v31, %v3037_v36  ;;  %5162 = vmatmul.msk.f32.gmra.mxu0 %vm852_vm0, %v2868_v14  ;;  %v3644_v42 = vadd.f32 %v7185_v22, %v3610_v23  ;;  %5226 = vmatmul.msk.f32.gmra.mxu2 %vm852_vm0, %v2868_v14 }
 0x9d9   : > { %v3146_v12 = vadd.f32 %v7162_v4, %v3112_v16  ;;  %v3676_v49 = vmax.f32 %v3644_v42, 0.0 }
 0x9da   : > { %v3535_v39 = vpop.f32.mrf.mxu2 }
 0x9db   : > { %v3178_v2 = vmax.f32 %v3146_v12, 0.0  ;;  %v3536_v46 = vadd.f32 %v7170_v5, %v3535_v39  ;;  %5241 = vmatmul.msk.f32.gmra.mxu3 %vm3702_vm2, %v3676_v49  ;;  %v7362_v12 = vld [vmem:[%s8174_s2 + $0x18b] ss:$0 sm:$0xff] }
 0x9dc   : > { %v2870_v59 = vpop.f32.mrf.mxu3  ;;  %v3039_v7 = vpop.f32.mrf.mxu0 }
 0x9dd   : > { %v2871_v55 = vadd.f32 %v7029_v32, %v2870_v59  ;;  %v3040_v24 = vadd.f32 %v7150_v0, %v3039_v7  ;;  %5178 = vmatmul.msk.f32.gmra.mxu1 %vm3201_vm1, %v3178_v2  ;;  %v3611_v62 = vmul.f32 %v7176_v18, %v3536_v46  ;;  %v7369_v2 = vld [vmem:[%s8174_s2 + $0x18c] ss:$0 sm:$0xff] }
 0x9df   : > { %v3113_v63 = vmul.f32 %v7155_v31, %v3040_v24  ;;  %5163 = vmatmul.msk.f32.gmra.mxu0 %vm852_vm0, %v2871_v55  ;;  %v3645_v47 = vadd.f32 %v7185_v22, %v3611_v62  ;;  %5227 = vmatmul.msk.f32.gmra.mxu2 %vm852_vm0, %v2871_v55  ;;  %v7375_v62 = vld [vmem:[%s8174_s2 + $0x18d] ss:$0 sm:$0xff] }
 0x9e1   : > { %v3147_v52 = vadd.f32 %v7162_v4, %v3113_v63  ;;  %v3677_v56 = vmax.f32 %v3645_v47, 0.0 }
 0x9e2   : > { %v3538_v6 = vpop.f32.mrf.mxu2 }
 0x9e3   : > { %v3179_v10 = vmax.f32 %v3147_v52, 0.0  ;;  %v3539_v60 = vadd.f32 %v7170_v5, %v3538_v6  ;;  %5242 = vmatmul.msk.f32.gmra.mxu3 %vm3702_vm2, %v3677_v56 }
 0x9e4   : > { %v2873_v61 = vpop.f32.mrf.mxu3  ;;  %v3042_v40 = vpop.f32.mrf.mxu0 }
 0x9e5   : > { %v2874_v58 = vadd.f32 %v7029_v32, %v2873_v61  ;;  %v3043_v17 = vadd.f32 %v7150_v0, %v3042_v40  ;;  %5179 = vmatmul.msk.f32.gmra.mxu1 %vm3201_vm1, %v3179_v10  ;;  %v3612_v51 = vmul.f32 %v7176_v18, %v3539_v60 }
 0x9e7   : > { %v3114_v30 = vmul.f32 %v7155_v31, %v3043_v17  ;;  %5164 = vmatmul.msk.f32.gmra.mxu0 %vm852_vm0, %v2874_v58  ;;  %v3646_v45 = vadd.f32 %v7185_v22, %v3612_v51  ;;  %5228 = vmatmul.msk.f32.gmra.mxu2 %vm852_vm0, %v2874_v58 }
 0x9e9   : > { %v3148_v38 = vadd.f32 %v7162_v4, %v3114_v30  ;;  %v3678_v43 = vmax.f32 %v3646_v45, 0.0 }
 0x9ea   : > { %v3541_v15 = vpop.f32.mrf.mxu2 }
 0x9eb   : > { %v3180_v48 = vmax.f32 %v3148_v38, 0.0  ;;  %v3542_v54 = vadd.f32 %v7170_v5, %v3541_v15  ;;  %5243 = vmatmul.msk.f32.gmra.mxu3 %vm3702_vm2, %v3678_v43 }
 0x9ec   : > { %v2876_v53 = vpop.f32.mrf.mxu3  ;;  %v3045_v35 = vpop.f32.mrf.mxu0 }
 0x9ed   : > { %v2877_v50 = vadd.f32 %v7029_v32, %v2876_v53  ;;  %v3046_v44 = vadd.f32 %v7150_v0, %v3045_v35  ;;  %5180 = vmatmul.msk.f32.gmra.mxu1 %vm3201_vm1, %v3180_v48  ;;  %v3613_v19 = vmul.f32 %v7176_v18, %v3542_v54 }
 0x9ef   : > { %v3115_v25 = vmul.f32 %v7155_v31, %v3046_v44  ;;  %5165 = vmatmul.msk.f32.gmra.mxu0 %vm852_vm0, %v2877_v50  ;;  %v3647_v1 = vadd.f32 %v7185_v22, %v3613_v19  ;;  %5229 = vmatmul.msk.f32.gmra.mxu2 %vm852_vm0, %v2877_v50 }
 0x9f1   : > { %v3149_v13 = vadd.f32 %v7162_v4, %v3115_v25  ;;  %v3679_v28 = vmax.f32 %v3647_v1, 0.0 }
 0x9f2   : > { %v3544_v27 = vpop.f32.mrf.mxu2 }
 0x9f3   : > { %v3181_v20 = vmax.f32 %v3149_v13, 0.0  ;;  %v3545_v21 = vadd.f32 %v7170_v5, %v3544_v27  ;;  %5244 = vmatmul.msk.f32.gmra.mxu3 %vm3702_vm2, %v3679_v28 }
 0x9f4   : > { %v2879_v37 = vpop.f32.mrf.mxu3  ;;  %v3048_v26 = vpop.f32.mrf.mxu0 }
 0x9f5   : > { %v2880_v41 = vadd.f32 %v7029_v32, %v2879_v37  ;;  %v3049_v34 = vadd.f32 %v7150_v0, %v3048_v26  ;;  %5181 = vmatmul.msk.f32.gmra.mxu1 %vm3201_vm1, %v3181_v20  ;;  %v3614_v9 = vmul.f32 %v7176_v18, %v3545_v21 }
 0x9f7   : > { %v3116_v57 = vmul.f32 %v7155_v31, %v3049_v34  ;;  %5166 = vmatmul.msk.f32.gmra.mxu0 %vm852_vm0, %v2880_v41  ;;  %v3648_v3 = vadd.f32 %v7185_v22, %v3614_v9  ;;  %5230 = vmatmul.msk.f32.gmra.mxu2 %vm852_vm0, %v2880_v41 }
 0x9f9   : > { %v3150_v8 = vadd.f32 %v7162_v4, %v3116_v57  ;;  %v3680_v11 = vmax.f32 %v3648_v3, 0.0 }
 0x9fa   : > { %v3547_v29 = vpop.f32.mrf.mxu2 }
 0x9fb   : > { %v3182_v14 = vmax.f32 %v3150_v8, 0.0  ;;  %v3548_v32 = vadd.f32 %v7170_v5, %v3547_v29  ;;  %5245 = vmatmul.msk.f32.gmra.mxu3 %vm3702_vm2, %v3680_v11 }
 0x9fc   : > { %v3051_v36 = vpop.f32.mrf.mxu0 }
 0x9fd   : > { %v3052_v23 = vadd.f32 %v7150_v0, %v3051_v36  ;;  %5182 = vmatmul.msk.f32.gmra.mxu1 %vm3201_vm1, %v3182_v14  ;;  %v3615_v16 = vmul.f32 %v7176_v18, %v3548_v32 }
 0x9ff   : > { %v3117_v42 = vmul.f32 %v7155_v31, %v3052_v23  ;;  %v3649_v49 = vadd.f32 %v7185_v22, %v3615_v16 }
 0xa01   : > { %v3151_v39 = vadd.f32 %v7162_v4, %v3117_v42  ;;  %v3681_v46 = vmax.f32 %v3649_v49, 0.0 }
 0xa02   : > { %v3315_v59 = vpop.f32.mrf.mxu1  ;;  %v3550_v7 = vpop.f32.mrf.mxu2 }
 0xa03   : > { %v3183_v55 = vmax.f32 %v3151_v39, 0.0  ;;  %v3316_v24 = vadd.f32 %v7362_v12, %v3315_v59  ;;  %v3551_v63 = vadd.f32 %v7170_v5, %v3550_v7  ;;  %5246 = vmatmul.msk.f32.gmra.mxu3 %vm3702_vm2, %v3681_v46 }
 0xa04   : > { %v3054_v47 = vpop.f32.mrf.mxu0 }
 0xa05   : > { %v3413_v52 = vmul.f32 %v7369_v2, %v3316_v24  ;;  %v3055_v56 = vadd.f32 %v7150_v0, %v3054_v47  ;;  %5183 = vmatmul.msk.f32.gmra.mxu1 %vm3201_vm1, %v3183_v55  ;;  %v3616_v6 = vmul.f32 %v7176_v18, %v3551_v63 }
 0xa07   : > { %v3447_v10 = vadd.f32 %v7375_v62, %v3413_v52  ;;  %v3118_v60 = vmul.f32 %v7155_v31, %v3055_v56  ;;  %v3650_v61 = vadd.f32 %v7185_v22, %v3616_v6 }
 0xa09   : > { %v3152_v40 = vadd.f32 %v7162_v4, %v3118_v60  ;;  %5263 = vmatmul.msk.f32.vlgmr.msra.gmra.mxu0 %vm3201_vm1, %v3447_v10  ;;  %v3682_v58 = vmax.f32 %v3650_v61, 0.0 }
 0xa0a   : > { %v3318_v17 = vpop.f32.mrf.mxu1  ;;  %v3553_v51 = vpop.f32.mrf.mxu2 }
 0xa0b   : > { %v3184_v30 = vmax.f32 %v3152_v40, 0.0  ;;  %v3319_v45 = vadd.f32 %v7362_v12, %v3318_v17  ;;  %v3554_v33 = vadd.f32 %v7170_v5, %v3553_v51  ;;  %5247 = vmatmul.msk.f32.gmra.mxu3 %vm3702_vm2, %v3682_v58 }
 0xa0c   : > { %v3057_v38 = vpop.f32.mrf.mxu0 }
 0xa0d   : > { %v3414_v43 = vmul.f32 %v7369_v2, %v3319_v45  ;;  %v3058_v15 = vadd.f32 %v7150_v0, %v3057_v38  ;;  %5184 = vmatmul.msk.f32.gmra.mxu1 %vm3201_vm1, %v3184_v30  ;;  %v3617_v48 = vmul.f32 %v7176_v18, %v3554_v33 }
 0xa0f   : > { %v3448_v54 = vadd.f32 %v7375_v62, %v3414_v43  ;;  %v3119_v53 = vmul.f32 %v7155_v31, %v3058_v15  ;;  %v3651_v35 = vadd.f32 %v7185_v22, %v3617_v48 }
 0xa11   : > { %v3153_v50 = vadd.f32 %v7162_v4, %v3119_v53  ;;  %5264 = vmatmul.msk.f32.gmra.mxu0 %vm3201_vm1, %v3448_v54  ;;  %v3683_v44 = vmax.f32 %v3651_v35, 0.0 }
 0xa12   : > { %v3321_v19 = vpop.f32.mrf.mxu1  ;;  %v3556_v25 = vpop.f32.mrf.mxu2 }
 0xa13   : > { %v3185_v1 = vmax.f32 %v3153_v50, 0.0  ;;  %v3322_v13 = vadd.f32 %v7362_v12, %v3321_v19  ;;  %v3557_v28 = vadd.f32 %v7170_v5, %v3556_v25  ;;  %5248 = vmatmul.msk.f32.gmra.mxu3 %vm3702_vm2, %v3683_v44 }
 0xa14   : > { %v3060_v27 = vpop.f32.mrf.mxu0 }
 0xa15   : > { %v3415_v20 = vmul.f32 %v7369_v2, %v3322_v13  ;;  %v3061_v21 = vadd.f32 %v7150_v0, %v3060_v27  ;;  %5185 = vmatmul.msk.f32.gmra.mxu1 %vm3201_vm1, %v3185_v1  ;;  %v3618_v37 = vmul.f32 %v7176_v18, %v3557_v28 }
 0xa17   : > { %v3449_v26 = vadd.f32 %v7375_v62, %v3415_v20  ;;  %v3120_v41 = vmul.f32 %v7155_v31, %v3061_v21  ;;  %v3652_v34 = vadd.f32 %v7185_v22, %v3618_v37 }
 0xa19   : > { %v3154_v9 = vadd.f32 %v7162_v4, %v3120_v41  ;;  %5265 = vmatmul.msk.f32.gmra.mxu0 %vm3201_vm1, %v3449_v26  ;;  %v3684_v57 = vmax.f32 %v3652_v34, 0.0 }
 0xa1a   : > { %v3324_v3 = vpop.f32.mrf.mxu1  ;;  %v3559_v8 = vpop.f32.mrf.mxu2 }
 0xa1b   : > { %v3186_v11 = vmax.f32 %v3154_v9, 0.0  ;;  %v3325_v29 = vadd.f32 %v7362_v12, %v3324_v3  ;;  %v3560_v14 = vadd.f32 %v7170_v5, %v3559_v8  ;;  %5249 = vmatmul.msk.f32.gmra.mxu3 %vm3702_vm2, %v3684_v57 }
 0xa1c   : > { %v3063_v32 = vpop.f32.mrf.mxu0 }
 0xa1d   : > { %v3416_v36 = vmul.f32 %v7369_v2, %v3325_v29  ;;  %v3064_v23 = vadd.f32 %v7150_v0, %v3063_v32  ;;  %5186 = vmatmul.msk.f32.gmra.mxu1 %vm3201_vm1, %v3186_v11  ;;  %v3619_v16 = vmul.f32 %v7176_v18, %v3560_v14 }
 0xa1f   : > { %v3450_v42 = vadd.f32 %v7375_v62, %v3416_v36  ;;  %v3121_v49 = vmul.f32 %v7155_v31, %v3064_v23  ;;  %v3653_v39 = vadd.f32 %v7185_v22, %v3619_v16 }
 0xa21   : > { %v3155_v46 = vadd.f32 %v7162_v4, %v3121_v49  ;;  %5266 = vmatmul.msk.f32.gmra.mxu0 %vm3201_vm1, %v3450_v42  ;;  %v3685_v59 = vmax.f32 %v3653_v39, 0.0  ;;  %v7466_v42 = vpop.f32.mrf.mxu3 }
 0xa22   : > { %v3327_v7 = vpop.f32.mrf.mxu1  ;;  %v3562_v55 = vpop.f32.mrf.mxu2 }
 0xa23   : > { %v3187_v24 = vmax.f32 %v3155_v46, 0.0  ;;  %v3328_v63 = vadd.f32 %v7362_v12, %v3327_v7  ;;  %v3563_v47 = vadd.f32 %v7170_v5, %v3562_v55  ;;  %5250 = vmatmul.msk.f32.gmra.mxu3 %vm3702_vm2, %v3685_v59 }
 0xa24   : > { %v3066_v52 = vpop.f32.mrf.mxu0 }
 0xa25   : > { %v3417_v56 = vmul.f32 %v7369_v2, %v3328_v63  ;;  %v3067_v6 = vadd.f32 %v7150_v0, %v3066_v52  ;;  %5187 = vmatmul.msk.f32.gmra.mxu1 %vm3201_vm1, %v3187_v24  ;;  %v3620_v10 = vmul.f32 %v7176_v18, %v3563_v47 }
 0xa27   : > { %v3451_v60 = vadd.f32 %v7375_v62, %v3417_v56  ;;  %v3122_v61 = vmul.f32 %v7155_v31, %v3067_v6  ;;  %v3654_v40 = vadd.f32 %v7185_v22, %v3620_v10 }
 0xa29   : > { %v3156_v58 = vadd.f32 %v7162_v4, %v3122_v61  ;;  %5267 = vmatmul.msk.f32.gmra.mxu0 %vm3201_vm1, %v3451_v60  ;;  %v3686_v17 = vmax.f32 %v3654_v40, 0.0 }
 0xa2a   : > { %v3330_v51 = vpop.f32.mrf.mxu1  ;;  %v3565_v30 = vpop.f32.mrf.mxu2 }
 0xa2b   : > { %v3188_v45 = vmax.f32 %v3156_v58, 0.0  ;;  %v3331_v33 = vadd.f32 %v7362_v12, %v3330_v51  ;;  %v3566_v38 = vadd.f32 %v7170_v5, %v3565_v30  ;;  %5251 = vmatmul.msk.f32.gmra.mxu3 %vm3702_vm2, %v3686_v17  ;;  %v7483_v17 = vpop.f32.mrf.mxu3 }
 0xa2c   : > { %v3069_v43 = vpop.f32.mrf.mxu0 }
 0xa2d   : > { %v3418_v15 = vmul.f32 %v7369_v2, %v3331_v33  ;;  %v3070_v48 = vadd.f32 %v7150_v0, %v3069_v43  ;;  %5188 = vmatmul.msk.f32.gmra.mxu1 %vm3201_vm1, %v3188_v45  ;;  %v3621_v54 = vmul.f32 %v7176_v18, %v3566_v38 }
 0xa2f   : > { %v3452_v53 = vadd.f32 %v7375_v62, %v3418_v15  ;;  %v3123_v35 = vmul.f32 %v7155_v31, %v3070_v48  ;;  %v3655_v50 = vadd.f32 %v7185_v22, %v3621_v54 }
 0xa31   : > { %v3157_v44 = vadd.f32 %v7162_v4, %v3123_v35  ;;  %5268 = vmatmul.msk.f32.gmra.mxu0 %vm3201_vm1, %v3452_v53  ;;  %v3687_v19 = vmax.f32 %v3655_v50, 0.0 }
 0xa32   : > { %v3333_v25 = vpop.f32.mrf.mxu1  ;;  %v3568_v1 = vpop.f32.mrf.mxu2 }
 0xa33   : > { %v3189_v13 = vmax.f32 %v3157_v44, 0.0  ;;  %v3334_v28 = vadd.f32 %v7362_v12, %v3333_v25  ;;  %v3569_v27 = vadd.f32 %v7170_v5, %v3568_v1  ;;  %5252 = vmatmul.msk.f32.gmra.mxu3 %vm3702_vm2, %v3687_v19 }
 0xa34   : > { %v3072_v20 = vpop.f32.mrf.mxu0 }
 0xa35   : > { %v3419_v21 = vmul.f32 %v7369_v2, %v3334_v28  ;;  %v3073_v37 = vadd.f32 %v7150_v0, %v3072_v20  ;;  %5189 = vmatmul.msk.f32.gmra.mxu1 %vm3201_vm1, %v3189_v13  ;;  %v3622_v26 = vmul.f32 %v7176_v18, %v3569_v27  ;;  %v7500_v13 = vpop.f32.mrf.mxu3 }
 0xa37   : > { %v3453_v41 = vadd.f32 %v7375_v62, %v3419_v21  ;;  %v3124_v34 = vmul.f32 %v7155_v31, %v3073_v37  ;;  %v3656_v9 = vadd.f32 %v7185_v22, %v3622_v26 }
 0xa39   : > { %v3158_v57 = vadd.f32 %v7162_v4, %v3124_v34  ;;  %5269 = vmatmul.msk.f32.gmra.mxu0 %vm3201_vm1, %v3453_v41  ;;  %v3688_v3 = vmax.f32 %v3656_v9, 0.0 }
 0xa3a   : > { %v3336_v8 = vpop.f32.mrf.mxu1  ;;  %v3571_v11 = vpop.f32.mrf.mxu2 }
 0xa3b   : > { %v3190_v29 = vmax.f32 %v3158_v57, 0.0  ;;  %v3337_v14 = vadd.f32 %v7362_v12, %v3336_v8  ;;  %v3572_v32 = vadd.f32 %v7170_v5, %v3571_v11  ;;  %5253 = vmatmul.msk.f32.gmra.mxu3 %vm3702_vm2, %v3688_v3 }
 0xa3c   : > { %v3075_v36 = vpop.f32.mrf.mxu0 }
 0xa3d   : > { %v3420_v23 = vmul.f32 %v7369_v2, %v3337_v14  ;;  %v3076_v16 = vadd.f32 %v7150_v0, %v3075_v36  ;;  %5190 = vmatmul.msk.f32.gmra.mxu1 %vm3201_vm1, %v3190_v29  ;;  %v3623_v49 = vmul.f32 %v7176_v18, %v3572_v32 }
 0xa3f   : > { %v3454_v39 = vadd.f32 %v7375_v62, %v3420_v23  ;;  %v3125_v46 = vmul.f32 %v7155_v31, %v3076_v16  ;;  %v3657_v59 = vadd.f32 %v7185_v22, %v3623_v49  ;;  %v7515_v49 = vpop.f32.mrf.mxu3 }
 0xa41   : > { %v3159_v7 = vadd.f32 %v7162_v4, %v3125_v46  ;;  %5270 = vmatmul.msk.f32.gmra.mxu0 %vm3201_vm1, %v3454_v39  ;;  %v3689_v55 = vmax.f32 %v3657_v59, 0.0 }
 0xa42   : > { %v3339_v24 = vpop.f32.mrf.mxu1  ;;  %v3574_v63 = vpop.f32.mrf.mxu2 }
 0xa43   : > { %v3191_v47 = vmax.f32 %v3159_v7, 0.0  ;;  %v3340_v52 = vadd.f32 %v7362_v12, %v3339_v24  ;;  %v3575_v56 = vadd.f32 %v7170_v5, %v3574_v63  ;;  %5254 = vmatmul.msk.f32.gmra.mxu3 %vm3702_vm2, %v3689_v55 }
 0xa44   : > { %v3078_v6 = vpop.f32.mrf.mxu0 }
 0xa45   : > { %v3421_v10 = vmul.f32 %v7369_v2, %v3340_v52  ;;  %v3079_v60 = vadd.f32 %v7150_v0, %v3078_v6  ;;  %5191 = vmatmul.msk.f32.gmra.mxu1 %vm3201_vm1, %v3191_v47  ;;  %v3624_v61 = vmul.f32 %v7176_v18, %v3575_v56 }
 0xa47   : > { %v3455_v40 = vadd.f32 %v7375_v62, %v3421_v10  ;;  %v3126_v58 = vmul.f32 %v7155_v31, %v3079_v60  ;;  %v3658_v51 = vadd.f32 %v7185_v22, %v3624_v61 }
 0xa49   : > { %v3160_v30 = vadd.f32 %v7162_v4, %v3126_v58  ;;  %5271 = vmatmul.msk.f32.gmra.mxu0 %vm3201_vm1, %v3455_v40  ;;  %v3690_v45 = vmax.f32 %v3658_v51, 0.0 }
 0xa4a   : > { %v3342_v33 = vpop.f32.mrf.mxu1  ;;  %v3577_v38 = vpop.f32.mrf.mxu2 }
 0xa4b   : > { %v3192_v43 = vmax.f32 %v3160_v30, 0.0  ;;  %v3343_v15 = vadd.f32 %v7362_v12, %v3342_v33  ;;  %v3578_v48 = vadd.f32 %v7170_v5, %v3577_v38  ;;  %5255 = vmatmul.msk.f32.gmra.mxu3 %vm3702_vm2, %v3690_v45  ;;  %v7534_v45 = vpop.f32.mrf.mxu3 }
 0xa4c   : > { %v3081_v54 = vpop.f32.mrf.mxu0 }
 0xa4d   : > { %v3422_v53 = vmul.f32 %v7369_v2, %v3343_v15  ;;  %v3082_v35 = vadd.f32 %v7150_v0, %v3081_v54  ;;  %5192 = vmatmul.msk.f32.gmra.mxu1 %vm3201_vm1, %v3192_v43  ;;  %v3625_v50 = vmul.f32 %v7176_v18, %v3578_v48 }
 0xa4f   : > { %v3456_v44 = vadd.f32 %v7375_v62, %v3422_v53  ;;  %v3127_v19 = vmul.f32 %v7155_v31, %v3082_v35  ;;  %v3659_v25 = vadd.f32 %v7185_v22, %v3625_v50 }
 0xa51   : > { %v3161_v1 = vadd.f32 %v7162_v4, %v3127_v19  ;;  %5272 = vmatmul.msk.f32.gmra.mxu0 %vm3201_vm1, %v3456_v44  ;;  %v3691_v28 = vmax.f32 %v3659_v25, 0.0 }
 0xa52   : > { %v3345_v27 = vpop.f32.mrf.mxu1  ;;  %v3580_v20 = vpop.f32.mrf.mxu2 }
 0xa53   : > { %v3193_v21 = vmax.f32 %v3161_v1, 0.0  ;;  %v3346_v37 = vadd.f32 %v7362_v12, %v3345_v27  ;;  %v3581_v26 = vadd.f32 %v7170_v5, %v3580_v20  ;;  %5256 = vmatmul.msk.f32.gmra.mxu3 %vm3702_vm2, %v3691_v28 }
 0xa54   : > { %v3084_v41 = vpop.f32.mrf.mxu0 }
 0xa55   : > { %v3423_v34 = vmul.f32 %v7369_v2, %v3346_v37  ;;  %v3085_v9 = vadd.f32 %v7150_v0, %v3084_v41  ;;  %5193 = vmatmul.msk.f32.gmra.mxu1 %vm3201_vm1, %v3193_v21  ;;  %v3626_v57 = vmul.f32 %v7176_v18, %v3581_v26  ;;  %v7551_v37 = vpop.f32.mrf.mxu3 }
 0xa57   : > { %v3457_v3 = vadd.f32 %v7375_v62, %v3423_v34  ;;  %v3128_v8 = vmul.f32 %v7155_v31, %v3085_v9  ;;  %v3660_v11 = vadd.f32 %v7185_v22, %v3626_v57 }
 0xa59   : > { %v3162_v29 = vadd.f32 %v7162_v4, %v3128_v8  ;;  %5273 = vmatmul.msk.f32.gmra.mxu0 %vm3201_vm1, %v3457_v3  ;;  %v3692_v14 = vmax.f32 %v3660_v11, 0.0  ;;  %v5611_v11 = vld [vmem:[%s8174_s2 + $0x1b1] ss:$0 sm:$0xff] }
 0xa5a   : > { %v3348_v32 = vpop.f32.mrf.mxu1  ;;  %v3583_v36 = vpop.f32.mrf.mxu2 }
 0xa5b   : > { %v3194_v23 = vmax.f32 %v3162_v29, 0.0  ;;  %v3349_v16 = vadd.f32 %v7362_v12, %v3348_v32  ;;  %v3584_v39 = vadd.f32 %v7170_v5, %v3583_v36  ;;  %5257 = vmatmul.msk.f32.gmra.mxu3 %vm3702_vm2, %v3692_v14  ;;  %v5612_v32 = vld [vmem:[%s8174_s2 + $0x189] ss:$0 sm:$0xff] }
 0xa5c   : > { %v3087_v46 = vpop.f32.mrf.mxu0 }
 0xa5d   : > { %v3424_v59 = vmul.f32 %v7369_v2, %v3349_v16  ;;  %v3088_v7 = vadd.f32 %v7150_v0, %v3087_v46  ;;  %5194 = vmatmul.msk.f32.gmra.mxu1 %vm3201_vm1, %v3194_v23  ;;  %v3627_v55 = vmul.f32 %v7176_v18, %v3584_v39  ;;  %v5613_v23 = vld [vmem:[%s8174_s2 + $0x1b2] ss:$0 sm:$0xff]  ;;  %v5614_v39 = vld [vmem:[%s8174_s2 + $0x18a] ss:$0 sm:$0xff] }
 0xa5f   : > { %v3458_v24 = vadd.f32 %v7375_v62, %v3424_v59  ;;  %v3129_v63 = vmul.f32 %v7155_v31, %v3088_v7  ;;  %v3661_v47 = vadd.f32 %v7185_v22, %v3627_v55  ;;  %v7580_v59 = vpop.f32.mrf.mxu3 }
 0xa61   : > { %v3163_v52 = vadd.f32 %v7162_v4, %v3129_v63  ;;  %5274 = vmatmul.msk.f32.gmra.mxu0 %vm3201_vm1, %v3458_v24  ;;  %v3693_v56 = vmax.f32 %v3661_v47, 0.0 }
 0xa62   : > { %v3351_v6 = vpop.f32.mrf.mxu1  ;;  %v3586_v10 = vpop.f32.mrf.mxu2 }
 0xa63   : > { %v3195_v60 = vmax.f32 %v3163_v52, 0.0  ;;  %v3352_v61 = vadd.f32 %v7362_v12, %v3351_v6  ;;  %v3587_v40 = vadd.f32 %v7170_v5, %v3586_v10  ;;  %5258 = vmatmul.msk.f32.gmra.mxu3 %vm3702_vm2, %v3693_v56 }
 0xa64   : > { %v3090_v58 = vpop.f32.mrf.mxu0 }
 0xa65   : > { %v3425_v51 = vmul.f32 %v7369_v2, %v3352_v61  ;;  %v3091_v30 = vadd.f32 %v7150_v0, %v3090_v58  ;;  %5195 = vmatmul.msk.f32.gmra.mxu1 %vm3201_vm1, %v3195_v60  ;;  %v3628_v33 = vmul.f32 %v7176_v18, %v3587_v40 }
 0xa67   : > { %v3459_v38 = vadd.f32 %v7375_v62, %v3425_v51  ;;  %v3130_v43 = vmul.f32 %v7155_v31, %v3091_v30  ;;  %v3662_v15 = vadd.f32 %v7185_v22, %v3628_v33  ;;  %v7589_v51 = vpop.f32.mrf.mxu3  ;;  %v7596_v33 = vld [vmem:[%s8174_s2 + $0x1d0] ss:$0 sm:$0xff] }
 0xa69   : > { %v3164_v48 = vadd.f32 %v7162_v4, %v3130_v43  ;;  %5275 = vmatmul.msk.f32.gmra.mxu0 %vm3201_vm1, %v3459_v38  ;;  %v3694_v54 = vmax.f32 %v3662_v15, 0.0 }
 0xa6a   : > { %v3354_v53 = vpop.f32.mrf.mxu1  ;;  %v3589_v35 = vpop.f32.mrf.mxu2 }
 0xa6b   : > { %v3196_v50 = vmax.f32 %v3164_v48, 0.0  ;;  %v3355_v44 = vadd.f32 %v7362_v12, %v3354_v53  ;;  %v3590_v19 = vadd.f32 %v7170_v5, %v3589_v35  ;;  %5259 = vmatmul.msk.f32.gmra.mxu3 %vm3702_vm2, %v3694_v54 }
 0xa6c   : > { %v3093_v25 = vpop.f32.mrf.mxu0 }
 0xa6d   : > { %v3426_v1 = vmul.f32 %v7369_v2, %v3355_v44  ;;  %v3094_v28 = vadd.f32 %v7150_v0, %v3093_v25  ;;  %5196 = vmatmul.msk.f32.gmra.mxu1 %vm3201_vm1, %v3196_v50  ;;  %v3629_v27 = vmul.f32 %v7176_v18, %v3590_v19  ;;  %v5609_v18 = vld [vmem:[%s8174_s2 + $0x1b0] ss:$0 sm:$0xff] }
 0xa6f   : > { %v3460_v20 = vadd.f32 %v7375_v62, %v3426_v1  ;;  %v3131_v21 = vmul.f32 %v7155_v31, %v3094_v28  ;;  %v3663_v26 = vadd.f32 %v7185_v22, %v3629_v27 }
 0xa71   : > { %v3165_v5 = vadd.f32 %v7162_v4, %v3131_v21  ;;  %5276 = vmatmul.msk.f32.gmra.mxu0 %vm3201_vm1, %v3460_v20  ;;  %v3695_v41 = vmax.f32 %v3663_v26, 0.0  ;;  %v5610_v4 = vld [vmem:[%s8174_s2 + $0x188] ss:$0 sm:$0xff] }
 0xa72   : > { %v3357_v34 = vpop.f32.mrf.mxu1  ;;  %v3592_v9 = vpop.f32.mrf.mxu2 }
 0xa73   : > { %v3197_v0 = vmax.f32 %v3165_v5, 0.0  ;;  %v3358_v57 = vadd.f32 %v7362_v12, %v3357_v34  ;;  %v3593_v3 = vadd.f32 %v5609_v18, %v3592_v9  ;;  %5260 = vmatmul.msk.f32.gmra.mxu3 %vm3702_vm2, %v3695_v41 }
 0xa74   : > { %v3096_v31 = vpop.f32.mrf.mxu0 }
 0xa75   : > { %v3427_v22 = vmul.f32 %v7369_v2, %v3358_v57  ;;  %v3097_v8 = vadd.f32 %v5610_v4, %v3096_v31  ;;  %5197 = vmatmul.msk.f32.gmra.mxu1 %vm3201_vm1, %v3197_v0  ;;  %v3630_v29 = vmul.f32 %v5611_v11, %v3593_v3  ;;  %v7622_v31 = vpop.f32.mrf.mxu3 }
 0xa77   : > { %v3461_v14 = vadd.f32 %v7375_v62, %v3427_v22  ;;  %v3132_v36 = vmul.f32 %v5612_v32, %v3097_v8  ;;  %v3664_v16 = vadd.f32 %v5613_v23, %v3630_v29  ;;  %v8200_v32 = vld [vmem:[#allocation2_spill] sm:$0xff] }
 0xa78   : > { %vm4698_vm3 = vcmp.ge.s32.totalorder %v8200_v32, 10  ;;  %vm4699_vm4 = vcmp.lt.s32.totalorder %v8200_v32, 20  ;;  %vm4701_vm5 = vcmp.ge.s32.totalorder %v8200_v32, 20  ;;  %vm4702_vm6 = vcmp.lt.s32.totalorder %v8200_v32, 30 }
 0xa79   : > { %v3166_v46 = vadd.f32 %v5614_v39, %v3132_v36  ;;  %5277 = vmatmul.msk.f32.gmra.mxu0 %vm3201_vm1, %v3461_v14  ;;  %v3696_v7 = vmax.f32 %v3664_v16, 0.0  ;;  %vm7639_vm8 = vmand %vm4701_vm5, %vm4702_vm6 }
 0xa7a   : > { %v3360_v55 = vpop.f32.mrf.mxu1  ;;  %v3595_v24 = vpop.f32.mrf.mxu2  ;;  %vm7650_vm9 = vmand %vm4698_vm3, %vm4699_vm4 }
 0xa7b   : > { %v3198_v63 = vmax.f32 %v3166_v46, 0.0  ;;  %v3361_v47 = vadd.f32 %v7362_v12, %v3360_v55  ;;  %v3596_v52 = vadd.f32 %v5609_v18, %v3595_v24  ;;  %5261 = vmatmul.msk.f32.gmra.mxu3 %vm3702_vm2, %v3696_v7 }
 0xa7d   : > { %v3428_v56 = vmul.f32 %v7369_v2, %v3361_v47  ;;  %5198 = vmatmul.msk.f32.gmra.mxu1 %vm3201_vm1, %v3198_v63  ;;  %v3631_v6 = vmul.f32 %v5611_v11, %v3596_v52 }
 0xa7f   : > { %v3462_v10 = vadd.f32 %v7375_v62, %v3428_v56  ;;  %v3665_v60 = vadd.f32 %v5613_v23, %v3631_v6 }
 0xa81   : > { %5278 = vmatmul.msk.f32.gmra.mxu0 %vm3201_vm1, %v3462_v10  ;;  %v3697_v61 = vmax.f32 %v3665_v60, 0.0 }
 0xa82   : > { %v3363_v40 = vpop.f32.mrf.mxu1 }
 0xa83   : > { %v3364_v58 = vadd.f32 %v7362_v12, %v3363_v40  ;;  %5262 = vmatmul.msk.f32.gmra.mxu3 %vm3702_vm2, %v3697_v61  ;;  %v7644_v40 = vpop.f32.mrf.mxu3 }
 0xa85   : > { %v3429_v30 = vmul.f32 %v7369_v2, %v3364_v58 }
 0xa86   : > { %v4025_v38 = vpop.f32.mrf.mxu0 }
 0xa87   : > { %v3463_v43 = vadd.f32 %v7375_v62, %v3429_v30  ;;  %v4026_v15 = vadd.f32 %v4025_v38, %v7466_v42 }
 0xa89   : > { %v7601_v48 = vadd.f32 %v7596_v33, %v4026_v15  ;;  %5279 = vmatmul.msk.f32.gmra.mxu0 %vm3201_vm1, %v3463_v43 }
 0xa8a   : > { %v3366_v54 = vpop.f32.mrf.mxu1 }
 0xa8b   : > { %v4250_v53 = vand.u32 2147483647, %v7601_v48  ;;  %v3367_v35 = vadd.f32 %v7362_v12, %v3366_v54  ;;  %v4218_v6 = vmax.f32 %v7601_v48, 0.0 }
 0xa8d   : > { %v4282_v50 = vsub.f32 0.0, %v4250_v53  ;;  %v3430_v44 = vmul.f32 %v7369_v2, %v3367_v35 }
 0xa8e   : > { %v4028_v19 = vpop.f32.mrf.mxu0 }
 0xa8f   : > { %v4314_v25 = vmul.f32 1.442695, %v4282_v50  ;;  %v3464_v1 = vadd.f32 %v7375_v62, %v3430_v44  ;;  %v4029_v28 = vadd.f32 %v4028_v19, %v7483_v17 }
 0xa91   : > { %5353 = vpow2.f32 %v4314_v25  ;;  %v7610_v42 = vadd.f32 %v7596_v33, %v4029_v28  ;;  %5280 = vmatmul.msk.f32.gmra.mxu0 %vm3201_vm1, %v3464_v1 }
 0xa92   : > { %v3369_v27 = vpop.f32.mrf.mxu1 }
 0xa93   : > { %v4251_v20 = vand.u32 2147483647, %v7610_v42  ;;  %v3370_v21 = vadd.f32 %v7362_v12, %v3369_v27 }
 0xa95   : > { %v4283_v26 = vsub.f32 0.0, %v4251_v20  ;;  %v3431_v5 = vmul.f32 %v7369_v2, %v3370_v21 }
 0xa96   : > { %v4031_v41 = vpop.f32.mrf.mxu0 }
 0xa97   : > { %v5354_v34 = vpop.eup %5353  ;;  %v4316_v9 = vmul.f32 1.442695, %v4283_v26  ;;  %v3465_v0 = vadd.f32 %v7375_v62, %v3431_v5  ;;  %v4032_v17 = vadd.f32 %v4031_v41, %v7500_v13 }
 0xa98   : > { %v4378_v57 = vadd.f32 1.0, %v5354_v34  ;;  %v4381_v18 = vmul.f32 -0.5, %v5354_v34  ;;  %v4384_v14 = vand.u32 2147483647, %v5354_v34 }
 0xa99   : > { %5355 = vpow2.f32 %v4316_v9  ;;  %v7619_v3 = vadd.f32 %v7596_v33, %v4032_v17  ;;  %5281 = vmatmul.msk.f32.gmra.mxu0 %vm3201_vm1, %v3465_v0  ;;  %v4219_v9 = vmax.f32 %v7610_v42, 0.0 }
 0xa9a   : > { %5357 = vlog2.f32 %v4378_v57  ;;  %v3372_v22 = vpop.f32.mrf.mxu1  ;;  %v4382_v11 = vadd.f32 1.0, %v4381_v18  ;;  %vm4385_vm7 = vcmp.lt.f32.partialorder %v4384_v14, 0.0004427343 }
 0xa9b   : > { %v4252_v4 = vand.u32 2147483647, %v7619_v3  ;;  %v3373_v8 = vadd.f32 %v7362_v12, %v3372_v22  ;;  %5359 = vtanh.f32 %v7601_v48 }
 0xa9c   : > { %v4383_v55 = vmul.f32 %v5354_v34, %v4382_v11  ;;  %v7681_v11 = vpop.f32.mrf.mxu3 }
 0xa9d   : > { %v4284_v13 = vsub.f32 0.0, %v4252_v4  ;;  %v3432_v29 = vmul.f32 %v7369_v2, %v3373_v8 }
 0xa9e   : > { %v4034_v36 = vpop.f32.mrf.mxu0 }
 0xa9f   : > { %v5356_v23 = vpop.eup %5355  ;;  %v4318_v16 = vmul.f32 1.442695, %v4284_v13  ;;  %v3466_v39 = vadd.f32 %v7375_v62, %v3432_v29  ;;  %v4035_v46 = vadd.f32 %v4034_v36, %v7515_v49 }
 0xaa0   : > { %v5358_v7 = vpop.eup %5357  ;;  %v4387_v24 = vadd.f32 1.0, %v5356_v23  ;;  %v4390_v47 = vmul.f32 -0.5, %v5356_v23  ;;  %v4393_v35 = vand.u32 2147483647, %v5356_v23 }
 0xaa1   : > { %v4380_v63 = vmul.f32 0.6931472, %v5358_v7  ;;  %5361 = vpow2.f32 %v4318_v16  ;;  %v7635_v52 = vadd.f32 %v7596_v33, %v4035_v46  ;;  %5282 = vmatmul.msk.f32.gmra.mxu0 %vm3201_vm1, %v3466_v39  ;;  %v5360_v56 = vpop.eup %5359 }
 0xaa2   : > { %5363 = vlog2.f32 %v4387_v24  ;;  %v3375_v49 = vpop.f32.mrf.mxu1  ;;  %v4186_v43 = vmul.f32 180.0, %v5360_v56  ;;  %v4391_v15 = vadd.f32 1.0, %v4390_v47  ;;  %vm4394_vm10 = vcmp.lt.f32.partialorder %v4393_v35, 0.0004427343 }
 0xaa3   : > { %v4386_v10 = vsel %vm4385_vm7, %v4383_v55, %v4380_v63  ;;  %v4253_v61 = vand.u32 2147483647, %v7635_v52  ;;  %5365 = vtanh.f32 %v7610_v42  ;;  %v3376_v38 = vadd.f32 %v7362_v12, %v3375_v49 }
 0xaa4   : > { %v4666_v58 = vadd.f32 %v4386_v10, %v4218_v6  ;;  %v4220_v6 = vmax.f32 %v7619_v3, 0.0 }
 0xaa5   : > { %v4285_v54 = vsub.f32 0.0, %v4253_v61  ;;  %v3433_v50 = vmul.f32 %v7369_v2, %v3376_v38 }
 0xaa6   : > { %v4704_v53 = vsel %vm7639_vm8, %v4666_v58, %v7601_v48  ;;  %v4037_v44 = vpop.f32.mrf.mxu0  ;;  %v4392_v48 = vmul.f32 %v5356_v23, %v4391_v15 }
 0xaa7   : > { %v5362_v19 = vpop.eup %5361  ;;  %v4736_v25 = vsel %vm7650_vm9, %v4186_v43, %v4704_v53  ;;  %v4320_v1 = vmul.f32 1.442695, %v4285_v54  ;;  %v4038_v28 = vadd.f32 %v4037_v44, %v7534_v45  ;;  %v3467_v26 = vadd.f32 %v7375_v62, %v3433_v50 }
 0xaa8   : > { %v5364_v27 = vpop.eup %5363  ;;  %4768 = vst.msk [vmem:[%s7661_s22] sm:$0xff] %vm852_vm0, %v4736_v25  ;;  %v4396_v20 = vadd.f32 1.0, %v5362_v19  ;;  %v4399_v21 = vmul.f32 -0.5, %v5362_v19  ;;  %v4402_v29 = vand.u32 2147483647, %v5362_v19 }
 0xaa9   : > { %v4389_v5 = vmul.f32 0.6931472, %v5364_v27  ;;  %5367 = vpow2.f32 %v4320_v1  ;;  %v7674_v41 = vadd.f32 %v7596_v33, %v4038_v28  ;;  %v5366_v34 = vpop.eup %5365  ;;  %5283 = vmatmul.msk.f32.gmra.mxu0 %vm3201_vm1, %v3467_v26  ;;  %v7708_v28 = vpop.f32.mrf.mxu3 }
 0xaaa   : > { %5369 = vlog2.f32 %v4396_v20  ;;  %v3378_v45 = vpop.f32.mrf.mxu1  ;;  %v4400_v18 = vadd.f32 1.0, %v4399_v21  ;;  %v4187_v4 = vmul.f32 180.0, %v5366_v34  ;;  %vm4403_vm11 = vcmp.lt.f32.partialorder %v4402_v29, 0.0004427343 }
 0xaab   : > { %v4395_v0 = vsel %vm4394_vm10, %v4392_v48, %v4389_v5  ;;  %v4254_v17 = vand.u32 2147483647, %v7674_v41  ;;  %5371 = vtanh.f32 %v7619_v3  ;;  %v3379_v22 = vadd.f32 %v7362_v12, %v3378_v45 }
 0xaac   : > { %v4667_v57 = vadd.f32 %v4395_v0, %v4219_v9  ;;  %v4401_v7 = vmul.f32 %v5362_v19, %v4400_v18  ;;  %v4221_v9 = vmax.f32 %v7635_v52, 0.0 }
 0xaad   : > { %v4286_v8 = vsub.f32 0.0, %v4254_v17  ;;  %v3434_v14 = vmul.f32 %v7369_v2, %v3379_v22 }
 0xaae   : > { %v4705_v13 = vsel %vm7639_vm8, %v4667_v57, %v7610_v42  ;;  %v4040_v32 = vpop.f32.mrf.mxu0 }
 0xaaf   : > { %v5368_v36 = vpop.eup %5367  ;;  %v4737_v23 = vsel %vm7650_vm9, %v4187_v4, %v4705_v13  ;;  %v4322_v16 = vmul.f32 1.442695, %v4286_v8  ;;  %v4041_v39 = vadd.f32 %v4040_v32, %v7551_v37  ;;  %v3468_v24 = vadd.f32 %v7375_v62, %v3434_v14 }
 0xab0   : > { %v5370_v46 = vpop.eup %5369  ;;  %4769 = vst.msk [vmem:[%s7661_s22 + $0x8] sm:$0xff] %vm852_vm0, %v4737_v23  ;;  %v4405_v55 = vadd.f32 1.0, %v5368_v36  ;;  %v4408_v42 = vmul.f32 -0.5, %v5368_v36  ;;  %v4411_v53 = vand.u32 2147483647, %v5368_v36 }
 0xab1   : > { %v4398_v63 = vmul.f32 0.6931472, %v5370_v46  ;;  %5373 = vpow2.f32 %v4322_v16  ;;  %v7694_v47 = vadd.f32 %v7596_v33, %v4041_v39  ;;  %v5372_v56 = vpop.eup %5371  ;;  %5284 = vmatmul.msk.f32.gmra.mxu0 %vm3201_vm1, %v3468_v24 }
 0xab2   : > { %5375 = vlog2.f32 %v4405_v55  ;;  %v3381_v37 = vpop.f32.mrf.mxu1  ;;  %v4188_v38 = vmul.f32 180.0, %v5372_v56  ;;  %v4409_v43 = vadd.f32 1.0, %v4408_v42  ;;  %vm4412_vm12 = vcmp.lt.f32.partialorder %v4411_v53, 0.0004427343  ;;  %v7734_v42 = vpop.f32.mrf.mxu3 }
 0xab3   : > { %v4404_v49 = vsel %vm4403_vm11, %v4401_v7, %v4398_v63  ;;  %v4255_v10 = vand.u32 2147483647, %v7694_v47  ;;  %5377 = vtanh.f32 %v7635_v52  ;;  %v3382_v58 = vadd.f32 %v7362_v12, %v3381_v37 }
 0xab4   : > { %v4668_v61 = vadd.f32 %v4404_v49, %v4220_v6  ;;  %v4410_v5 = vmul.f32 %v5368_v36, %v4409_v43  ;;  %v4222_v6 = vmax.f32 %v7674_v41, 0.0 }
 0xab5   : > { %v4287_v15 = vsub.f32 0.0, %v4255_v10  ;;  %v3435_v35 = vmul.f32 %v7369_v2, %v3382_v58 }
 0xab6   : > { %v4706_v54 = vsel %vm7639_vm8, %v4668_v61, %v7619_v3  ;;  %v4043_v50 = vpop.f32.mrf.mxu0 }
 0xab7   : > { %v5374_v44 = vpop.eup %5373  ;;  %v4738_v19 = vsel %vm7650_vm9, %v4188_v38, %v4706_v54  ;;  %v4324_v25 = vmul.f32 1.442695, %v4287_v15  ;;  %v4044_v1 = vadd.f32 %v4043_v50, %v7580_v59  ;;  %v3469_v3 = vadd.f32 %v7375_v62, %v3435_v35 }
 0xab8   : > { %v5376_v27 = vpop.eup %5375  ;;  %4770 = vst.msk [vmem:[%s7661_s22 + $0x10] sm:$0xff] %vm852_vm0, %v4738_v19  ;;  %v4414_v20 = vadd.f32 1.0, %v5374_v44  ;;  %v4417_v21 = vmul.f32 -0.5, %v5374_v44  ;;  %v4420_v13 = vand.u32 2147483647, %v5374_v44 }
 0xab9   : > { %v4407_v26 = vmul.f32 0.6931472, %v5376_v27  ;;  %5379 = vpow2.f32 %v4324_v25  ;;  %v7714_v48 = vadd.f32 %v7596_v33, %v4044_v1  ;;  %v5378_v34 = vpop.eup %5377  ;;  %5285 = vmatmul.msk.f32.gmra.mxu0 %vm3201_vm1, %v3469_v3 }
 0xaba   : > { %5381 = vlog2.f32 %v4414_v20  ;;  %v3384_v59 = vpop.f32.mrf.mxu1  ;;  %v4418_v57 = vadd.f32 1.0, %v4417_v21  ;;  %v4189_v22 = vmul.f32 180.0, %v5378_v34  ;;  %vm4421_vm13 = vcmp.lt.f32.partialorder %v4420_v13, 0.0004427343 }
 0xabb   : > { %v4413_v45 = vsel %vm4412_vm12, %v4410_v5, %v4407_v26  ;;  %v4256_v0 = vand.u32 2147483647, %v7714_v48  ;;  %5383 = vtanh.f32 %v7674_v41  ;;  %v3385_v18 = vadd.f32 %v7362_v12, %v3384_v59 }
 0xabc   : > { %v4669_v17 = vadd.f32 %v4413_v45, %v4221_v9  ;;  %v4419_v46 = vmul.f32 %v5374_v44, %v4418_v57  ;;  %v4223_v26 = vmax.f32 %v7694_v47, 0.0  ;;  %v7757_v9 = vpop.f32.mrf.mxu3  ;;  %v7763_v45 = vld [vmem:[%s8174_s2 + $0x18b] ss:$0 sm:$0xff] }
 0xabd   : > { %v4288_v4 = vsub.f32 0.0, %v4256_v0  ;;  %v3436_v29 = vmul.f32 %v7369_v2, %v3385_v18 }
 0xabe   : > { %v4707_v8 = vsel %vm7639_vm8, %v4669_v17, %v7635_v52  ;;  %v4046_v14 = vpop.f32.mrf.mxu0 }
 0xabf   : > { %v5380_v32 = vpop.eup %5379  ;;  %v4739_v36 = vsel %vm7650_vm9, %v4189_v22, %v4707_v8  ;;  %v4326_v23 = vmul.f32 1.442695, %v4288_v4  ;;  %v4047_v16 = vadd.f32 %v4046_v14, %v7589_v51  ;;  %v3470_v55 = vadd.f32 %v7375_v62, %v3436_v29  ;;  %v7772_v4 = vld [vmem:[%s8174_s2 + $0x18c] ss:$0 sm:$0xff] }
 0xac0   : > { %v5382_v39 = vpop.eup %5381  ;;  %4771 = vst.msk [vmem:[%s7661_s22 + $0x18] sm:$0xff] %vm852_vm0, %v4739_v36  ;;  %v4423_v7 = vadd.f32 1.0, %v5380_v32  ;;  %v4426_v52 = vmul.f32 -0.5, %v5380_v32  ;;  %v4429_v54 = vand.u32 2147483647, %v5380_v32 }
 0xac1   : > { %v4416_v24 = vmul.f32 0.6931472, %v5382_v39  ;;  %5385 = vpow2.f32 %v4326_v23  ;;  %v7732_v63 = vadd.f32 %v7596_v33, %v4047_v16  ;;  %v5384_v56 = vpop.eup %5383  ;;  %5286 = vmatmul.msk.f32.gmra.mxu0 %vm3201_vm1, %v3470_v55  ;;  %v7783_v39 = vld [vmem:[%s8174_s2 + $0x18d] ss:$0 sm:$0xff] }
 0xac2   : > { %5387 = vlog2.f32 %v4423_v7  ;;  %v3387_v51 = vpop.f32.mrf.mxu1  ;;  %v4190_v58 = vmul.f32 180.0, %v5384_v56  ;;  %v4427_v38 = vadd.f32 1.0, %v4426_v52  ;;  %vm4430_vm14 = vcmp.lt.f32.partialorder %v4429_v54, 0.0004427343 }
 0xac3   : > { %v4422_v37 = vsel %vm4421_vm13, %v4419_v46, %v4416_v24  ;;  %v4257_v49 = vand.u32 2147483647, %v7732_v63  ;;  %5389 = vtanh.f32 %v7694_v47  ;;  %v3388_v61 = vadd.f32 %v7362_v12, %v3387_v51 }
 0xac4   : > { %v4670_v10 = vadd.f32 %v4422_v37, %v4222_v6 }
 0xac5   : > { %v4289_v43 = vsub.f32 0.0, %v4257_v49  ;;  %v3437_v53 = vmul.f32 %v7369_v2, %v3388_v61 }
 0xac6   : > { %v4708_v15 = vsel %vm7639_vm8, %v4670_v10, %v7674_v41  ;;  %v4049_v35 = vpop.f32.mrf.mxu0  ;;  %v4428_v41 = vmul.f32 %v5380_v32, %v4427_v38  ;;  %v7794_v38 = vpop.f32.mrf.mxu3 }
 0xac7   : > { %v5386_v50 = vpop.eup %5385  ;;  %v4740_v44 = vsel %vm7650_vm9, %v4190_v58, %v4708_v15  ;;  %v4328_v19 = vmul.f32 1.442695, %v4289_v43  ;;  %v4050_v25 = vadd.f32 %v4049_v35, %v7622_v31  ;;  %v3471_v20 = vadd.f32 %v7375_v62, %v3437_v53 }
 0xac8   : > { %v5388_v1 = vpop.eup %5387  ;;  %4772 = vst.msk [vmem:[%s7661_s22 + $0x20] sm:$0xff] %vm852_vm0, %v4740_v44  ;;  %v4432_v12 = vadd.f32 1.0, %v5386_v50  ;;  %v4435_v27 = vmul.f32 -0.5, %v5386_v50  ;;  %v4438_v22 = vand.u32 2147483647, %v5386_v50 }
 0xac9   : > { %v4425_v21 = vmul.f32 0.6931472, %v5388_v1  ;;  %5391 = vpow2.f32 %v4328_v19  ;;  %v7752_v2 = vadd.f32 %v7596_v33, %v4050_v25  ;;  %v5390_v3 = vpop.eup %5389  ;;  %5287 = vmatmul.msk.f32.gmra.mxu0 %vm3201_vm1, %v3471_v20 }
 0xaca   : > { %5393 = vlog2.f32 %v4432_v12  ;;  %v3390_v31 = vpop.f32.mrf.mxu1  ;;  %v4436_v59 = vadd.f32 1.0, %v4435_v27  ;;  %v4191_v17 = vmul.f32 180.0, %v5390_v3  ;;  %vm4439_vm15 = vcmp.lt.f32.partialorder %v4438_v22, 0.0004427343 }
 0xacb   : > { %v4431_v5 = vsel %vm4430_vm14, %v4428_v41, %v4425_v21  ;;  %v4258_v34 = vand.u32 2147483647, %v7752_v2  ;;  %5395 = vtanh.f32 %v7714_v48  ;;  %v3391_v0 = vadd.f32 %v7763_v45, %v3390_v31 }
 0xacc   : > { %v4671_v62 = vadd.f32 %v4431_v5, %v4223_v26  ;;  %v4225_v3 = vmax.f32 %v7732_v63, 0.0 }
 0xacd   : > { %v4290_v57 = vsub.f32 0.0, %v4258_v34  ;;  %v3438_v8 = vmul.f32 %v7772_v4, %v3391_v0 }
 0xace   : > { %v4709_v18 = vsel %vm7639_vm8, %v4671_v62, %v7694_v47  ;;  %v4052_v13 = vpop.f32.mrf.mxu0  ;;  %v4437_v47 = vmul.f32 %v5386_v50, %v4436_v59 }
 0xacf   : > { %v5392_v29 = vpop.eup %5391  ;;  %v4741_v14 = vsel %vm7650_vm9, %v4191_v17, %v4709_v18  ;;  %v4330_v32 = vmul.f32 1.442695, %v4290_v57  ;;  %v4053_v36 = vadd.f32 %v4052_v13, %v7644_v40  ;;  %v3472_v46 = vadd.f32 %v7783_v39, %v3438_v8 }
 0xad0   : > { %v5394_v23 = vpop.eup %5393  ;;  %4773 = vst.msk [vmem:[%s7661_s22 + $0x28] sm:$0xff] %vm852_vm0, %v4741_v14  ;;  %v4441_v16 = vadd.f32 1.0, %v5392_v29  ;;  %v4444_v55 = vmul.f32 -0.5, %v5392_v29  ;;  %v4224_v40 = vmax.f32 %v7714_v48, 0.0  ;;  %v4447_v15 = vand.u32 2147483647, %v5392_v29 }
 0xad1   : > { %v4434_v7 = vmul.f32 0.6931472, %v5394_v23  ;;  %5397 = vpow2.f32 %v4330_v32  ;;  %v7787_v24 = vadd.f32 %v7596_v33, %v4053_v36  ;;  %v5396_v52 = vpop.eup %5395  ;;  %5288 = vmatmul.msk.f32.gmra.mxu0 %vm3201_vm1, %v3472_v46  ;;  %v7821_v32 = vpop.f32.mrf.mxu3 }
 0xad2   : > { %5399 = vlog2.f32 %v4441_v16  ;;  %v3393_v56 = vpop.f32.mrf.mxu1  ;;  %v4192_v10 = vmul.f32 180.0, %v5396_v52  ;;  %v4445_v61 = vadd.f32 1.0, %v4444_v55  ;;  %vm4448_vm2 = vcmp.lt.f32.partialorder %v4447_v15, 0.0004427343 }
 0xad3   : > { %v4440_v6 = vsel %vm4439_vm15, %v4437_v47, %v4434_v7  ;;  %v4259_v51 = vand.u32 2147483647, %v7787_v24  ;;  %5401 = vtanh.f32 %v7732_v63  ;;  %v3394_v49 = vadd.f32 %v7763_v45, %v3393_v56 }
 0xad4   : > { %v4672_v37 = vadd.f32 %v4440_v6, %v4224_v40  ;;  %v4226_v52 = vmax.f32 %v7752_v2, 0.0 }
 0xad5   : > { %v4291_v58 = vsub.f32 0.0, %v4259_v51  ;;  %v3439_v54 = vmul.f32 %v7772_v4, %v3394_v49 }
 0xad6   : > { %v4710_v43 = vsel %vm7639_vm8, %v4672_v37, %v7714_v48  ;;  %v4055_v53 = vpop.f32.mrf.mxu0  ;;  %v4446_v48 = vmul.f32 %v5392_v29, %v4445_v61 }
 0xad7   : > { %v5398_v35 = vpop.eup %5397  ;;  %v4742_v50 = vsel %vm7650_vm9, %v4192_v10, %v4710_v43  ;;  %v4332_v44 = vmul.f32 1.442695, %v4291_v58  ;;  %v4056_v19 = vadd.f32 %v4055_v53, %v7681_v11  ;;  %v3473_v27 = vadd.f32 %v7783_v39, %v3439_v54 }
 0xad8   : > { %v5400_v25 = vpop.eup %5399  ;;  %4774 = vst.msk [vmem:[%s7661_s22 + $0x30] sm:$0xff] %vm852_vm0, %v4742_v50  ;;  %v4450_v1 = vadd.f32 1.0, %v5398_v35  ;;  %v4453_v12 = vmul.f32 -0.5, %v5398_v35  ;;  %v4456_v57 = vand.u32 2147483647, %v5398_v35 }
 0xad9   : > { %v4443_v20 = vmul.f32 0.6931472, %v5400_v25  ;;  %5403 = vpow2.f32 %v4332_v44  ;;  %v7807_v21 = vadd.f32 %v7596_v33, %v4056_v19  ;;  %v5402_v41 = vpop.eup %5401  ;;  %5289 = vmatmul.msk.f32.gmra.mxu0 %vm3201_vm1, %v3473_v27 }
 0xada   : > { %5405 = vlog2.f32 %v4450_v1  ;;  %v3396_v11 = vpop.f32.mrf.mxu1  ;;  %v4454_v34 = vadd.f32 1.0, %v4453_v12  ;;  %v4193_v59 = vmul.f32 180.0, %v5402_v41  ;;  %vm4457_vm3 = vcmp.lt.f32.partialorder %v4456_v57, 0.0004427343 }
 0xadb   : > { %v4449_v26 = vsel %vm4448_vm2, %v4446_v48, %v4443_v20  ;;  %v4260_v31 = vand.u32 2147483647, %v7807_v21  ;;  %5407 = vtanh.f32 %v7752_v2  ;;  %v3397_v62 = vadd.f32 %v7763_v45, %v3396_v11  ;;  %v7847_v20 = vpop.f32.mrf.mxu3 }
 0xadc   : > { %v4673_v5 = vadd.f32 %v4449_v26, %v4225_v3  ;;  %v4455_v23 = vmul.f32 %v5398_v35, %v4454_v34  ;;  %v4227_v41 = vmax.f32 %v7787_v24, 0.0 }
 0xadd   : > { %v4292_v0 = vsub.f32 0.0, %v4260_v31  ;;  %v3440_v18 = vmul.f32 %v7772_v4, %v3397_v62 }
 0xade   : > { %v4711_v17 = vsel %vm7639_vm8, %v4673_v5, %v7732_v63  ;;  %v4058_v22 = vpop.f32.mrf.mxu0 }
 0xadf   : > { %v5404_v8 = vpop.eup %5403  ;;  %v4743_v13 = vsel %vm7650_vm9, %v4193_v59, %v4711_v17  ;;  %v4334_v29 = vmul.f32 1.442695, %v4292_v0  ;;  %v4059_v14 = vadd.f32 %v4058_v22, %v7708_v28  ;;  %v3474_v63 = vadd.f32 %v7783_v39, %v3440_v18 }
 0xae0   : > { %v5406_v36 = vpop.eup %5405  ;;  %4775 = vst.msk [vmem:[%s7661_s22 + $0x38] sm:$0xff] %vm852_vm0, %v4743_v13  ;;  %v4459_v47 = vadd.f32 1.0, %v5404_v8  ;;  %v4462_v46 = vmul.f32 -0.5, %v5404_v8  ;;  %v4465_v58 = vand.u32 2147483647, %v5404_v8 }
 0xae1   : > { %v4452_v16 = vmul.f32 0.6931472, %v5406_v36  ;;  %5409 = vpow2.f32 %v4334_v29  ;;  %v7827_v7 = vadd.f32 %v7596_v33, %v4059_v14  ;;  %v5408_v55 = vpop.eup %5407  ;;  %5290 = vmatmul.msk.f32.gmra.mxu0 %vm3201_vm1, %v3474_v63 }
 0xae2   : > { %5411 = vlog2.f32 %v4459_v47  ;;  %v3399_v28 = vpop.f32.mrf.mxu1  ;;  %v4194_v37 = vmul.f32 180.0, %v5408_v55  ;;  %v4463_v49 = vadd.f32 1.0, %v4462_v46  ;;  %vm4466_vm4 = vcmp.lt.f32.partialorder %v4465_v58, 0.0004427343 }
 0xae3   : > { %v4458_v40 = vsel %vm4457_vm3, %v4455_v23, %v4452_v16  ;;  %v4261_v56 = vand.u32 2147483647, %v7827_v7  ;;  %5413 = vtanh.f32 %v7787_v24  ;;  %v3400_v51 = vadd.f32 %v7763_v45, %v3399_v28  ;;  %v7870_v28 = vpop.f32.mrf.mxu3 }
 0xae4   : > { %v4674_v6 = vadd.f32 %v4458_v40, %v4226_v52  ;;  %v4228_v46 = vmax.f32 %v7807_v21, 0.0 }
 0xae5   : > { %v4293_v10 = vsub.f32 0.0, %v4261_v56  ;;  %v3441_v43 = vmul.f32 %v7772_v4, %v3400_v51 }
 0xae6   : > { %v4712_v61 = vsel %vm7639_vm8, %v4674_v6, %v7752_v2  ;;  %v4061_v15 = vpop.f32.mrf.mxu0  ;;  %v4464_v2 = vmul.f32 %v5404_v8, %v4463_v49 }
 0xae7   : > { %v5410_v54 = vpop.eup %5409  ;;  %v4744_v53 = vsel %vm7650_vm9, %v4194_v37, %v4712_v61  ;;  %v4336_v35 = vmul.f32 1.442695, %v4293_v10  ;;  %v4062_v50 = vadd.f32 %v4061_v15, %v7734_v42  ;;  %v3475_v1 = vadd.f32 %v7783_v39, %v3441_v43 }
 0xae8   : > { %v5412_v44 = vpop.eup %5411  ;;  %4776 = vst.msk [vmem:[%s7661_s22 + $0x40] sm:$0xff] %vm852_vm0, %v4744_v53  ;;  %v4468_v19 = vadd.f32 1.0, %v5410_v54  ;;  %v4471_v25 = vmul.f32 -0.5, %v5410_v54  ;;  %v4474_v0 = vand.u32 2147483647, %v5410_v54 }
 0xae9   : > { %v4461_v12 = vmul.f32 0.6931472, %v5412_v44  ;;  %5415 = vpow2.f32 %v4336_v35  ;;  %v7845_v27 = vadd.f32 %v7596_v33, %v4062_v50  ;;  %v5414_v48 = vpop.eup %5413  ;;  %5291 = vmatmul.msk.f32.gmra.mxu0 %vm3201_vm1, %v3475_v1 }
 0xaea   : > { %5417 = vlog2.f32 %v4468_v19  ;;  %v3402_v42 = vpop.f32.mrf.mxu1  ;;  %v4472_v31 = vadd.f32 1.0, %v4471_v25  ;;  %v4195_v34 = vmul.f32 180.0, %v5414_v48  ;;  %vm4475_vm5 = vcmp.lt.f32.partialorder %v4474_v0, 0.0004427343 }
 0xaeb   : > { %v4467_v3 = vsel %vm4466_vm4, %v4464_v2, %v4461_v12  ;;  %v4262_v11 = vand.u32 2147483647, %v7845_v27  ;;  %5419 = vtanh.f32 %v7807_v21  ;;  %v3403_v5 = vadd.f32 %v7763_v45, %v3402_v42 }
 0xaec   : > { %v4675_v26 = vadd.f32 %v4467_v3, %v4227_v41  ;;  %v4473_v14 = vmul.f32 %v5410_v54, %v4472_v31  ;;  %v4229_v2 = vmax.f32 %v7827_v7, 0.0 }
 0xaed   : > { %v4294_v62 = vsub.f32 0.0, %v4262_v11  ;;  %v3442_v17 = vmul.f32 %v7772_v4, %v3403_v5  ;;  %v7892_v5 = vpop.f32.mrf.mxu3 }
 0xaee   : > { %v4713_v59 = vsel %vm7639_vm8, %v4675_v26, %v7787_v24  ;;  %v4064_v57 = vpop.f32.mrf.mxu0 }
 0xaef   : > { %v5416_v18 = vpop.eup %5415  ;;  %v4745_v22 = vsel %vm7650_vm9, %v4195_v34, %v4713_v59  ;;  %v4338_v8 = vmul.f32 1.442695, %v4294_v62  ;;  %v4065_v13 = vadd.f32 %v4064_v57, %v7757_v9  ;;  %v3476_v23 = vadd.f32 %v7783_v39, %v3442_v17 }
 0xaf0   : > { %v5418_v29 = vpop.eup %5417  ;;  %4777 = vst.msk [vmem:[%s7661_s22 + $0x48] sm:$0xff] %vm852_vm0, %v4745_v22  ;;  %v4477_v36 = vadd.f32 1.0, %v5416_v18  ;;  %v4480_v24 = vmul.f32 -0.5, %v5416_v18  ;;  %v4483_v10 = vand.u32 2147483647, %v5416_v18 }
 0xaf1   : > { %v4470_v47 = vmul.f32 0.6931472, %v5418_v29  ;;  %5421 = vpow2.f32 %v4338_v8  ;;  %v7865_v63 = vadd.f32 %v7596_v33, %v4065_v13  ;;  %v5420_v16 = vpop.eup %5419  ;;  %5292 = vmatmul.msk.f32.gmra.mxu0 %vm3201_vm1, %v3476_v23  ;;  %v4230_v23 = vmax.f32 %v7845_v27, 0.0 }
 0xaf2   : > { %5423 = vlog2.f32 %v4477_v36  ;;  %v3405_v9 = vpop.f32.mrf.mxu1  ;;  %v4196_v6 = vmul.f32 180.0, %v5420_v16  ;;  %v4481_v51 = vadd.f32 1.0, %v4480_v24  ;;  %vm4484_vm6 = vcmp.lt.f32.partialorder %v4483_v10, 0.0004427343 }
 0xaf3   : > { %v4476_v55 = vsel %vm4475_vm5, %v4473_v14, %v4470_v47  ;;  %v4263_v52 = vand.u32 2147483647, %v7865_v63  ;;  %5425 = vtanh.f32 %v7827_v7  ;;  %v3406_v56 = vadd.f32 %v7763_v45, %v3405_v9 }
 0xaf4   : > { %v4676_v40 = vadd.f32 %v4476_v55, %v4228_v46 }
 0xaf5   : > { %v4295_v37 = vsub.f32 0.0, %v4263_v52  ;;  %v3443_v61 = vmul.f32 %v7772_v4, %v3406_v56 }
 0xaf6   : > { %v4714_v49 = vsel %vm7639_vm8, %v4676_v40, %v7807_v21  ;;  %v4067_v58 = vpop.f32.mrf.mxu0  ;;  %v4482_v21 = vmul.f32 %v5416_v18, %v4481_v51 }
 0xaf7   : > { %v5422_v43 = vpop.eup %5421  ;;  %v4746_v15 = vsel %vm7650_vm9, %v4196_v6, %v4714_v49  ;;  %v4340_v54 = vmul.f32 1.442695, %v4295_v37  ;;  %v4068_v53 = vadd.f32 %v4067_v58, %v7794_v38  ;;  %v3477_v19 = vadd.f32 %v7783_v39, %v3443_v61  ;;  %v7917_v37 = vpop.f32.mrf.mxu3 }
 0xaf8   : > { %v5424_v35 = vpop.eup %5423  ;;  %4778 = vst.msk [vmem:[%s7661_s22 + $0x50] sm:$0xff] %vm852_vm0, %v4746_v15  ;;  %v4486_v50 = vadd.f32 1.0, %v5422_v43  ;;  %v4489_v44 = vmul.f32 -0.5, %v5422_v43  ;;  %v4492_v62 = vand.u32 2147483647, %v5422_v43 }
 0xaf9   : > { %v4479_v25 = vmul.f32 0.6931472, %v5424_v35  ;;  %5427 = vpow2.f32 %v4340_v54  ;;  %v7885_v1 = vadd.f32 %v7596_v33, %v4068_v53  ;;  %v5426_v12 = vpop.eup %5425  ;;  %5293 = vmatmul.msk.f32.gmra.mxu0 %vm3201_vm1, %v3477_v19  ;;  %v4231_v54 = vmax.f32 %v7865_v63, 0.0 }
 0xafa   : > { %5429 = vlog2.f32 %v4486_v50  ;;  %v3408_v38 = vpop.f32.mrf.mxu1  ;;  %v4490_v3 = vadd.f32 1.0, %v4489_v44  ;;  %v4197_v26 = vmul.f32 180.0, %v5426_v12  ;;  %vm4493_vm7 = vcmp.lt.f32.partialorder %v4492_v62, 0.0004427343 }
 0xafb   : > { %v4485_v48 = vsel %vm4484_vm6, %v4482_v21, %v4479_v25  ;;  %v4264_v41 = vand.u32 2147483647, %v7885_v1  ;;  %5431 = vtanh.f32 %v7845_v27  ;;  %v3409_v11 = vadd.f32 %v7763_v45, %v3408_v38 }
 0xafc   : > { %v4677_v42 = vadd.f32 %v4485_v48, %v4229_v2  ;;  %v4491_v8 = vmul.f32 %v5422_v43, %v4490_v3 }
 0xafd   : > { %v4296_v31 = vsub.f32 0.0, %v4264_v41  ;;  %v3444_v59 = vmul.f32 %v7772_v4, %v3409_v11 }
 0xafe   : > { %v4715_v34 = vsel %vm7639_vm8, %v4677_v42, %v7827_v7  ;;  %v4070_v0 = vpop.f32.mrf.mxu0 }
 0xaff   : > { %v5428_v17 = vpop.eup %5427  ;;  %v4747_v57 = vsel %vm7650_vm9, %v4197_v26, %v4715_v34  ;;  %v4342_v18 = vmul.f32 1.442695, %v4296_v31  ;;  %v4071_v22 = vadd.f32 %v4070_v0, %v7821_v32  ;;  %v3478_v29 = vadd.f32 %v7783_v39, %v3444_v59 }
 0xb00   : > { %v5430_v45 = vpop.eup %5429  ;;  %4779 = vst.msk [vmem:[%s7661_s22 + $0x58] sm:$0xff] %vm852_vm0, %v4747_v57  ;;  %v4495_v13 = vadd.f32 1.0, %v5428_v17  ;;  %v4498_v7 = vmul.f32 -0.5, %v5428_v17  ;;  %v4501_v55 = vand.u32 2147483647, %v5428_v17  ;;  %v4232_v59 = vmax.f32 %v7885_v1, 0.0 }
 0xb01   : > { %v4488_v14 = vmul.f32 0.6931472, %v5430_v45  ;;  %5433 = vpow2.f32 %v4342_v18  ;;  %v7905_v4 = vadd.f32 %v7596_v33, %v4071_v22  ;;  %v5432_v36 = vpop.eup %5431  ;;  %5294 = vmatmul.msk.f32.gmra.mxu0 %vm3201_vm1, %v3478_v29 }
 0xb02   : > { %5435 = vlog2.f32 %v4495_v13  ;;  %v4198_v39 = vmul.f32 180.0, %v5432_v36  ;;  %v4499_v16 = vadd.f32 1.0, %v4498_v7  ;;  %vm4502_vm1 = vcmp.lt.f32.partialorder %v4501_v55, 0.0004427343 }
 0xb03   : > { %v4494_v32 = vsel %vm4493_vm7, %v4491_v8, %v4488_v14  ;;  %v4265_v47 = vand.u32 2147483647, %v7905_v4  ;;  %5437 = vtanh.f32 %v7865_v63 }
 0xb04   : > { %v4678_v24 = vadd.f32 %v4494_v32, %v4230_v23  ;;  %v4500_v43 = vmul.f32 %v5428_v17, %v4499_v16 }
 0xb05   : > { %v4297_v46 = vsub.f32 0.0, %v4265_v47 }
 0xb06   : > { %v4716_v9 = vsel %vm7639_vm8, %v4678_v24, %v7845_v27  ;;  %v4073_v52 = vpop.f32.mrf.mxu0 }
 0xb07   : > { %v5434_v40 = vpop.eup %5433  ;;  %v4748_v56 = vsel %vm7650_vm9, %v4198_v39, %v4716_v9  ;;  %v4344_v6 = vmul.f32 1.442695, %v4297_v46  ;;  %v4074_v51 = vadd.f32 %v4073_v52, %v7847_v20  ;;  %v4233_v46 = vmax.f32 %v7905_v4, 0.0 }
 0xb08   : > { %v5436_v49 = vpop.eup %5435  ;;  %4780 = vst.msk [vmem:[%s7661_s22 + $0x60] sm:$0xff] %vm852_vm0, %v4748_v56  ;;  %v4504_v10 = vadd.f32 1.0, %v5434_v40  ;;  %v4507_v61 = vmul.f32 -0.5, %v5434_v40  ;;  %v4510_v21 = vand.u32 2147483647, %v5434_v40 }
 0xb09   : > { %v4497_v58 = vmul.f32 0.6931472, %v5436_v49  ;;  %5439 = vpow2.f32 %v4344_v6  ;;  %v7922_v27 = vadd.f32 %v7596_v33, %v4074_v51  ;;  %v5438_v15 = vpop.eup %5437 }
 0xb0a   : > { %5441 = vlog2.f32 %v4504_v10  ;;  %v4508_v50 = vadd.f32 1.0, %v4507_v61  ;;  %v4199_v44 = vmul.f32 180.0, %v5438_v15  ;;  %vm4511_vm10 = vcmp.lt.f32.partialorder %v4510_v21, 0.0004427343 }
 0xb0b   : > { %v4503_v20 = vsel %vm4502_vm1, %v4500_v43, %v4497_v58  ;;  %v4266_v53 = vand.u32 2147483647, %v7922_v27  ;;  %5443 = vtanh.f32 %v7885_v1 }
 0xb0c   : > { %v4679_v35 = vadd.f32 %v4503_v20, %v4231_v54  ;;  %v4509_v3 = vmul.f32 %v5434_v40, %v4508_v50 }
 0xb0d   : > { %v4298_v19 = vsub.f32 0.0, %v4266_v53 }
 0xb0e   : > { %v4717_v25 = vsel %vm7639_vm8, %v4679_v35, %v7865_v63  ;;  %v4076_v12 = vpop.f32.mrf.mxu0  ;;  %v7938_v63 = vpop.f32.mrf.mxu3 }
 0xb0f   : > { %v5440_v2 = vpop.eup %5439  ;;  %v4749_v38 = vsel %vm7650_vm9, %v4199_v44, %v4717_v25  ;;  %v4346_v48 = vmul.f32 1.442695, %v4298_v19  ;;  %v4077_v41 = vadd.f32 %v4076_v12, %v7870_v28  ;;  %v4234_v19 = vmax.f32 %v7922_v27, 0.0 }
 0xb10   : > { %v5442_v42 = vpop.eup %5441  ;;  %4781 = vst.msk [vmem:[%s7661_s22 + $0x68] sm:$0xff] %vm852_vm0, %v4749_v38  ;;  %v4513_v11 = vadd.f32 1.0, %v5440_v2  ;;  %v4516_v31 = vmul.f32 -0.5, %v5440_v2  ;;  %v4519_v45 = vand.u32 2147483647, %v5440_v2 }
 0xb11   : > { %v4506_v26 = vmul.f32 0.6931472, %v5442_v42  ;;  %5445 = vpow2.f32 %v4346_v48  ;;  %v7936_v34 = vadd.f32 %v7596_v33, %v4077_v41  ;;  %v5444_v62 = vpop.eup %5443 }
 0xb12   : > { %5447 = vlog2.f32 %v4513_v11  ;;  %v4200_v57 = vmul.f32 180.0, %v5444_v62  ;;  %v4517_v18 = vadd.f32 1.0, %v4516_v31  ;;  %vm4520_vm11 = vcmp.lt.f32.partialorder %v4519_v45, 0.0004427343 }
 0xb13   : > { %v4512_v28 = vsel %vm4511_vm10, %v4509_v3, %v4506_v26  ;;  %v4267_v0 = vand.u32 2147483647, %v7936_v34  ;;  %5449 = vtanh.f32 %v7905_v4 }
 0xb14   : > { %v4680_v17 = vadd.f32 %v4512_v28, %v4232_v59  ;;  %v4518_v24 = vmul.f32 %v5440_v2, %v4517_v18 }
 0xb15   : > { %v4299_v22 = vsub.f32 0.0, %v4267_v0 }
 0xb16   : > { %v4718_v33 = vsel %vm7639_vm8, %v4680_v17, %v7885_v1  ;;  %v4079_v8 = vpop.f32.mrf.mxu0  ;;  %v7954_v1 = vld [vmem:[%s8174_s2 + $0x1d0] ss:$0 sm:$0xff]  ;;  %v7961_v55 = vpop.f32.mrf.mxu3 }
 0xb17   : > { %v5446_v13 = vpop.eup %5445  ;;  %v4750_v29 = vsel %vm7650_vm9, %v4200_v57, %v4718_v33  ;;  %v4348_v14 = vmul.f32 1.442695, %v4299_v22  ;;  %v4080_v7 = vadd.f32 %v4079_v8, %v7892_v5 }
 0xb18   : > { %v5448_v36 = vpop.eup %5447  ;;  %4782 = vst.msk [vmem:[%s7661_s22 + $0x70] sm:$0xff] %vm852_vm0, %v4750_v29  ;;  %v4522_v23 = vadd.f32 1.0, %v5446_v13  ;;  %v4525_v32 = vmul.f32 -0.5, %v5446_v13  ;;  %v4528_v49 = vand.u32 2147483647, %v5446_v13 }
 0xb19   : > { %v4515_v47 = vmul.f32 0.6931472, %v5448_v36  ;;  %5451 = vpow2.f32 %v4348_v14  ;;  %v7957_v39 = vadd.f32 %v7954_v1, %v4080_v7  ;;  %v5450_v16 = vpop.eup %5449 }
 0xb1a   : > { %5453 = vlog2.f32 %v4522_v23  ;;  %v4526_v40 = vadd.f32 1.0, %v4525_v32  ;;  %v4201_v56 = vmul.f32 180.0, %v5450_v16  ;;  %vm4529_vm12 = vcmp.lt.f32.partialorder %v4528_v49, 0.0004427343 }
 0xb1b   : > { %v4521_v5 = vsel %vm4520_vm11, %v4518_v24, %v4515_v47  ;;  %v4268_v9 = vand.u32 2147483647, %v7957_v39  ;;  %5455 = vtanh.f32 %v7922_v27 }
 0xb1c   : > { %v4681_v52 = vadd.f32 %v4521_v5, %v4233_v46  ;;  %v4527_v20 = vmul.f32 %v5446_v13, %v4526_v40 }
 0xb1d   : > { %v4300_v6 = vsub.f32 0.0, %v4268_v9 }
 0xb1e   : > { %v4719_v51 = vsel %vm7639_vm8, %v4681_v52, %v7905_v4  ;;  %v4082_v10 = vpop.f32.mrf.mxu0  ;;  %v3882_v48 = vpop.f32.mrf.mxu3 }
 0xb1f   : > { %v5452_v61 = vpop.eup %5451  ;;  %v4751_v58 = vsel %vm7650_vm9, %v4201_v56, %v4719_v51  ;;  %v4350_v43 = vmul.f32 1.442695, %v4300_v6  ;;  %v4083_v15 = vadd.f32 %v4082_v10, %v7917_v37 }
 0xb20   : > { %v5454_v54 = vpop.eup %5453  ;;  %4783 = vst.msk [vmem:[%s7661_s22 + $0x78] sm:$0xff] %vm852_vm0, %v4751_v58  ;;  %v4531_v53 = vadd.f32 1.0, %v5452_v61  ;;  %v4534_v50 = vmul.f32 -0.5, %v5452_v61  ;;  %v4537_v42 = vand.u32 2147483647, %v5452_v61 }
 0xb21   : > { %v4524_v35 = vmul.f32 0.6931472, %v5454_v54  ;;  %5457 = vpow2.f32 %v4350_v43  ;;  %v7973_v44 = vadd.f32 %v7954_v1, %v4083_v15  ;;  %v5456_v4 = vpop.eup %5455 }
 0xb22   : > { %5459 = vlog2.f32 %v4531_v53  ;;  %v4202_v12 = vmul.f32 180.0, %v5456_v4  ;;  %v4535_v2 = vadd.f32 1.0, %v4534_v50  ;;  %vm4538_vm13 = vcmp.lt.f32.partialorder %v4537_v42, 0.0004427343 }
 0xb23   : > { %v4530_v25 = vsel %vm4529_vm12, %v4527_v20, %v4524_v35  ;;  %v4269_v37 = vand.u32 2147483647, %v7973_v44  ;;  %5461 = vtanh.f32 %v7936_v34 }
 0xb24   : > { %v4682_v21 = vadd.f32 %v4530_v25, %v4234_v19  ;;  %v4536_v17 = vmul.f32 %v5452_v61, %v4535_v2 }
 0xb25   : > { %v4301_v38 = vsub.f32 0.0, %v4269_v37 }
 0xb26   : > { %v4720_v41 = vsel %vm7639_vm8, %v4682_v21, %v7922_v27  ;;  %v4085_v31 = vpop.f32.mrf.mxu0  ;;  %v4235_v27 = vmax.f32 %v7936_v34, 0.0  ;;  %v3885_v47 = vpop.f32.mrf.mxu3 }
 0xb27   : > { %v5458_v3 = vpop.eup %5457  ;;  %v4752_v11 = vsel %vm7650_vm9, %v4202_v12, %v4720_v41  ;;  %v4352_v26 = vmul.f32 1.442695, %v4301_v38  ;;  %v4086_v28 = vadd.f32 %v4085_v31, %v7938_v63  ;;  %v4237_v12 = vmax.f32 %v7973_v44, 0.0 }
 0xb28   : > { %v5460_v62 = vpop.eup %5459  ;;  %4784 = vst.msk [vmem:[%s7661_s22 + $0x80] sm:$0xff] %vm852_vm0, %v4752_v11  ;;  %v4540_v59 = vadd.f32 1.0, %v5458_v3  ;;  %v4543_v57 = vmul.f32 -0.5, %v5458_v3  ;;  %v4546_v14 = vand.u32 2147483647, %v5458_v3 }
 0xb29   : > { %v4533_v0 = vmul.f32 0.6931472, %v5460_v62  ;;  %5463 = vpow2.f32 %v4352_v26  ;;  %v5462_v18 = vpop.eup %5461  ;;  %v7988_v33 = vadd.f32 %v7954_v1, %v4086_v28 }
 0xb2a   : > { %5465 = vlog2.f32 %v4540_v59  ;;  %v4203_v8 = vmul.f32 180.0, %v5462_v18  ;;  %v4544_v13 = vadd.f32 1.0, %v4543_v57  ;;  %vm4547_vm14 = vcmp.lt.f32.partialorder %v4546_v14, 0.0004427343 }
 0xb2b   : > { %v4539_v22 = vsel %vm4538_vm13, %v4536_v17, %v4533_v0  ;;  %5467 = vtanh.f32 %v7957_v39  ;;  %v4270_v63 = vand.u32 2147483647, %v7988_v33 }
 0xb2c   : > { %v4683_v45 = vadd.f32 %v4539_v22, %v4235_v27  ;;  %v4545_v9 = vmul.f32 %v5458_v3, %v4544_v13 }
 0xb2d   : > { %v4302_v23 = vsub.f32 0.0, %v4270_v63 }
 0xb2e   : > { %v4721_v29 = vsel %vm7639_vm8, %v4683_v45, %v7936_v34  ;;  %v4088_v32 = vpop.f32.mrf.mxu0  ;;  %v4236_v34 = vmax.f32 %v7957_v39, 0.0  ;;  %v3888_v37 = vpop.f32.mrf.mxu3 }
 0xb2f   : > { %v5464_v7 = vpop.eup %5463  ;;  %v4753_v36 = vsel %vm7650_vm9, %v4203_v8, %v4721_v29  ;;  %v4089_v46 = vadd.f32 %v4088_v32, %v7961_v55  ;;  %v4354_v40 = vmul.f32 1.442695, %v4302_v23  ;;  %v4238_v29 = vmax.f32 %v7988_v33, 0.0 }
 0xb30   : > { %v5466_v24 = vpop.eup %5465  ;;  %4785 = vst.msk [vmem:[%s7661_s22 + $0x88] sm:$0xff] %vm852_vm0, %v4753_v36  ;;  %v4549_v16 = vadd.f32 1.0, %v5464_v7  ;;  %v4552_v52 = vmul.f32 -0.5, %v5464_v7  ;;  %v4555_v43 = vand.u32 2147483647, %v5464_v7 }
 0xb31   : > { %v4542_v5 = vmul.f32 0.6931472, %v5466_v24  ;;  %v5468_v56 = vpop.eup %5467  ;;  %v8002_v6 = vadd.f32 %v7954_v1, %v4089_v46 }
 0xb32   : > { %5469 = vlog2.f32 %v4549_v16  ;;  %v4204_v10 = vmul.f32 180.0, %v5468_v56  ;;  %v4553_v55 = vadd.f32 1.0, %v4552_v52  ;;  %vm4556_vm15 = vcmp.lt.f32.partialorder %v4555_v43, 0.0004427343 }
 0xb33   : > { %v4548_v51 = vsel %vm4547_vm14, %v4545_v9, %v4542_v5  ;;  %5471 = vpow2.f32 %v4354_v40  ;;  %v4271_v61 = vand.u32 2147483647, %v8002_v6 }
 0xb34   : > { %v4684_v49 = vadd.f32 %v4548_v51, %v4236_v34  ;;  %5473 = vtanh.f32 %v7973_v44  ;;  %v4554_v19 = vmul.f32 %v5464_v7, %v4553_v55 }
 0xb35   : > { %v4303_v54 = vsub.f32 0.0, %v4271_v61 }
 0xb36   : > { %v4722_v58 = vsel %vm7639_vm8, %v4684_v49, %v7957_v39  ;;  %v4091_v20 = vpop.f32.mrf.mxu0  ;;  %v3891_v13 = vpop.f32.mrf.mxu3 }
 0xb37   : > { %v4754_v15 = vsel %vm7650_vm9, %v4204_v10, %v4722_v58  ;;  %v4092_v35 = vadd.f32 %v4091_v20, %v3882_v48  ;;  %v4356_v25 = vmul.f32 1.442695, %v4303_v54 }
 0xb38   : > { %v5470_v53 = vpop.eup %5469  ;;  %4786 = vst.msk [vmem:[%s7661_s22 + $0x90] sm:$0xff] %vm852_vm0, %v4754_v15 }
 0xb39   : > { %v5472_v50 = vpop.eup %5471  ;;  %v4551_v4 = vmul.f32 0.6931472, %v5470_v53  ;;  %v8015_v2 = vadd.f32 %v7954_v1, %v4092_v35  ;;  %5475 = vpow2.f32 %v4356_v25 }
 0xb3a   : > { %v5474_v21 = vpop.eup %5473  ;;  %v4558_v39 = vadd.f32 1.0, %v5472_v50  ;;  %v4561_v41 = vmul.f32 -0.5, %v5472_v50  ;;  %v4564_v28 = vand.u32 2147483647, %v5472_v50 }
 0xb3b   : > { %v4557_v38 = vsel %vm4556_vm15, %v4554_v19, %v4551_v4  ;;  %v4205_v48 = vmul.f32 180.0, %v5474_v21  ;;  %v4272_v3 = vand.u32 2147483647, %v8015_v2 }
 0xb3c   : > { %v4685_v42 = vadd.f32 %v4557_v38, %v4237_v12  ;;  %5477 = vlog2.f32 %v4558_v39  ;;  %v4562_v31 = vadd.f32 1.0, %v4561_v41  ;;  %vm4565_vm2 = vcmp.lt.f32.partialorder %v4564_v28, 0.0004427343 }
 0xb3d   : > { %5479 = vtanh.f32 %v7988_v33  ;;  %v4304_v62 = vsub.f32 0.0, %v4272_v3 }
 0xb3e   : > { %v4723_v11 = vsel %vm7639_vm8, %v4685_v42, %v7973_v44  ;;  %v4094_v59 = vpop.f32.mrf.mxu0  ;;  %v4563_v45 = vmul.f32 %v5472_v50, %v4562_v31  ;;  %v3894_v15 = vpop.f32.mrf.mxu3 }
 0xb3f   : > { %v4755_v26 = vsel %vm7650_vm9, %v4205_v48, %v4723_v11  ;;  %v4095_v0 = vadd.f32 %v4094_v59, %v3885_v47  ;;  %v5476_v17 = vpop.eup %5475  ;;  %v4358_v57 = vmul.f32 1.442695, %v4304_v62 }
 0xb40   : > { %4787 = vst.msk [vmem:[%s7661_s22 + $0x98] sm:$0xff] %vm852_vm0, %v4755_v26  ;;  %v4567_v27 = vadd.f32 1.0, %v5476_v17  ;;  %v4570_v8 = vmul.f32 -0.5, %v5476_v17  ;;  %v4573_v46 = vand.u32 2147483647, %v5476_v17 }
 0xb41   : > { %v8027_v22 = vadd.f32 %v7954_v1, %v4095_v0  ;;  %5481 = vpow2.f32 %v4358_v57 }
 0xb42   : > { %v5478_v18 = vpop.eup %5477  ;;  %5483 = vlog2.f32 %v4567_v27  ;;  %v4571_v32 = vadd.f32 1.0, %v4570_v8  ;;  %vm4574_vm3 = vcmp.lt.f32.partialorder %v4573_v46, 0.0004427343 }
 0xb43   : > { %v4560_v44 = vmul.f32 0.6931472, %v5478_v18  ;;  %v5480_v63 = vpop.eup %5479  ;;  %v4273_v7 = vand.u32 2147483647, %v8027_v22  ;;  %5485 = vtanh.f32 %v8002_v6 }
 0xb44   : > { %v4206_v23 = vmul.f32 180.0, %v5480_v63  ;;  %v4572_v10 = vmul.f32 %v5476_v17, %v4571_v32 }
 0xb45   : > { %v4566_v14 = vsel %vm4565_vm2, %v4563_v45, %v4560_v44  ;;  %v4305_v47 = vsub.f32 0.0, %v4273_v7 }
 0xb46   : > { %v4686_v36 = vadd.f32 %v4566_v14, %v4238_v29  ;;  %v4097_v24 = vpop.f32.mrf.mxu0  ;;  %v3897_v57 = vpop.f32.mrf.mxu3 }
 0xb47   : > { %v4098_v5 = vadd.f32 %v4097_v24, %v3888_v37  ;;  %v5482_v9 = vpop.eup %5481  ;;  %v4360_v40 = vmul.f32 1.442695, %v4305_v47 }
 0xb48   : > { %v4724_v16 = vsel %vm7639_vm8, %v4686_v36, %v7988_v33  ;;  %v5484_v56 = vpop.eup %5483  ;;  %v4576_v34 = vadd.f32 1.0, %v5482_v9  ;;  %v4579_v55 = vmul.f32 -0.5, %v5482_v9  ;;  %v4239_v33 = vmax.f32 %v8002_v6, 0.0 }
 0xb49   : > { %v4756_v52 = vsel %vm7650_vm9, %v4206_v23, %v4724_v16  ;;  %v8040_v51 = vadd.f32 %v7954_v1, %v4098_v5  ;;  %v4569_v49 = vmul.f32 0.6931472, %v5484_v56  ;;  %5487 = vpow2.f32 %v4360_v40  ;;  %v5486_v61 = vpop.eup %5485 }
 0xb4a   : > { %4788 = vst.msk [vmem:[%s7661_s22 + $0xa0] sm:$0xff] %vm852_vm0, %v4756_v52  ;;  %5489 = vlog2.f32 %v4576_v34  ;;  %v4207_v20 = vmul.f32 180.0, %v5486_v61  ;;  %v4580_v53 = vadd.f32 1.0, %v4579_v55  ;;  %v4582_v19 = vand.u32 2147483647, %v5482_v9 }
 0xb4b   : > { %v4575_v58 = vsel %vm4574_vm3, %v4572_v10, %v4569_v49  ;;  %v4274_v43 = vand.u32 2147483647, %v8040_v51  ;;  %5491 = vtanh.f32 %v8015_v2 }
 0xb4c   : > { %v4687_v54 = vadd.f32 %v4575_v58, %v4239_v33  ;;  %v4581_v48 = vmul.f32 %v5482_v9, %v4580_v53  ;;  %vm4583_vm4 = vcmp.lt.f32.partialorder %v4582_v19, 0.0004427343  ;;  %v4242_v53 = vmax.f32 %v8040_v51, 0.0 }
 0xb4d   : > { %v4306_v35 = vsub.f32 0.0, %v4274_v43 }
 0xb4e   : > { %v4100_v50 = vpop.f32.mrf.mxu0  ;;  %v4725_v4 = vsel %vm7639_vm8, %v4687_v54, %v8002_v6  ;;  %v4240_v6 = vmax.f32 %v8015_v2, 0.0  ;;  %v3900_v61 = vpop.f32.mrf.mxu3 }
 0xb4f   : > { %v4101_v25 = vadd.f32 %v4100_v50, %v3891_v13  ;;  %v5488_v37 = vpop.eup %5487  ;;  %v4757_v21 = vsel %vm7650_vm9, %v4207_v20, %v4725_v4  ;;  %v4362_v12 = vmul.f32 1.442695, %v4306_v35 }
 0xb50   : > { %v5490_v39 = vpop.eup %5489  ;;  %4789 = vst.msk [vmem:[%s7661_s22 + $0xa8] sm:$0xff] %vm852_vm0, %v4757_v21  ;;  %v4585_v38 = vadd.f32 1.0, %v5488_v37  ;;  %v4588_v3 = vmul.f32 -0.5, %v5488_v37  ;;  %v4591_v27 = vand.u32 2147483647, %v5488_v37 }
 0xb51   : > { %v8053_v41 = vadd.f32 %v7954_v1, %v4101_v25  ;;  %v4578_v42 = vmul.f32 0.6931472, %v5490_v39  ;;  %5493 = vpow2.f32 %v4362_v12  ;;  %v5492_v11 = vpop.eup %5491 }
 0xb52   : > { %5495 = vlog2.f32 %v4585_v38  ;;  %v4208_v59 = vmul.f32 180.0, %v5492_v11  ;;  %v4589_v28 = vadd.f32 1.0, %v4588_v3  ;;  %vm4592_vm5 = vcmp.lt.f32.partialorder %v4591_v27, 0.0004427343 }
 0xb53   : > { %v4584_v26 = vsel %vm4583_vm4, %v4581_v48, %v4578_v42  ;;  %v4275_v31 = vand.u32 2147483647, %v8053_v41  ;;  %5497 = vtanh.f32 %v8027_v22 }
 0xb54   : > { %v4688_v62 = vadd.f32 %v4584_v26, %v4240_v6  ;;  %v4590_v36 = vmul.f32 %v5488_v37, %v4589_v28 }
 0xb55   : > { %v4307_v0 = vsub.f32 0.0, %v4275_v31 }
 0xb56   : > { %v4103_v17 = vpop.f32.mrf.mxu0  ;;  %v4726_v18 = vsel %vm7639_vm8, %v4688_v62, %v8015_v2  ;;  %v4241_v2 = vmax.f32 %v8027_v22, 0.0  ;;  %v3903_v28 = vpop.f32.mrf.mxu3 }
 0xb57   : > { %v4104_v44 = vadd.f32 %v4103_v17, %v3894_v15  ;;  %v5494_v45 = vpop.eup %5493  ;;  %v4758_v8 = vsel %vm7650_vm9, %v4208_v59, %v4726_v18  ;;  %v4364_v13 = vmul.f32 1.442695, %v4307_v0  ;;  %v4243_v0 = vmax.f32 %v8053_v41, 0.0 }
 0xb58   : > { %v5496_v63 = vpop.eup %5495  ;;  %4790 = vst.msk [vmem:[%s7661_s22 + $0xb0] sm:$0xff] %vm852_vm0, %v4758_v8  ;;  %v4594_v29 = vadd.f32 1.0, %v5494_v45  ;;  %v4597_v23 = vmul.f32 -0.5, %v5494_v45  ;;  %v4600_v56 = vand.u32 2147483647, %v5494_v45 }
 0xb59   : > { %v8066_v14 = vadd.f32 %v7954_v1, %v4104_v44  ;;  %v4587_v7 = vmul.f32 0.6931472, %v5496_v63  ;;  %5499 = vpow2.f32 %v4364_v13  ;;  %v5498_v32 = vpop.eup %5497 }
 0xb5a   : > { %5501 = vlog2.f32 %v4594_v29  ;;  %v4209_v46 = vmul.f32 180.0, %v5498_v32  ;;  %v4598_v5 = vadd.f32 1.0, %v4597_v23  ;;  %vm4601_vm6 = vcmp.lt.f32.partialorder %v4600_v56, 0.0004427343 }
 0xb5b   : > { %v4593_v47 = vsel %vm4592_vm5, %v4590_v36, %v4587_v7  ;;  %v4276_v24 = vand.u32 2147483647, %v8066_v14  ;;  %5503 = vtanh.f32 %v8040_v51 }
 0xb5c   : > { %v4689_v16 = vadd.f32 %v4593_v47, %v4241_v2  ;;  %v4599_v54 = vmul.f32 %v5494_v45, %v4598_v5 }
 0xb5d   : > { %v4308_v9 = vsub.f32 0.0, %v4276_v24 }
 0xb5e   : > { %v4106_v52 = vpop.f32.mrf.mxu0  ;;  %v4727_v40 = vsel %vm7639_vm8, %v4689_v16, %v8027_v22 }
 0xb5f   : > { %v4107_v34 = vadd.f32 %v4106_v52, %v3897_v57  ;;  %v5500_v49 = vpop.eup %5499  ;;  %v4759_v10 = vsel %vm7650_vm9, %v4209_v46, %v4727_v40  ;;  %v4366_v55 = vmul.f32 1.442695, %v4308_v9  ;;  %v3906_v40 = vpop.f32.mrf.mxu3 }
 0xb60   : > { %v5502_v33 = vpop.eup %5501  ;;  %4791 = vst.msk [vmem:[%s7661_s22 + $0xb8] sm:$0xff] %vm852_vm0, %v4759_v10  ;;  %v4603_v58 = vadd.f32 1.0, %v5500_v49  ;;  %v4606_v20 = vmul.f32 -0.5, %v5500_v49  ;;  %v4609_v39 = vand.u32 2147483647, %v5500_v49 }
 0xb61   : > { %v8079_v43 = vadd.f32 %v7954_v1, %v4107_v34  ;;  %v4596_v15 = vmul.f32 0.6931472, %v5502_v33  ;;  %5505 = vpow2.f32 %v4366_v55  ;;  %v5504_v22 = vpop.eup %5503 }
 0xb62   : > { %5507 = vlog2.f32 %v4603_v58  ;;  %v4210_v19 = vmul.f32 180.0, %v5504_v22  ;;  %v4607_v25 = vadd.f32 1.0, %v4606_v20  ;;  %vm4610_vm7 = vcmp.lt.f32.partialorder %v4609_v39, 0.0004427343 }
 0xb63   : > { %v4602_v35 = vsel %vm4601_vm6, %v4599_v54, %v4596_v15  ;;  %v4277_v50 = vand.u32 2147483647, %v8079_v43  ;;  %5509 = vtanh.f32 %v8053_v41 }
 0xb64   : > { %v4690_v4 = vadd.f32 %v4602_v35, %v4242_v53  ;;  %v4608_v62 = vmul.f32 %v5500_v49, %v4607_v25 }
 0xb65   : > { %v4309_v37 = vsub.f32 0.0, %v4277_v50 }
 0xb66   : > { %v4109_v21 = vpop.f32.mrf.mxu0  ;;  %v4728_v12 = vsel %vm7639_vm8, %v4690_v4, %v8040_v51 }
 0xb67   : > { %v4110_v38 = vadd.f32 %v4109_v21, %v3900_v61  ;;  %v5506_v42 = vpop.eup %5505  ;;  %v4760_v48 = vsel %vm7650_vm9, %v4210_v19, %v4728_v12  ;;  %v4368_v3 = vmul.f32 1.442695, %v4309_v37 }
 0xb68   : > { %v5508_v11 = vpop.eup %5507  ;;  %4792 = vst.msk [vmem:[%s7661_s22 + $0xc0] sm:$0xff] %vm852_vm0, %v4760_v48  ;;  %v4612_v6 = vadd.f32 1.0, %v5506_v42  ;;  %v4615_v59 = vmul.f32 -0.5, %v5506_v42  ;;  %v4618_v63 = vand.u32 2147483647, %v5506_v42  ;;  %v3909_v48 = vpop.f32.mrf.mxu3 }
 0xb69   : > { %v8092_v26 = vadd.f32 %v7954_v1, %v4110_v38  ;;  %v4605_v31 = vmul.f32 0.6931472, %v5508_v11  ;;  %5511 = vpow2.f32 %v4368_v3  ;;  %v5510_v51 = vpop.eup %5509 }
 0xb6a   : > { %5513 = vlog2.f32 %v4612_v6  ;;  %v4211_v27 = vmul.f32 180.0, %v5510_v51  ;;  %v4616_v44 = vadd.f32 1.0, %v4615_v59  ;;  %vm4619_vm1 = vcmp.lt.f32.partialorder %v4618_v63, 0.0004427343 }
 0xb6b   : > { %v4611_v17 = vsel %vm4610_vm7, %v4608_v62, %v4605_v31  ;;  %v4278_v57 = vand.u32 2147483647, %v8092_v26  ;;  %5515 = vtanh.f32 %v8066_v14 }
 0xb6c   : > { %v4691_v18 = vadd.f32 %v4611_v17, %v4243_v0  ;;  %v4617_v16 = vmul.f32 %v5506_v42, %v4616_v44 }
 0xb6d   : > { %v4310_v45 = vsub.f32 0.0, %v4278_v57 }
 0xb6e   : > { %v4112_v8 = vpop.f32.mrf.mxu0  ;;  %v4729_v13 = vsel %vm7639_vm8, %v4691_v18, %v8053_v41  ;;  %v4244_v41 = vmax.f32 %v8066_v14, 0.0 }
 0xb6f   : > { %v4113_v29 = vadd.f32 %v4112_v8, %v3903_v28  ;;  %v5512_v7 = vpop.eup %5511  ;;  %v4761_v36 = vsel %vm7650_vm9, %v4211_v27, %v4729_v13  ;;  %v4370_v23 = vmul.f32 1.442695, %v4310_v45 }
 0xb70   : > { %v5514_v32 = vpop.eup %5513  ;;  %4793 = vst.msk [vmem:[%s7661_s22 + $0xc8] sm:$0xff] %vm852_vm0, %v4761_v36  ;;  %v4621_v2 = vadd.f32 1.0, %v5512_v7  ;;  %v4624_v46 = vmul.f32 -0.5, %v5512_v7  ;;  %v4627_v33 = vand.u32 2147483647, %v5512_v7 }
 0xb71   : > { %v8105_v47 = vadd.f32 %v7954_v1, %v4113_v29  ;;  %v4614_v24 = vmul.f32 0.6931472, %v5514_v32  ;;  %5517 = vpow2.f32 %v4370_v23  ;;  %v5516_v5 = vpop.eup %5515 }
 0xb72   : > { %5519 = vlog2.f32 %v4621_v2  ;;  %v4212_v34 = vmul.f32 180.0, %v5516_v5  ;;  %v4625_v49 = vadd.f32 1.0, %v4624_v46  ;;  %vm4628_vm10 = vcmp.lt.f32.partialorder %v4627_v33, 0.0004427343 }
 0xb73   : > { %v4620_v9 = vsel %vm4619_vm1, %v4617_v16, %v4614_v24  ;;  %v4279_v52 = vand.u32 2147483647, %v8105_v47  ;;  %5521 = vtanh.f32 %v8079_v43 }
 0xb74   : > { %v4692_v56 = vadd.f32 %v4620_v9, %v4244_v41  ;;  %v4626_v4 = vmul.f32 %v5512_v7, %v4625_v49 }
 0xb75   : > { %v4311_v10 = vsub.f32 0.0, %v4279_v52  ;;  %v4247_v52 = vmax.f32 %v8105_v47, 0.0 }
 0xb76   : > { %v4115_v55 = vpop.f32.mrf.mxu0  ;;  %v4730_v61 = vsel %vm7639_vm8, %v4692_v56, %v8066_v14  ;;  %v4245_v14 = vmax.f32 %v8079_v43, 0.0 }
 0xb77   : > { %v4116_v58 = vadd.f32 %v4115_v55, %v3906_v40  ;;  %v5518_v15 = vpop.eup %5517  ;;  %v4762_v54 = vsel %vm7650_vm9, %v4212_v34, %v4730_v61  ;;  %v4372_v20 = vmul.f32 1.442695, %v4311_v10 }
 0xb78   : > { %v5520_v22 = vpop.eup %5519  ;;  %4794 = vst.msk [vmem:[%s7661_s22 + $0xd0] sm:$0xff] %vm852_vm0, %v4762_v54  ;;  %v4630_v53 = vadd.f32 1.0, %v5518_v15  ;;  %v4633_v19 = vmul.f32 -0.5, %v5518_v15  ;;  %v4636_v6 = vand.u32 2147483647, %v5518_v15 }
 0xb79   : > { %v8118_v35 = vadd.f32 %v7954_v1, %v4116_v58  ;;  %v4623_v50 = vmul.f32 0.6931472, %v5520_v22  ;;  %5523 = vpow2.f32 %v4372_v20  ;;  %v5522_v25 = vpop.eup %5521 }
 0xb7a   : > { %5525 = vlog2.f32 %v4630_v53  ;;  %v4213_v39 = vmul.f32 180.0, %v5522_v25  ;;  %v4634_v38 = vadd.f32 1.0, %v4633_v19  ;;  %vm4637_vm11 = vcmp.lt.f32.partialorder %v4636_v6, 0.0004427343 }
 0xb7b   : > { %v4629_v37 = vsel %vm4628_vm10, %v4626_v4, %v4623_v50  ;;  %v4280_v21 = vand.u32 2147483647, %v8118_v35  ;;  %5527 = vtanh.f32 %v8092_v26  ;;  %v4248_v53 = vmax.f32 %v8118_v35, 0.0 }
 0xb7c   : > { %v4693_v12 = vadd.f32 %v4629_v37, %v4245_v14  ;;  %v4635_v18 = vmul.f32 %v5518_v15, %v4634_v38 }
 0xb7d   : > { %v4312_v42 = vsub.f32 0.0, %v4280_v21 }
 0xb7e   : > { %v4118_v3 = vpop.f32.mrf.mxu0  ;;  %v4731_v11 = vsel %vm7639_vm8, %v4693_v12, %v8079_v43  ;;  %v4246_v43 = vmax.f32 %v8092_v26, 0.0 }
 0xb7f   : > { %v4119_v31 = vadd.f32 %v4118_v3, %v3909_v48  ;;  %v5524_v62 = vpop.eup %5523  ;;  %v4763_v59 = vsel %vm7650_vm9, %v4213_v39, %v4731_v11  ;;  %v4374_v28 = vmul.f32 1.442695, %v4312_v42 }
 0xb80   : > { %v5526_v51 = vpop.eup %5525  ;;  %4795 = vst.msk [vmem:[%s7661_s22 + $0xd8] sm:$0xff] %vm852_vm0, %v4763_v59  ;;  %v4639_v0 = vadd.f32 1.0, %v5524_v62  ;;  %v4642_v27 = vmul.f32 -0.5, %v5524_v62  ;;  %v4645_v36 = vand.u32 2147483647, %v5524_v62 }
 0xb81   : > { %v8131_v17 = vadd.f32 %v7954_v1, %v4119_v31  ;;  %v4632_v57 = vmul.f32 0.6931472, %v5526_v51  ;;  %5529 = vpow2.f32 %v4374_v28  ;;  %v5528_v44 = vpop.eup %5527 }
 0xb82   : > { %5531 = vlog2.f32 %v4639_v0  ;;  %v4214_v63 = vmul.f32 180.0, %v5528_v44  ;;  %v4643_v29 = vadd.f32 1.0, %v4642_v27  ;;  %vm4646_vm12 = vcmp.lt.f32.partialorder %v4645_v36, 0.0004427343 }
 0xb83   : > { %v4638_v45 = vsel %vm4637_vm11, %v4635_v18, %v4632_v57  ;;  %v4281_v8 = vand.u32 2147483647, %v8131_v17  ;;  %5533 = vtanh.f32 %v8105_v47  ;;  %v4249_v42 = vmax.f32 %v8131_v17, 0.0 }
 0xb84   : > { %v4694_v13 = vadd.f32 %v4638_v45, %v4246_v43  ;;  %v4644_v5 = vmul.f32 %v5524_v62, %v4643_v29 }
 0xb85   : > { %v4313_v1 = vsub.f32 0.0, %v4281_v8 }
 0xb86   : > { %v4732_v7 = vsel %vm7639_vm8, %v4694_v13, %v8092_v26 }
 0xb87   : > { %v5530_v23 = vpop.eup %5529  ;;  %v4764_v32 = vsel %vm7650_vm9, %v4214_v63, %v4732_v7  ;;  %v4376_v2 = vmul.f32 1.442695, %v4313_v1 }
 0xb88   : > { %v5532_v24 = vpop.eup %5531  ;;  %4796 = vst.msk [vmem:[%s7661_s22 + $0xe0] sm:$0xff] %vm852_vm0, %v4764_v32  ;;  %v4648_v16 = vadd.f32 1.0, %v5530_v23  ;;  %v4651_v41 = vmul.f32 -0.5, %v5530_v23  ;;  %v4654_v10 = vand.u32 2147483647, %v5530_v23 }
 0xb89   : > { %v4641_v46 = vmul.f32 0.6931472, %v5532_v24  ;;  %5535 = vpow2.f32 %v4376_v2  ;;  %v5534_v9 = vpop.eup %5533 }
 0xb8a   : > { %5537 = vlog2.f32 %v4648_v16  ;;  %v4215_v56 = vmul.f32 180.0, %v5534_v9  ;;  %v4652_v34 = vadd.f32 1.0, %v4651_v41  ;;  %vm4655_vm13 = vcmp.lt.f32.partialorder %v4654_v10, 0.0004427343 }
 0xb8b   : > { %v4647_v26 = vsel %vm4646_vm12, %v4644_v5, %v4641_v46  ;;  %5539 = vtanh.f32 %v8118_v35 }
 0xb8c   : > { %v4695_v40 = vadd.f32 %v4647_v26, %v4247_v52  ;;  %v4653_v54 = vmul.f32 %v5530_v23, %v4652_v34 }
 0xb8e   : > { %v4733_v49 = vsel %vm7639_vm8, %v4695_v40, %v8105_v47 }
 0xb8f   : > { %v5536_v55 = vpop.eup %5535  ;;  %v4765_v61 = vsel %vm7650_vm9, %v4215_v56, %v4733_v49 }
 0xb90   : > { %v5538_v33 = vpop.eup %5537  ;;  %4797 = vst.msk [vmem:[%s7661_s22 + $0xe8] sm:$0xff] %vm852_vm0, %v4765_v61  ;;  %v4657_v58 = vadd.f32 1.0, %v5536_v55  ;;  %v4660_v20 = vmul.f32 -0.5, %v5536_v55  ;;  %v4663_v14 = vand.u32 2147483647, %v5536_v55 }
 0xb91   : > { %v4650_v15 = vmul.f32 0.6931472, %v5538_v33  ;;  %v5540_v22 = vpop.eup %5539 }
 0xb92   : > { %5541 = vlog2.f32 %v4657_v58  ;;  %v4216_v4 = vmul.f32 180.0, %v5540_v22  ;;  %v4661_v19 = vadd.f32 1.0, %v4660_v20  ;;  %vm4664_vm14 = vcmp.lt.f32.partialorder %v4663_v14, 0.0004427343 }
 0xb93   : > { %v4656_v50 = vsel %vm4655_vm13, %v4653_v54, %v4650_v15  ;;  %5543 = vtanh.f32 %v8131_v17 }
 0xb94   : > { %v4696_v47 = vadd.f32 %v4656_v50, %v4248_v53  ;;  %v4662_v39 = vmul.f32 %v5536_v55, %v4661_v19 }
 0xb96   : > { %v4734_v25 = vsel %vm7639_vm8, %v4696_v47, %v8118_v35 }
 0xb97   : > { %v4766_v37 = vsel %vm7650_vm9, %v4216_v4, %v4734_v25 }
 0xb98   : > { %v5542_v21 = vpop.eup %5541  ;;  %4798 = vst.msk [vmem:[%s7661_s22 + $0xf0] sm:$0xff] %vm852_vm0, %v4766_v37 }
 0xb99   : > { %v4659_v12 = vmul.f32 0.6931472, %v5542_v21  ;;  %v5544_v38 = vpop.eup %5543 }
 0xb9a   : > { %v4217_v11 = vmul.f32 180.0, %v5544_v38 }
 0xb9b   : > { %v4665_v48 = vsel %vm4664_vm14, %v4662_v39, %v4659_v12 }
 0xb9c   : > { %v4697_v3 = vadd.f32 %v4665_v48, %v4249_v42 }
 0xb9e   : > { %v4735_v35 = vsel %vm7639_vm8, %v4697_v3, %v8131_v17 }
 0xb9f   : > { %v4767_v6 = vsel %vm7650_vm9, %v4217_v11, %v4735_v35 }
 0xba0   : > { %4799 = vst.msk [vmem:[%s7661_s22 + $0xf8] sm:$0xff] %vm852_vm0, %v4767_v6 }
 0xba1 PF: > { %s13_s12 = sadd.s32 1, %s5625_s12  }
 0xba2   : > { %p10_p5 = scmp.ge.s32.totalorder %s13_s12, 4  }
 0xba4   :  { %12 = sbr.rel (!%p10_p5) target bundleno = 1 (0x1), region = 65 }

</bundles_post_ra>
